<compile_context>
chip_gen: v7x
topology: tpu7x:2x2x1
jax: 0.10.0
libtpu: 0.0.40
codegen_flags: <defaults>
</compile_context>

<pallas_src>
import jax
import jax.numpy as jnp
from jax import lax
from jax.experimental import pallas as pl
from jax.experimental.pallas import tpu as pltpu

HID = 39          # hidden size == input size of each LSTM block
GP = 128          # per-gate lane padding (vreg lane width) -> aligned gate slices
NG = 8            # 4 gates x 2 directions


def _bilstm_kernel(x_ref,      # (T*Bp, I)     time-major input, batch padded to Bp
                   w_in_ref,   # (I, NG*GP)    [i,f,g,o]_fwd | [i,f,g,o]_bwd (lane padded)
                   b_in_ref,   # (1, NG*GP)    b_ih + b_hh, same layout
                   w_hh_ref,   # (2*GP, NG*GP) block "diagonal": rows 0:H fwd, GP:GP+H bwd
                   out_ref,    # (T, Bp, 2*GP) [h_fwd(t) | h_bwd(T-1-t)] per row t
                   gx_scr):    # (T*Bp, NG*GP) scratch: precomputed input-side gates
    T, Bp, _ = out_ref.shape

    # (1) Hoisted input projection: one big MXU matmul for all timesteps, both
    #     directions and all four gates. Nothing x-dependent remains in the loop.
    gx_scr[...] = (
        jnp.dot(x_ref[...], w_in_ref[...], preferred_element_type=jnp.float32)
        + b_in_ref[...])

    w_hh = w_hh_ref[...]                        # hoist recurrent-weight load
    h = jnp.zeros((Bp, 2 * GP), jnp.float32)    # [h_fwd(128) | h_bwd(128)]
    c = jnp.zeros((Bp, 2 * GP), jnp.float32)

    def lstm_gates(pre, c_prev):                # PyTorch gate order i, f, g, o
        i = jax.nn.sigmoid(pre[:, 0 * GP:1 * GP])
        f = jax.nn.sigmoid(pre[:, 1 * GP:2 * GP])
        g = jnp.tanh(pre[:, 2 * GP:3 * GP])
        o = jax.nn.sigmoid(pre[:, 3 * GP:4 * GP])
        c_new = f * c_prev + i * g
        return o * jnp.tanh(c_new), c_new

    # (2) Fused fwd+bwd recurrence, fully unrolled (T is small & static).
    for s in range(T):
        rec = jnp.dot(h, w_hh, preferred_element_type=jnp.float32)   # (Bp, NG*GP)
        pre_f = gx_scr[s * Bp:(s + 1) * Bp, 0:4 * GP] + rec[:, 0:4 * GP]
        pre_r = (gx_scr[(T - 1 - s) * Bp:(T - s) * Bp, 4 * GP:NG * GP]
                 + rec[:, 4 * GP:NG * GP])
        h_f, c_f = lstm_gates(pre_f, c[:, 0:GP])
        h_r, c_r = lstm_gates(pre_r, c[:, GP:2 * GP])
        h = jnp.concatenate([h_f, h_r], axis=1)        # 128-aligned concat
        c = jnp.concatenate([c_f, c_r], axis=1)
        # Module's post-LSTM time flip => backward state of time T-1-s also
        # belongs at output row s, so one dense (Bp, 256) store covers both dirs.
        out_ref[s] = h


@jax.jit
def lstm_forward(x_flat, packed):
    """Forward of the PyTorch `LSTM` block: (B, T*39) -> (B, T*78)."""
    w_in, b_in, w_hh = packed
    B, L = x_flat.shape
    T = L // HID
    Bp = ((B + 7) // 8) * 8                     # pad batch to a sublane multiple

    x = x_flat.reshape(B, T, HID)
    x = jnp.pad(x, ((0, Bp - B), (0, 0), (0, 0)))
    x_tb = jnp.transpose(x, (1, 0, 2)).reshape(T * Bp, HID)   # time-major rows

    out = pl.pallas_call(
        _bilstm_kernel,
        out_shape=jax.ShapeDtypeStruct((T, Bp, 2 * GP), jnp.float32),
        grid_spec=pltpu.PrefetchScalarGridSpec(
            num_scalar_prefetch=0,
            grid=(1,),
            in_specs=[pl.BlockSpec((T * Bp, HID), lambda i: (0, 0)),
                      pl.BlockSpec((HID, NG * GP), lambda i: (0, 0)),
                      pl.BlockSpec((1, NG * GP), lambda i: (0, 0)),
                      pl.BlockSpec((2 * GP, NG * GP), lambda i: (0, 0))],
            out_specs=pl.BlockSpec((T, Bp, 2 * GP), lambda i: (0, 0, 0)),
            scratch_shapes=[pltpu.VMEM((T * Bp, NG * GP), jnp.float32)],
        ),
        compiler_params=pltpu.CompilerParams(
            dimension_semantics=("arbitrary",)),
    )(x_tb, w_in, b_in, w_hh)

    # Strip batch/lane padding and flatten to the module's (B, T*78) layout
    # (flip already folded into the kernel; XLA fuses these slices into 1 copy).
    out = out[:, :B, :]                                         # (T, B, 2*GP)
    y = jnp.concatenate([out[..., :HID], out[..., GP:GP + HID]], axis=-1)
    return jnp.transpose(y, (1, 0, 2)).reshape(B, T * 2 * HID)


# ----------------------- parameter packing & init --------------------------

def _pad_gate_lanes(w):
    """Split last dim into 4 H-wide gate blocks and pad each to GP lanes."""
    blocks = []
    for g in range(4):
        blk = w[..., g * HID:(g + 1) * HID]
        blocks.append(jnp.pad(blk, [(0, 0)] * (w.ndim - 1) + [(0, GP - HID)]))
    return jnp.concatenate(blocks, axis=-1)                     # (..., 4*GP)


def pack_params(params):
    """Pack (H,4H)/(1,4H) per-direction params into the lane-aligned layout."""
    wih_f, whh_f, b_f, wih_r, whh_r, b_r = params
    w_in = jnp.concatenate([_pad_gate_lanes(wih_f), _pad_gate_lanes(wih_r)], axis=-1)
    b_in = jnp.concatenate([_pad_gate_lanes(b_f), _pad_gate_lanes(b_r)], axis=-1)
    w_hh = jnp.zeros((2 * GP, NG * GP), jnp.float32)
    w_hh = w_hh.at[0:HID, 0:4 * GP].set(_pad_gate_lanes(whh_f))
    w_hh = w_hh.at[GP:GP + HID, 4 * GP:NG * GP].set(_pad_gate_lanes(whh_r))
    return w_in, b_in, w_hh


def init_params(key):
    """Deterministic init matching PyTorch LSTM param shapes (transposed, bias summed)."""
    H = HID
    k = 1.0 / jnp.sqrt(jnp.float32(H))
    keys = jax.random.split(key, 8)
    u = lambda kk, shp: jax.random.uniform(kk, shp, jnp.float32, -k, k)
    wih_f = u(keys[0], (H, 4 * H))
    whh_f = u(keys[1], (H, 4 * H))
    b_f = u(keys[2], (1, 4 * H)) + u(keys[3], (1, 4 * H))
    wih_r = u(keys[4], (H, 4 * H))
    whh_r = u(keys[5], (H, 4 * H))
    b_r = u(keys[6], (1, 4 * H)) + u(keys[7], (1, 4 * H))
    return (wih_f, whh_f, b_f, wih_r, whh_r, b_r)


# ------------------------------ reference ----------------------------------

def _reference(x_flat, params):
    """Pure-JAX reference (lax.scan) of the same forward, for validation."""
    B = x_flat.shape[0]
    T = x_flat.shape[1] // HID
    H = HID
    x = x_flat.reshape(B, T, H)
    (wih_f, whh_f, b_f, wih_r, whh_r, b_r) = params

    def run_dir(xs, wih, whh, b):  # xs: (T, B, H)
        def step(carry, x_t):
            h, c = carry
            g = x_t @ wih + h @ whh + b
            i = jax.nn.sigmoid(g[:, 0 * H:1 * H])
            f = jax.nn.sigmoid(g[:, 1 * H:2 * H])
            gg = jnp.tanh(g[:, 2 * H:3 * H])
            o = jax.nn.sigmoid(g[:, 3 * H:4 * H])
            c = f * c + i * gg
            h = o * jnp.tanh(c)
            return (h, c), h
        h0 = jnp.zeros((B, H), jnp.float32)
        _, hs = lax.scan(step, (h0, h0), xs)
        return hs  # (T, B, H)

    xs = jnp.transpose(x, (1, 0, 2))
    hf = run_dir(xs, wih_f, whh_f, b_f)
    hr = run_dir(xs[::-1], wih_r, whh_r, b_r)[::-1]
    out_f = jnp.transpose(hf, (1, 0, 2))
    out_r = jnp.transpose(hr, (1, 0, 2))
    y = jnp.concatenate([out_f, jnp.flip(out_r, axis=1)], axis=2)
    return y.reshape(B, T * 2 * H)


if __name__ == "__main__":
    key = jax.random.PRNGKey(0)
    pkey, xkey = jax.random.split(key)

    B, T = 2, 8
    params = init_params(pkey)
    packed = pack_params(params)
    x = jax.random.normal(xkey, (B, T * HID), jnp.float32)      # (2, 312)

    out = lstm_forward(x, packed)
    out = jax.block_until_ready(out)

    ref = _reference(x, params)
    assert out.shape == (B, T * 2 * HID), out.shape
    assert jnp.allclose(out, ref, rtol=1e-3, atol=1e-3), \
        float(jnp.max(jnp.abs(out - ref)))

    print("KERNEL_OK")
</pallas_src>

<mosaic_0001>
module attributes {stable_mosaic.version = 11 : i64} {
  func.func @_bilstm_kernel(%arg0: i32, %arg1: memref<64x39xf32, #tpu.memory_space<vmem>>, %arg2: memref<39x1024xf32, #tpu.memory_space<vmem>>, %arg3: memref<1x1024xf32, #tpu.memory_space<vmem>>, %arg4: memref<256x1024xf32, #tpu.memory_space<vmem>>, %arg5: memref<8x8x256xf32, #tpu.memory_space<vmem>>, %arg6: memref<64x1024xf32, #tpu.memory_space<vmem>>) attributes {dimension_semantics = [#tpu.dimension_semantics<arbitrary>], iteration_bounds = array<i64: 1>, scalar_prefetch = 0 : i64, scratch_operands = 1 : i64, tpu.core_type = #tpu.core_type<tc>, window_params = [{pipeline_mode = #tpu.pipeline_mode<synchronous>, transform_indices = @transform_0, window_bounds = array<i64: 64, 39>}, {pipeline_mode = #tpu.pipeline_mode<synchronous>, transform_indices = @transform_1, window_bounds = array<i64: 39, 1024>}, {pipeline_mode = #tpu.pipeline_mode<synchronous>, transform_indices = @transform_2, window_bounds = array<i64: 1, 1024>}, {pipeline_mode = #tpu.pipeline_mode<synchronous>, transform_indices = @transform_3, window_bounds = array<i64: 256, 1024>}, {pipeline_mode = #tpu.pipeline_mode<synchronous>, transform_indices = @transform_4, window_bounds = array<i64: 8, 8, 256>}]} {
    %c0 = arith.constant 0 : index
    %c0_0 = arith.constant 0 : index
    %0 = vector.load %arg1[%c0, %c0_0] : memref<64x39xf32, #tpu.memory_space<vmem>>, vector<64x39xf32>
    %c0_1 = arith.constant 0 : index
    %c0_2 = arith.constant 0 : index
    %1 = vector.load %arg2[%c0_1, %c0_2] : memref<39x1024xf32, #tpu.memory_space<vmem>>, vector<39x1024xf32>
    %cst = arith.constant dense<0.000000e+00> : vector<64x1024xf32>
    %2 = tpu.matmul %0, %1, %cst {dimension_numbers = #tpu.dot_dimension_numbers<[1], [0], [0], [1], [0, 0, 1, 1], [], []>} : vector<64x39xf32>, vector<39x1024xf32>, vector<64x1024xf32> -> vector<64x1024xf32>
    %c0_3 = arith.constant 0 : index
    %c0_4 = arith.constant 0 : index
    %3 = vector.load %arg3[%c0_3, %c0_4] : memref<1x1024xf32, #tpu.memory_space<vmem>>, vector<1x1024xf32>
    %4 = vector.broadcast %3 : vector<1x1024xf32> to vector<64x1024xf32>
    %5 = arith.addf %2, %4 : vector<64x1024xf32>
    %c0_5 = arith.constant 0 : index
    %c0_6 = arith.constant 0 : index
    %6 = vector.load %arg6[%c0_5, %c0_6] : memref<64x1024xf32, #tpu.memory_space<vmem>>, vector<64x1024xf32>
    tpu.vector_store %arg6[%c0_5, %c0_6], %5 {strides = array<i32>} : memref<64x1024xf32, #tpu.memory_space<vmem>>, vector<64x1024xf32>,
    %c0_7 = arith.constant 0 : index
    %c0_8 = arith.constant 0 : index
    %7 = vector.load %arg4[%c0_7, %c0_8] : memref<256x1024xf32, #tpu.memory_space<vmem>>, vector<256x1024xf32>
    %cst_9 = arith.constant 0.000000e+00 : f32
    %8 = vector.broadcast %cst_9 : f32 to vector<8x256xf32>
    %cst_10 = arith.constant 0.000000e+00 : f32
    %9 = vector.broadcast %cst_10 : f32 to vector<8x256xf32>
    %cst_11 = arith.constant dense<0.000000e+00> : vector<8x1024xf32>
    %10 = tpu.matmul %8, %7, %cst_11 {dimension_numbers = #tpu.dot_dimension_numbers<[1], [0], [0], [1], [0, 0, 1, 1], [], []>} : vector<8x256xf32>, vector<256x1024xf32>, vector<8x1024xf32> -> vector<8x1024xf32>
    %c0_12 = arith.constant 0 : index
    %c0_13 = arith.constant 0 : index
    %11 = vector.load %arg6[%c0_12, %c0_13] : memref<64x1024xf32, #tpu.memory_space<vmem>>, vector<8x512xf32>
    %12 = vector.extract_strided_slice %10 {offsets = [0, 0], sizes = [8, 512], strides = [1, 1]} : vector<8x1024xf32> to vector<8x512xf32>
    %13 = arith.addf %11, %12 : vector<8x512xf32>
    %c56 = arith.constant 56 : index
    %c512 = arith.constant 512 : index
    %14 = vector.load %arg6[%c56, %c512] : memref<64x1024xf32, #tpu.memory_space<vmem>>, vector<8x512xf32>
    %15 = vector.extract_strided_slice %10 {offsets = [0, 512], sizes = [8, 512], strides = [1, 1]} : vector<8x1024xf32> to vector<8x512xf32>
    %16 = arith.addf %14, %15 : vector<8x512xf32>
    %17 = vector.extract_strided_slice %9 {offsets = [0, 0], sizes = [8, 128], strides = [1, 1]} : vector<8x256xf32> to vector<8x128xf32>
    %18 = vector.extract_strided_slice %13 {offsets = [0, 0], sizes = [8, 128], strides = [1, 1]} : vector<8x512xf32> to vector<8x128xf32>
    %19 = arith.negf %18 : vector<8x128xf32>
    %20 = math.exp %19 : vector<8x128xf32>
    %cst_14 = arith.constant 1.000000e+00 : f32
    %21 = vector.broadcast %cst_14 : f32 to vector<8x128xf32>
    %22 = arith.addf %21, %20 : vector<8x128xf32>
    %23 = arith.divf %21, %22 : vector<8x128xf32>
    %24 = vector.extract_strided_slice %13 {offsets = [0, 128], sizes = [8, 128], strides = [1, 1]} : vector<8x512xf32> to vector<8x128xf32>
    %25 = arith.negf %24 : vector<8x128xf32>
    %26 = math.exp %25 : vector<8x128xf32>
    %cst_15 = arith.constant 1.000000e+00 : f32
    %27 = vector.broadcast %cst_15 : f32 to vector<8x128xf32>
    %28 = arith.addf %27, %26 : vector<8x128xf32>
    %29 = arith.divf %27, %28 : vector<8x128xf32>
    %30 = vector.extract_strided_slice %13 {offsets = [0, 256], sizes = [8, 128], strides = [1, 1]} : vector<8x512xf32> to vector<8x128xf32>
    %31 = math.tanh %30 : vector<8x128xf32>
    %32 = vector.extract_strided_slice %13 {offsets = [0, 384], sizes = [8, 128], strides = [1, 1]} : vector<8x512xf32> to vector<8x128xf32>
    %33 = arith.negf %32 : vector<8x128xf32>
    %34 = math.exp %33 : vector<8x128xf32>
    %cst_16 = arith.constant 1.000000e+00 : f32
    %35 = vector.broadcast %cst_16 : f32 to vector<8x128xf32>
    %36 = arith.addf %35, %34 : vector<8x128xf32>
    %37 = arith.divf %35, %36 : vector<8x128xf32>
    %38 = arith.mulf %29, %17 : vector<8x128xf32>
    %39 = arith.mulf %23, %31 : vector<8x128xf32>
    %40 = arith.addf %38, %39 : vector<8x128xf32>
    %41 = math.tanh %40 : vector<8x128xf32>
    %42 = arith.mulf %37, %41 : vector<8x128xf32>
    %43 = vector.extract_strided_slice %9 {offsets = [0, 128], sizes = [8, 128], strides = [1, 1]} : vector<8x256xf32> to vector<8x128xf32>
    %44 = vector.extract_strided_slice %16 {offsets = [0, 0], sizes = [8, 128], strides = [1, 1]} : vector<8x512xf32> to vector<8x128xf32>
    %45 = arith.negf %44 : vector<8x128xf32>
    %46 = math.exp %45 : vector<8x128xf32>
    %cst_17 = arith.constant 1.000000e+00 : f32
    %47 = vector.broadcast %cst_17 : f32 to vector<8x128xf32>
    %48 = arith.addf %47, %46 : vector<8x128xf32>
    %49 = arith.divf %47, %48 : vector<8x128xf32>
    %50 = vector.extract_strided_slice %16 {offsets = [0, 128], sizes = [8, 128], strides = [1, 1]} : vector<8x512xf32> to vector<8x128xf32>
    %51 = arith.negf %50 : vector<8x128xf32>
    %52 = math.exp %51 : vector<8x128xf32>
    %cst_18 = arith.constant 1.000000e+00 : f32
    %53 = vector.broadcast %cst_18 : f32 to vector<8x128xf32>
    %54 = arith.addf %53, %52 : vector<8x128xf32>
    %55 = arith.divf %53, %54 : vector<8x128xf32>
    %56 = vector.extract_strided_slice %16 {offsets = [0, 256], sizes = [8, 128], strides = [1, 1]} : vector<8x512xf32> to vector<8x128xf32>
    %57 = math.tanh %56 : vector<8x128xf32>
    %58 = vector.extract_strided_slice %16 {offsets = [0, 384], sizes = [8, 128], strides = [1, 1]} : vector<8x512xf32> to vector<8x128xf32>
    %59 = arith.negf %58 : vector<8x128xf32>
    %60 = math.exp %59 : vector<8x128xf32>
    %cst_19 = arith.constant 1.000000e+00 : f32
    %61 = vector.broadcast %cst_19 : f32 to vector<8x128xf32>
    %62 = arith.addf %61, %60 : vector<8x128xf32>
    %63 = arith.divf %61, %62 : vector<8x128xf32>
    %64 = arith.mulf %55, %43 : vector<8x128xf32>
    %65 = arith.mulf %49, %57 : vector<8x128xf32>
    %66 = arith.addf %64, %65 : vector<8x128xf32>
    %67 = math.tanh %66 : vector<8x128xf32>
    %68 = arith.mulf %63, %67 : vector<8x128xf32>
    %69 = tpu.concatenate %42, %68 in 1 : vector<8x128xf32>, vector<8x128xf32> -> vector<8x256xf32>
    %70 = tpu.concatenate %40, %66 in 1 : vector<8x128xf32>, vector<8x128xf32> -> vector<8x256xf32>
    %c0_20 = arith.constant 0 : index
    %c0_21 = arith.constant 0 : index
    %c0_22 = arith.constant 0 : index
    %71 = vector.load %arg5[%c0_20, %c0_21, %c0_22] : memref<8x8x256xf32, #tpu.memory_space<vmem>>, vector<1x8x256xf32>
    %72 = vector.shape_cast %71 : vector<1x8x256xf32> to vector<8x256xf32>
    %73 = vector.shape_cast %69 : vector<8x256xf32> to vector<1x8x256xf32>
    tpu.vector_store %arg5[%c0_20, %c0_21, %c0_22], %73 {strides = array<i32>} : memref<8x8x256xf32, #tpu.memory_space<vmem>>, vector<1x8x256xf32>,
    %cst_23 = arith.constant dense<0.000000e+00> : vector<8x1024xf32>
    %74 = tpu.matmul %69, %7, %cst_23 {dimension_numbers = #tpu.dot_dimension_numbers<[1], [0], [0], [1], [0, 0, 1, 1], [], []>} : vector<8x256xf32>, vector<256x1024xf32>, vector<8x1024xf32> -> vector<8x1024xf32>
    %c8 = arith.constant 8 : index
    %c0_24 = arith.constant 0 : index
    %75 = vector.load %arg6[%c8, %c0_24] : memref<64x1024xf32, #tpu.memory_space<vmem>>, vector<8x512xf32>
    %76 = vector.extract_strided_slice %74 {offsets = [0, 0], sizes = [8, 512], strides = [1, 1]} : vector<8x1024xf32> to vector<8x512xf32>
    %77 = arith.addf %75, %76 : vector<8x512xf32>
    %c48 = arith.constant 48 : index
    %c512_25 = arith.constant 512 : index
    %78 = vector.load %arg6[%c48, %c512_25] : memref<64x1024xf32, #tpu.memory_space<vmem>>, vector<8x512xf32>
    %79 = vector.extract_strided_slice %74 {offsets = [0, 512], sizes = [8, 512], strides = [1, 1]} : vector<8x1024xf32> to vector<8x512xf32>
    %80 = arith.addf %78, %79 : vector<8x512xf32>
    %81 = vector.extract_strided_slice %70 {offsets = [0, 0], sizes = [8, 128], strides = [1, 1]} : vector<8x256xf32> to vector<8x128xf32>
    %82 = vector.extract_strided_slice %77 {offsets = [0, 0], sizes = [8, 128], strides = [1, 1]} : vector<8x512xf32> to vector<8x128xf32>
    %83 = arith.negf %82 : vector<8x128xf32>
    %84 = math.exp %83 : vector<8x128xf32>
    %cst_26 = arith.constant 1.000000e+00 : f32
    %85 = vector.broadcast %cst_26 : f32 to vector<8x128xf32>
    %86 = arith.addf %85, %84 : vector<8x128xf32>
    %87 = arith.divf %85, %86 : vector<8x128xf32>
    %88 = vector.extract_strided_slice %77 {offsets = [0, 128], sizes = [8, 128], strides = [1, 1]} : vector<8x512xf32> to vector<8x128xf32>
    %89 = arith.negf %88 : vector<8x128xf32>
    %90 = math.exp %89 : vector<8x128xf32>
    %cst_27 = arith.constant 1.000000e+00 : f32
    %91 = vector.broadcast %cst_27 : f32 to vector<8x128xf32>
    %92 = arith.addf %91, %90 : vector<8x128xf32>
    %93 = arith.divf %91, %92 : vector<8x128xf32>
    %94 = vector.extract_strided_slice %77 {offsets = [0, 256], sizes = [8, 128], strides = [1, 1]} : vector<8x512xf32> to vector<8x128xf32>
    %95 = math.tanh %94 : vector<8x128xf32>
    %96 = vector.extract_strided_slice %77 {offsets = [0, 384], sizes = [8, 128], strides = [1, 1]} : vector<8x512xf32> to vector<8x128xf32>
    %97 = arith.negf %96 : vector<8x128xf32>
    %98 = math.exp %97 : vector<8x128xf32>
    %cst_28 = arith.constant 1.000000e+00 : f32
    %99 = vector.broadcast %cst_28 : f32 to vector<8x128xf32>
    %100 = arith.addf %99, %98 : vector<8x128xf32>
    %101 = arith.divf %99, %100 : vector<8x128xf32>
    %102 = arith.mulf %93, %81 : vector<8x128xf32>
    %103 = arith.mulf %87, %95 : vector<8x128xf32>
    %104 = arith.addf %102, %103 : vector<8x128xf32>
    %105 = math.tanh %104 : vector<8x128xf32>
    %106 = arith.mulf %101, %105 : vector<8x128xf32>
    %107 = vector.extract_strided_slice %70 {offsets = [0, 128], sizes = [8, 128], strides = [1, 1]} : vector<8x256xf32> to vector<8x128xf32>
    %108 = vector.extract_strided_slice %80 {offsets = [0, 0], sizes = [8, 128], strides = [1, 1]} : vector<8x512xf32> to vector<8x128xf32>
    %109 = arith.negf %108 : vector<8x128xf32>
    %110 = math.exp %109 : vector<8x128xf32>
    %cst_29 = arith.constant 1.000000e+00 : f32
    %111 = vector.broadcast %cst_29 : f32 to vector<8x128xf32>
    %112 = arith.addf %111, %110 : vector<8x128xf32>
    %113 = arith.divf %111, %112 : vector<8x128xf32>
    %114 = vector.extract_strided_slice %80 {offsets = [0, 128], sizes = [8, 128], strides = [1, 1]} : vector<8x512xf32> to vector<8x128xf32>
    %115 = arith.negf %114 : vector<8x128xf32>
    %116 = math.exp %115 : vector<8x128xf32>
    %cst_30 = arith.constant 1.000000e+00 : f32
    %117 = vector.broadcast %cst_30 : f32 to vector<8x128xf32>
    %118 = arith.addf %117, %116 : vector<8x128xf32>
    %119 = arith.divf %117, %118 : vector<8x128xf32>
    %120 = vector.extract_strided_slice %80 {offsets = [0, 256], sizes = [8, 128], strides = [1, 1]} : vector<8x512xf32> to vector<8x128xf32>
    %121 = math.tanh %120 : vector<8x128xf32>
    %122 = vector.extract_strided_slice %80 {offsets = [0, 384], sizes = [8, 128], strides = [1, 1]} : vector<8x512xf32> to vector<8x128xf32>
    %123 = arith.negf %122 : vector<8x128xf32>
    %124 = math.exp %123 : vector<8x128xf32>
    %cst_31 = arith.constant 1.000000e+00 : f32
    %125 = vector.broadcast %cst_31 : f32 to vector<8x128xf32>
    %126 = arith.addf %125, %124 : vector<8x128xf32>
    %127 = arith.divf %125, %126 : vector<8x128xf32>
    %128 = arith.mulf %119, %107 : vector<8x128xf32>
    %129 = arith.mulf %113, %121 : vector<8x128xf32>
    %130 = arith.addf %128, %129 : vector<8x128xf32>
    %131 = math.tanh %130 : vector<8x128xf32>
    %132 = arith.mulf %127, %131 : vector<8x128xf32>
    %133 = tpu.concatenate %106, %132 in 1 : vector<8x128xf32>, vector<8x128xf32> -> vector<8x256xf32>
    %134 = tpu.concatenate %104, %130 in 1 : vector<8x128xf32>, vector<8x128xf32> -> vector<8x256xf32>
    %c1 = arith.constant 1 : index
    %c0_32 = arith.constant 0 : index
    %c0_33 = arith.constant 0 : index
    %135 = vector.load %arg5[%c1, %c0_32, %c0_33] : memref<8x8x256xf32, #tpu.memory_space<vmem>>, vector<1x8x256xf32>
    %136 = vector.shape_cast %135 : vector<1x8x256xf32> to vector<8x256xf32>
    %137 = vector.shape_cast %133 : vector<8x256xf32> to vector<1x8x256xf32>
    tpu.vector_store %arg5[%c1, %c0_32, %c0_33], %137 {strides = array<i32>} : memref<8x8x256xf32, #tpu.memory_space<vmem>>, vector<1x8x256xf32>,
    %cst_34 = arith.constant dense<0.000000e+00> : vector<8x1024xf32>
    %138 = tpu.matmul %133, %7, %cst_34 {dimension_numbers = #tpu.dot_dimension_numbers<[1], [0], [0], [1], [0, 0, 1, 1], [], []>} : vector<8x256xf32>, vector<256x1024xf32>, vector<8x1024xf32> -> vector<8x1024xf32>
    %c16 = arith.constant 16 : index
    %c0_35 = arith.constant 0 : index
    %139 = vector.load %arg6[%c16, %c0_35] : memref<64x1024xf32, #tpu.memory_space<vmem>>, vector<8x512xf32>
    %140 = vector.extract_strided_slice %138 {offsets = [0, 0], sizes = [8, 512], strides = [1, 1]} : vector<8x1024xf32> to vector<8x512xf32>
    %141 = arith.addf %139, %140 : vector<8x512xf32>
    %c40 = arith.constant 40 : index
    %c512_36 = arith.constant 512 : index
    %142 = vector.load %arg6[%c40, %c512_36] : memref<64x1024xf32, #tpu.memory_space<vmem>>, vector<8x512xf32>
    %143 = vector.extract_strided_slice %138 {offsets = [0, 512], sizes = [8, 512], strides = [1, 1]} : vector<8x1024xf32> to vector<8x512xf32>
    %144 = arith.addf %142, %143 : vector<8x512xf32>
    %145 = vector.extract_strided_slice %134 {offsets = [0, 0], sizes = [8, 128], strides = [1, 1]} : vector<8x256xf32> to vector<8x128xf32>
    %146 = vector.extract_strided_slice %141 {offsets = [0, 0], sizes = [8, 128], strides = [1, 1]} : vector<8x512xf32> to vector<8x128xf32>
    %147 = arith.negf %146 : vector<8x128xf32>
    %148 = math.exp %147 : vector<8x128xf32>
    %cst_37 = arith.constant 1.000000e+00 : f32
    %149 = vector.broadcast %cst_37 : f32 to vector<8x128xf32>
    %150 = arith.addf %149, %148 : vector<8x128xf32>
    %151 = arith.divf %149, %150 : vector<8x128xf32>
    %152 = vector.extract_strided_slice %141 {offsets = [0, 128], sizes = [8, 128], strides = [1, 1]} : vector<8x512xf32> to vector<8x128xf32>
    %153 = arith.negf %152 : vector<8x128xf32>
    %154 = math.exp %153 : vector<8x128xf32>
    %cst_38 = arith.constant 1.000000e+00 : f32
    %155 = vector.broadcast %cst_38 : f32 to vector<8x128xf32>
    %156 = arith.addf %155, %154 : vector<8x128xf32>
    %157 = arith.divf %155, %156 : vector<8x128xf32>
    %158 = vector.extract_strided_slice %141 {offsets = [0, 256], sizes = [8, 128], strides = [1, 1]} : vector<8x512xf32> to vector<8x128xf32>
    %159 = math.tanh %158 : vector<8x128xf32>
    %160 = vector.extract_strided_slice %141 {offsets = [0, 384], sizes = [8, 128], strides = [1, 1]} : vector<8x512xf32> to vector<8x128xf32>
    %161 = arith.negf %160 : vector<8x128xf32>
    %162 = math.exp %161 : vector<8x128xf32>
    %cst_39 = arith.constant 1.000000e+00 : f32
    %163 = vector.broadcast %cst_39 : f32 to vector<8x128xf32>
    %164 = arith.addf %163, %162 : vector<8x128xf32>
    %165 = arith.divf %163, %164 : vector<8x128xf32>
    %166 = arith.mulf %157, %145 : vector<8x128xf32>
    %167 = arith.mulf %151, %159 : vector<8x128xf32>
    %168 = arith.addf %166, %167 : vector<8x128xf32>
    %169 = math.tanh %168 : vector<8x128xf32>
    %170 = arith.mulf %165, %169 : vector<8x128xf32>
    %171 = vector.extract_strided_slice %134 {offsets = [0, 128], sizes = [8, 128], strides = [1, 1]} : vector<8x256xf32> to vector<8x128xf32>
    %172 = vector.extract_strided_slice %144 {offsets = [0, 0], sizes = [8, 128], strides = [1, 1]} : vector<8x512xf32> to vector<8x128xf32>
    %173 = arith.negf %172 : vector<8x128xf32>
    %174 = math.exp %173 : vector<8x128xf32>
    %cst_40 = arith.constant 1.000000e+00 : f32
    %175 = vector.broadcast %cst_40 : f32 to vector<8x128xf32>
    %176 = arith.addf %175, %174 : vector<8x128xf32>
    %177 = arith.divf %175, %176 : vector<8x128xf32>
    %178 = vector.extract_strided_slice %144 {offsets = [0, 128], sizes = [8, 128], strides = [1, 1]} : vector<8x512xf32> to vector<8x128xf32>
    %179 = arith.negf %178 : vector<8x128xf32>
    %180 = math.exp %179 : vector<8x128xf32>
    %cst_41 = arith.constant 1.000000e+00 : f32
    %181 = vector.broadcast %cst_41 : f32 to vector<8x128xf32>
    %182 = arith.addf %181, %180 : vector<8x128xf32>
    %183 = arith.divf %181, %182 : vector<8x128xf32>
    %184 = vector.extract_strided_slice %144 {offsets = [0, 256], sizes = [8, 128], strides = [1, 1]} : vector<8x512xf32> to vector<8x128xf32>
    %185 = math.tanh %184 : vector<8x128xf32>
    %186 = vector.extract_strided_slice %144 {offsets = [0, 384], sizes = [8, 128], strides = [1, 1]} : vector<8x512xf32> to vector<8x128xf32>
    %187 = arith.negf %186 : vector<8x128xf32>
    %188 = math.exp %187 : vector<8x128xf32>
    %cst_42 = arith.constant 1.000000e+00 : f32
    %189 = vector.broadcast %cst_42 : f32 to vector<8x128xf32>
    %190 = arith.addf %189, %188 : vector<8x128xf32>
    %191 = arith.divf %189, %190 : vector<8x128xf32>
    %192 = arith.mulf %183, %171 : vector<8x128xf32>
    %193 = arith.mulf %177, %185 : vector<8x128xf32>
    %194 = arith.addf %192, %193 : vector<8x128xf32>
    %195 = math.tanh %194 : vector<8x128xf32>
    %196 = arith.mulf %191, %195 : vector<8x128xf32>
    %197 = tpu.concatenate %170, %196 in 1 : vector<8x128xf32>, vector<8x128xf32> -> vector<8x256xf32>
    %198 = tpu.concatenate %168, %194 in 1 : vector<8x128xf32>, vector<8x128xf32> -> vector<8x256xf32>
    %c2 = arith.constant 2 : index
    %c0_43 = arith.constant 0 : index
    %c0_44 = arith.constant 0 : index
    %199 = vector.load %arg5[%c2, %c0_43, %c0_44] : memref<8x8x256xf32, #tpu.memory_space<vmem>>, vector<1x8x256xf32>
    %200 = vector.shape_cast %199 : vector<1x8x256xf32> to vector<8x256xf32>
    %201 = vector.shape_cast %197 : vector<8x256xf32> to vector<1x8x256xf32>
    tpu.vector_store %arg5[%c2, %c0_43, %c0_44], %201 {strides = array<i32>} : memref<8x8x256xf32, #tpu.memory_space<vmem>>, vector<1x8x256xf32>,
    %cst_45 = arith.constant dense<0.000000e+00> : vector<8x1024xf32>
    %202 = tpu.matmul %197, %7, %cst_45 {dimension_numbers = #tpu.dot_dimension_numbers<[1], [0], [0], [1], [0, 0, 1, 1], [], []>} : vector<8x256xf32>, vector<256x1024xf32>, vector<8x1024xf32> -> vector<8x1024xf32>
    %c24 = arith.constant 24 : index
    %c0_46 = arith.constant 0 : index
    %203 = vector.load %arg6[%c24, %c0_46] : memref<64x1024xf32, #tpu.memory_space<vmem>>, vector<8x512xf32>
    %204 = vector.extract_strided_slice %202 {offsets = [0, 0], sizes = [8, 512], strides = [1, 1]} : vector<8x1024xf32> to vector<8x512xf32>
    %205 = arith.addf %203, %204 : vector<8x512xf32>
    %c32 = arith.constant 32 : index
    %c512_47 = arith.constant 512 : index
    %206 = vector.load %arg6[%c32, %c512_47] : memref<64x1024xf32, #tpu.memory_space<vmem>>, vector<8x512xf32>
    %207 = vector.extract_strided_slice %202 {offsets = [0, 512], sizes = [8, 512], strides = [1, 1]} : vector<8x1024xf32> to vector<8x512xf32>
    %208 = arith.addf %206, %207 : vector<8x512xf32>
    %209 = vector.extract_strided_slice %198 {offsets = [0, 0], sizes = [8, 128], strides = [1, 1]} : vector<8x256xf32> to vector<8x128xf32>
    %210 = vector.extract_strided_slice %205 {offsets = [0, 0], sizes = [8, 128], strides = [1, 1]} : vector<8x512xf32> to vector<8x128xf32>
    %211 = arith.negf %210 : vector<8x128xf32>
    %212 = math.exp %211 : vector<8x128xf32>
    %cst_48 = arith.constant 1.000000e+00 : f32
    %213 = vector.broadcast %cst_48 : f32 to vector<8x128xf32>
    %214 = arith.addf %213, %212 : vector<8x128xf32>
    %215 = arith.divf %213, %214 : vector<8x128xf32>
    %216 = vector.extract_strided_slice %205 {offsets = [0, 128], sizes = [8, 128], strides = [1, 1]} : vector<8x512xf32> to vector<8x128xf32>
    %217 = arith.negf %216 : vector<8x128xf32>
    %218 = math.exp %217 : vector<8x128xf32>
    %cst_49 = arith.constant 1.000000e+00 : f32
    %219 = vector.broadcast %cst_49 : f32 to vector<8x128xf32>
    %220 = arith.addf %219, %218 : vector<8x128xf32>
    %221 = arith.divf %219, %220 : vector<8x128xf32>
    %222 = vector.extract_strided_slice %205 {offsets = [0, 256], sizes = [8, 128], strides = [1, 1]} : vector<8x512xf32> to vector<8x128xf32>
    %223 = math.tanh %222 : vector<8x128xf32>
    %224 = vector.extract_strided_slice %205 {offsets = [0, 384], sizes = [8, 128], strides = [1, 1]} : vector<8x512xf32> to vector<8x128xf32>
    %225 = arith.negf %224 : vector<8x128xf32>
    %226 = math.exp %225 : vector<8x128xf32>
    %cst_50 = arith.constant 1.000000e+00 : f32
    %227 = vector.broadcast %cst_50 : f32 to vector<8x128xf32>
    %228 = arith.addf %227, %226 : vector<8x128xf32>
    %229 = arith.divf %227, %228 : vector<8x128xf32>
    %230 = arith.mulf %221, %209 : vector<8x128xf32>
    %231 = arith.mulf %215, %223 : vector<8x128xf32>
    %232 = arith.addf %230, %231 : vector<8x128xf32>
    %233 = math.tanh %232 : vector<8x128xf32>
    %234 = arith.mulf %229, %233 : vector<8x128xf32>
    %235 = vector.extract_strided_slice %198 {offsets = [0, 128], sizes = [8, 128], strides = [1, 1]} : vector<8x256xf32> to vector<8x128xf32>
    %236 = vector.extract_strided_slice %208 {offsets = [0, 0], sizes = [8, 128], strides = [1, 1]} : vector<8x512xf32> to vector<8x128xf32>
    %237 = arith.negf %236 : vector<8x128xf32>
    %238 = math.exp %237 : vector<8x128xf32>
    %cst_51 = arith.constant 1.000000e+00 : f32
    %239 = vector.broadcast %cst_51 : f32 to vector<8x128xf32>
    %240 = arith.addf %239, %238 : vector<8x128xf32>
    %241 = arith.divf %239, %240 : vector<8x128xf32>
    %242 = vector.extract_strided_slice %208 {offsets = [0, 128], sizes = [8, 128], strides = [1, 1]} : vector<8x512xf32> to vector<8x128xf32>
    %243 = arith.negf %242 : vector<8x128xf32>
    %244 = math.exp %243 : vector<8x128xf32>
    %cst_52 = arith.constant 1.000000e+00 : f32
    %245 = vector.broadcast %cst_52 : f32 to vector<8x128xf32>
    %246 = arith.addf %245, %244 : vector<8x128xf32>
    %247 = arith.divf %245, %246 : vector<8x128xf32>
    %248 = vector.extract_strided_slice %208 {offsets = [0, 256], sizes = [8, 128], strides = [1, 1]} : vector<8x512xf32> to vector<8x128xf32>
    %249 = math.tanh %248 : vector<8x128xf32>
    %250 = vector.extract_strided_slice %208 {offsets = [0, 384], sizes = [8, 128], strides = [1, 1]} : vector<8x512xf32> to vector<8x128xf32>
    %251 = arith.negf %250 : vector<8x128xf32>
    %252 = math.exp %251 : vector<8x128xf32>
    %cst_53 = arith.constant 1.000000e+00 : f32
    %253 = vector.broadcast %cst_53 : f32 to vector<8x128xf32>
    %254 = arith.addf %253, %252 : vector<8x128xf32>
    %255 = arith.divf %253, %254 : vector<8x128xf32>
    %256 = arith.mulf %247, %235 : vector<8x128xf32>
    %257 = arith.mulf %241, %249 : vector<8x128xf32>
    %258 = arith.addf %256, %257 : vector<8x128xf32>
    %259 = math.tanh %258 : vector<8x128xf32>
    %260 = arith.mulf %255, %259 : vector<8x128xf32>
    %261 = tpu.concatenate %234, %260 in 1 : vector<8x128xf32>, vector<8x128xf32> -> vector<8x256xf32>
    %262 = tpu.concatenate %232, %258 in 1 : vector<8x128xf32>, vector<8x128xf32> -> vector<8x256xf32>
    %c3 = arith.constant 3 : index
    %c0_54 = arith.constant 0 : index
    %c0_55 = arith.constant 0 : index
    %263 = vector.load %arg5[%c3, %c0_54, %c0_55] : memref<8x8x256xf32, #tpu.memory_space<vmem>>, vector<1x8x256xf32>
    %264 = vector.shape_cast %263 : vector<1x8x256xf32> to vector<8x256xf32>
    %265 = vector.shape_cast %261 : vector<8x256xf32> to vector<1x8x256xf32>
    tpu.vector_store %arg5[%c3, %c0_54, %c0_55], %265 {strides = array<i32>} : memref<8x8x256xf32, #tpu.memory_space<vmem>>, vector<1x8x256xf32>,
    %cst_56 = arith.constant dense<0.000000e+00> : vector<8x1024xf32>
    %266 = tpu.matmul %261, %7, %cst_56 {dimension_numbers = #tpu.dot_dimension_numbers<[1], [0], [0], [1], [0, 0, 1, 1], [], []>} : vector<8x256xf32>, vector<256x1024xf32>, vector<8x1024xf32> -> vector<8x1024xf32>
    %c32_57 = arith.constant 32 : index
    %c0_58 = arith.constant 0 : index
    %267 = vector.load %arg6[%c32_57, %c0_58] : memref<64x1024xf32, #tpu.memory_space<vmem>>, vector<8x512xf32>
    %268 = vector.extract_strided_slice %266 {offsets = [0, 0], sizes = [8, 512], strides = [1, 1]} : vector<8x1024xf32> to vector<8x512xf32>
    %269 = arith.addf %267, %268 : vector<8x512xf32>
    %c24_59 = arith.constant 24 : index
    %c512_60 = arith.constant 512 : index
    %270 = vector.load %arg6[%c24_59, %c512_60] : memref<64x1024xf32, #tpu.memory_space<vmem>>, vector<8x512xf32>
    %271 = vector.extract_strided_slice %266 {offsets = [0, 512], sizes = [8, 512], strides = [1, 1]} : vector<8x1024xf32> to vector<8x512xf32>
    %272 = arith.addf %270, %271 : vector<8x512xf32>
    %273 = vector.extract_strided_slice %262 {offsets = [0, 0], sizes = [8, 128], strides = [1, 1]} : vector<8x256xf32> to vector<8x128xf32>
    %274 = vector.extract_strided_slice %269 {offsets = [0, 0], sizes = [8, 128], strides = [1, 1]} : vector<8x512xf32> to vector<8x128xf32>
    %275 = arith.negf %274 : vector<8x128xf32>
    %276 = math.exp %275 : vector<8x128xf32>
    %cst_61 = arith.constant 1.000000e+00 : f32
    %277 = vector.broadcast %cst_61 : f32 to vector<8x128xf32>
    %278 = arith.addf %277, %276 : vector<8x128xf32>
    %279 = arith.divf %277, %278 : vector<8x128xf32>
    %280 = vector.extract_strided_slice %269 {offsets = [0, 128], sizes = [8, 128], strides = [1, 1]} : vector<8x512xf32> to vector<8x128xf32>
    %281 = arith.negf %280 : vector<8x128xf32>
    %282 = math.exp %281 : vector<8x128xf32>
    %cst_62 = arith.constant 1.000000e+00 : f32
    %283 = vector.broadcast %cst_62 : f32 to vector<8x128xf32>
    %284 = arith.addf %283, %282 : vector<8x128xf32>
    %285 = arith.divf %283, %284 : vector<8x128xf32>
    %286 = vector.extract_strided_slice %269 {offsets = [0, 256], sizes = [8, 128], strides = [1, 1]} : vector<8x512xf32> to vector<8x128xf32>
    %287 = math.tanh %286 : vector<8x128xf32>
    %288 = vector.extract_strided_slice %269 {offsets = [0, 384], sizes = [8, 128], strides = [1, 1]} : vector<8x512xf32> to vector<8x128xf32>
    %289 = arith.negf %288 : vector<8x128xf32>
    %290 = math.exp %289 : vector<8x128xf32>
    %cst_63 = arith.constant 1.000000e+00 : f32
    %291 = vector.broadcast %cst_63 : f32 to vector<8x128xf32>
    %292 = arith.addf %291, %290 : vector<8x128xf32>
    %293 = arith.divf %291, %292 : vector<8x128xf32>
    %294 = arith.mulf %285, %273 : vector<8x128xf32>
    %295 = arith.mulf %279, %287 : vector<8x128xf32>
    %296 = arith.addf %294, %295 : vector<8x128xf32>
    %297 = math.tanh %296 : vector<8x128xf32>
    %298 = arith.mulf %293, %297 : vector<8x128xf32>
    %299 = vector.extract_strided_slice %262 {offsets = [0, 128], sizes = [8, 128], strides = [1, 1]} : vector<8x256xf32> to vector<8x128xf32>
    %300 = vector.extract_strided_slice %272 {offsets = [0, 0], sizes = [8, 128], strides = [1, 1]} : vector<8x512xf32> to vector<8x128xf32>
    %301 = arith.negf %300 : vector<8x128xf32>
    %302 = math.exp %301 : vector<8x128xf32>
    %cst_64 = arith.constant 1.000000e+00 : f32
    %303 = vector.broadcast %cst_64 : f32 to vector<8x128xf32>
    %304 = arith.addf %303, %302 : vector<8x128xf32>
    %305 = arith.divf %303, %304 : vector<8x128xf32>
    %306 = vector.extract_strided_slice %272 {offsets = [0, 128], sizes = [8, 128], strides = [1, 1]} : vector<8x512xf32> to vector<8x128xf32>
    %307 = arith.negf %306 : vector<8x128xf32>
    %308 = math.exp %307 : vector<8x128xf32>
    %cst_65 = arith.constant 1.000000e+00 : f32
    %309 = vector.broadcast %cst_65 : f32 to vector<8x128xf32>
    %310 = arith.addf %309, %308 : vector<8x128xf32>
    %311 = arith.divf %309, %310 : vector<8x128xf32>
    %312 = vector.extract_strided_slice %272 {offsets = [0, 256], sizes = [8, 128], strides = [1, 1]} : vector<8x512xf32> to vector<8x128xf32>
    %313 = math.tanh %312 : vector<8x128xf32>
    %314 = vector.extract_strided_slice %272 {offsets = [0, 384], sizes = [8, 128], strides = [1, 1]} : vector<8x512xf32> to vector<8x128xf32>
    %315 = arith.negf %314 : vector<8x128xf32>
    %316 = math.exp %315 : vector<8x128xf32>
    %cst_66 = arith.constant 1.000000e+00 : f32
    %317 = vector.broadcast %cst_66 : f32 to vector<8x128xf32>
    %318 = arith.addf %317, %316 : vector<8x128xf32>
    %319 = arith.divf %317, %318 : vector<8x128xf32>
    %320 = arith.mulf %311, %299 : vector<8x128xf32>
    %321 = arith.mulf %305, %313 : vector<8x128xf32>
    %322 = arith.addf %320, %321 : vector<8x128xf32>
    %323 = math.tanh %322 : vector<8x128xf32>
    %324 = arith.mulf %319, %323 : vector<8x128xf32>
    %325 = tpu.concatenate %298, %324 in 1 : vector<8x128xf32>, vector<8x128xf32> -> vector<8x256xf32>
    %326 = tpu.concatenate %296, %322 in 1 : vector<8x128xf32>, vector<8x128xf32> -> vector<8x256xf32>
    %c4 = arith.constant 4 : index
    %c0_67 = arith.constant 0 : index
    %c0_68 = arith.constant 0 : index
    %327 = vector.load %arg5[%c4, %c0_67, %c0_68] : memref<8x8x256xf32, #tpu.memory_space<vmem>>, vector<1x8x256xf32>
    %328 = vector.shape_cast %327 : vector<1x8x256xf32> to vector<8x256xf32>
    %329 = vector.shape_cast %325 : vector<8x256xf32> to vector<1x8x256xf32>
    tpu.vector_store %arg5[%c4, %c0_67, %c0_68], %329 {strides = array<i32>} : memref<8x8x256xf32, #tpu.memory_space<vmem>>, vector<1x8x256xf32>,
    %cst_69 = arith.constant dense<0.000000e+00> : vector<8x1024xf32>
    %330 = tpu.matmul %325, %7, %cst_69 {dimension_numbers = #tpu.dot_dimension_numbers<[1], [0], [0], [1], [0, 0, 1, 1], [], []>} : vector<8x256xf32>, vector<256x1024xf32>, vector<8x1024xf32> -> vector<8x1024xf32>
    %c40_70 = arith.constant 40 : index
    %c0_71 = arith.constant 0 : index
    %331 = vector.load %arg6[%c40_70, %c0_71] : memref<64x1024xf32, #tpu.memory_space<vmem>>, vector<8x512xf32>
    %332 = vector.extract_strided_slice %330 {offsets = [0, 0], sizes = [8, 512], strides = [1, 1]} : vector<8x1024xf32> to vector<8x512xf32>
    %333 = arith.addf %331, %332 : vector<8x512xf32>
    %c16_72 = arith.constant 16 : index
    %c512_73 = arith.constant 512 : index
    %334 = vector.load %arg6[%c16_72, %c512_73] : memref<64x1024xf32, #tpu.memory_space<vmem>>, vector<8x512xf32>
    %335 = vector.extract_strided_slice %330 {offsets = [0, 512], sizes = [8, 512], strides = [1, 1]} : vector<8x1024xf32> to vector<8x512xf32>
    %336 = arith.addf %334, %335 : vector<8x512xf32>
    %337 = vector.extract_strided_slice %326 {offsets = [0, 0], sizes = [8, 128], strides = [1, 1]} : vector<8x256xf32> to vector<8x128xf32>
    %338 = vector.extract_strided_slice %333 {offsets = [0, 0], sizes = [8, 128], strides = [1, 1]} : vector<8x512xf32> to vector<8x128xf32>
    %339 = arith.negf %338 : vector<8x128xf32>
    %340 = math.exp %339 : vector<8x128xf32>
    %cst_74 = arith.constant 1.000000e+00 : f32
    %341 = vector.broadcast %cst_74 : f32 to vector<8x128xf32>
    %342 = arith.addf %341, %340 : vector<8x128xf32>
    %343 = arith.divf %341, %342 : vector<8x128xf32>
    %344 = vector.extract_strided_slice %333 {offsets = [0, 128], sizes = [8, 128], strides = [1, 1]} : vector<8x512xf32> to vector<8x128xf32>
    %345 = arith.negf %344 : vector<8x128xf32>
    %346 = math.exp %345 : vector<8x128xf32>
    %cst_75 = arith.constant 1.000000e+00 : f32
    %347 = vector.broadcast %cst_75 : f32 to vector<8x128xf32>
    %348 = arith.addf %347, %346 : vector<8x128xf32>
    %349 = arith.divf %347, %348 : vector<8x128xf32>
    %350 = vector.extract_strided_slice %333 {offsets = [0, 256], sizes = [8, 128], strides = [1, 1]} : vector<8x512xf32> to vector<8x128xf32>
    %351 = math.tanh %350 : vector<8x128xf32>
    %352 = vector.extract_strided_slice %333 {offsets = [0, 384], sizes = [8, 128], strides = [1, 1]} : vector<8x512xf32> to vector<8x128xf32>
    %353 = arith.negf %352 : vector<8x128xf32>
    %354 = math.exp %353 : vector<8x128xf32>
    %cst_76 = arith.constant 1.000000e+00 : f32
    %355 = vector.broadcast %cst_76 : f32 to vector<8x128xf32>
    %356 = arith.addf %355, %354 : vector<8x128xf32>
    %357 = arith.divf %355, %356 : vector<8x128xf32>
    %358 = arith.mulf %349, %337 : vector<8x128xf32>
    %359 = arith.mulf %343, %351 : vector<8x128xf32>
    %360 = arith.addf %358, %359 : vector<8x128xf32>
    %361 = math.tanh %360 : vector<8x128xf32>
    %362 = arith.mulf %357, %361 : vector<8x128xf32>
    %363 = vector.extract_strided_slice %326 {offsets = [0, 128], sizes = [8, 128], strides = [1, 1]} : vector<8x256xf32> to vector<8x128xf32>
    %364 = vector.extract_strided_slice %336 {offsets = [0, 0], sizes = [8, 128], strides = [1, 1]} : vector<8x512xf32> to vector<8x128xf32>
    %365 = arith.negf %364 : vector<8x128xf32>
    %366 = math.exp %365 : vector<8x128xf32>
    %cst_77 = arith.constant 1.000000e+00 : f32
    %367 = vector.broadcast %cst_77 : f32 to vector<8x128xf32>
    %368 = arith.addf %367, %366 : vector<8x128xf32>
    %369 = arith.divf %367, %368 : vector<8x128xf32>
    %370 = vector.extract_strided_slice %336 {offsets = [0, 128], sizes = [8, 128], strides = [1, 1]} : vector<8x512xf32> to vector<8x128xf32>
    %371 = arith.negf %370 : vector<8x128xf32>
    %372 = math.exp %371 : vector<8x128xf32>
    %cst_78 = arith.constant 1.000000e+00 : f32
    %373 = vector.broadcast %cst_78 : f32 to vector<8x128xf32>
    %374 = arith.addf %373, %372 : vector<8x128xf32>
    %375 = arith.divf %373, %374 : vector<8x128xf32>
    %376 = vector.extract_strided_slice %336 {offsets = [0, 256], sizes = [8, 128], strides = [1, 1]} : vector<8x512xf32> to vector<8x128xf32>
    %377 = math.tanh %376 : vector<8x128xf32>
    %378 = vector.extract_strided_slice %336 {offsets = [0, 384], sizes = [8, 128], strides = [1, 1]} : vector<8x512xf32> to vector<8x128xf32>
    %379 = arith.negf %378 : vector<8x128xf32>
    %380 = math.exp %379 : vector<8x128xf32>
    %cst_79 = arith.constant 1.000000e+00 : f32
    %381 = vector.broadcast %cst_79 : f32 to vector<8x128xf32>
    %382 = arith.addf %381, %380 : vector<8x128xf32>
    %383 = arith.divf %381, %382 : vector<8x128xf32>
    %384 = arith.mulf %375, %363 : vector<8x128xf32>
    %385 = arith.mulf %369, %377 : vector<8x128xf32>
    %386 = arith.addf %384, %385 : vector<8x128xf32>
    %387 = math.tanh %386 : vector<8x128xf32>
    %388 = arith.mulf %383, %387 : vector<8x128xf32>
    %389 = tpu.concatenate %362, %388 in 1 : vector<8x128xf32>, vector<8x128xf32> -> vector<8x256xf32>
    %390 = tpu.concatenate %360, %386 in 1 : vector<8x128xf32>, vector<8x128xf32> -> vector<8x256xf32>
    %c5 = arith.constant 5 : index
    %c0_80 = arith.constant 0 : index
    %c0_81 = arith.constant 0 : index
    %391 = vector.load %arg5[%c5, %c0_80, %c0_81] : memref<8x8x256xf32, #tpu.memory_space<vmem>>, vector<1x8x256xf32>
    %392 = vector.shape_cast %391 : vector<1x8x256xf32> to vector<8x256xf32>
    %393 = vector.shape_cast %389 : vector<8x256xf32> to vector<1x8x256xf32>
    tpu.vector_store %arg5[%c5, %c0_80, %c0_81], %393 {strides = array<i32>} : memref<8x8x256xf32, #tpu.memory_space<vmem>>, vector<1x8x256xf32>,
    %cst_82 = arith.constant dense<0.000000e+00> : vector<8x1024xf32>
    %394 = tpu.matmul %389, %7, %cst_82 {dimension_numbers = #tpu.dot_dimension_numbers<[1], [0], [0], [1], [0, 0, 1, 1], [], []>} : vector<8x256xf32>, vector<256x1024xf32>, vector<8x1024xf32> -> vector<8x1024xf32>
    %c48_83 = arith.constant 48 : index
    %c0_84 = arith.constant 0 : index
    %395 = vector.load %arg6[%c48_83, %c0_84] : memref<64x1024xf32, #tpu.memory_space<vmem>>, vector<8x512xf32>
    %396 = vector.extract_strided_slice %394 {offsets = [0, 0], sizes = [8, 512], strides = [1, 1]} : vector<8x1024xf32> to vector<8x512xf32>
    %397 = arith.addf %395, %396 : vector<8x512xf32>
    %c8_85 = arith.constant 8 : index
    %c512_86 = arith.constant 512 : index
    %398 = vector.load %arg6[%c8_85, %c512_86] : memref<64x1024xf32, #tpu.memory_space<vmem>>, vector<8x512xf32>
    %399 = vector.extract_strided_slice %394 {offsets = [0, 512], sizes = [8, 512], strides = [1, 1]} : vector<8x1024xf32> to vector<8x512xf32>
    %400 = arith.addf %398, %399 : vector<8x512xf32>
    %401 = vector.extract_strided_slice %390 {offsets = [0, 0], sizes = [8, 128], strides = [1, 1]} : vector<8x256xf32> to vector<8x128xf32>
    %402 = vector.extract_strided_slice %397 {offsets = [0, 0], sizes = [8, 128], strides = [1, 1]} : vector<8x512xf32> to vector<8x128xf32>
    %403 = arith.negf %402 : vector<8x128xf32>
    %404 = math.exp %403 : vector<8x128xf32>
    %cst_87 = arith.constant 1.000000e+00 : f32
    %405 = vector.broadcast %cst_87 : f32 to vector<8x128xf32>
    %406 = arith.addf %405, %404 : vector<8x128xf32>
    %407 = arith.divf %405, %406 : vector<8x128xf32>
    %408 = vector.extract_strided_slice %397 {offsets = [0, 128], sizes = [8, 128], strides = [1, 1]} : vector<8x512xf32> to vector<8x128xf32>
    %409 = arith.negf %408 : vector<8x128xf32>
    %410 = math.exp %409 : vector<8x128xf32>
    %cst_88 = arith.constant 1.000000e+00 : f32
    %411 = vector.broadcast %cst_88 : f32 to vector<8x128xf32>
    %412 = arith.addf %411, %410 : vector<8x128xf32>
    %413 = arith.divf %411, %412 : vector<8x128xf32>
    %414 = vector.extract_strided_slice %397 {offsets = [0, 256], sizes = [8, 128], strides = [1, 1]} : vector<8x512xf32> to vector<8x128xf32>
    %415 = math.tanh %414 : vector<8x128xf32>
    %416 = vector.extract_strided_slice %397 {offsets = [0, 384], sizes = [8, 128], strides = [1, 1]} : vector<8x512xf32> to vector<8x128xf32>
    %417 = arith.negf %416 : vector<8x128xf32>
    %418 = math.exp %417 : vector<8x128xf32>
    %cst_89 = arith.constant 1.000000e+00 : f32
    %419 = vector.broadcast %cst_89 : f32 to vector<8x128xf32>
    %420 = arith.addf %419, %418 : vector<8x128xf32>
    %421 = arith.divf %419, %420 : vector<8x128xf32>
    %422 = arith.mulf %413, %401 : vector<8x128xf32>
    %423 = arith.mulf %407, %415 : vector<8x128xf32>
    %424 = arith.addf %422, %423 : vector<8x128xf32>
    %425 = math.tanh %424 : vector<8x128xf32>
    %426 = arith.mulf %421, %425 : vector<8x128xf32>
    %427 = vector.extract_strided_slice %390 {offsets = [0, 128], sizes = [8, 128], strides = [1, 1]} : vector<8x256xf32> to vector<8x128xf32>
    %428 = vector.extract_strided_slice %400 {offsets = [0, 0], sizes = [8, 128], strides = [1, 1]} : vector<8x512xf32> to vector<8x128xf32>
    %429 = arith.negf %428 : vector<8x128xf32>
    %430 = math.exp %429 : vector<8x128xf32>
    %cst_90 = arith.constant 1.000000e+00 : f32
    %431 = vector.broadcast %cst_90 : f32 to vector<8x128xf32>
    %432 = arith.addf %431, %430 : vector<8x128xf32>
    %433 = arith.divf %431, %432 : vector<8x128xf32>
    %434 = vector.extract_strided_slice %400 {offsets = [0, 128], sizes = [8, 128], strides = [1, 1]} : vector<8x512xf32> to vector<8x128xf32>
    %435 = arith.negf %434 : vector<8x128xf32>
    %436 = math.exp %435 : vector<8x128xf32>
    %cst_91 = arith.constant 1.000000e+00 : f32
    %437 = vector.broadcast %cst_91 : f32 to vector<8x128xf32>
    %438 = arith.addf %437, %436 : vector<8x128xf32>
    %439 = arith.divf %437, %438 : vector<8x128xf32>
    %440 = vector.extract_strided_slice %400 {offsets = [0, 256], sizes = [8, 128], strides = [1, 1]} : vector<8x512xf32> to vector<8x128xf32>
    %441 = math.tanh %440 : vector<8x128xf32>
    %442 = vector.extract_strided_slice %400 {offsets = [0, 384], sizes = [8, 128], strides = [1, 1]} : vector<8x512xf32> to vector<8x128xf32>
    %443 = arith.negf %442 : vector<8x128xf32>
    %444 = math.exp %443 : vector<8x128xf32>
    %cst_92 = arith.constant 1.000000e+00 : f32
    %445 = vector.broadcast %cst_92 : f32 to vector<8x128xf32>
    %446 = arith.addf %445, %444 : vector<8x128xf32>
    %447 = arith.divf %445, %446 : vector<8x128xf32>
    %448 = arith.mulf %439, %427 : vector<8x128xf32>
    %449 = arith.mulf %433, %441 : vector<8x128xf32>
    %450 = arith.addf %448, %449 : vector<8x128xf32>
    %451 = math.tanh %450 : vector<8x128xf32>
    %452 = arith.mulf %447, %451 : vector<8x128xf32>
    %453 = tpu.concatenate %426, %452 in 1 : vector<8x128xf32>, vector<8x128xf32> -> vector<8x256xf32>
    %454 = tpu.concatenate %424, %450 in 1 : vector<8x128xf32>, vector<8x128xf32> -> vector<8x256xf32>
    %c6 = arith.constant 6 : index
    %c0_93 = arith.constant 0 : index
    %c0_94 = arith.constant 0 : index
    %455 = vector.load %arg5[%c6, %c0_93, %c0_94] : memref<8x8x256xf32, #tpu.memory_space<vmem>>, vector<1x8x256xf32>
    %456 = vector.shape_cast %455 : vector<1x8x256xf32> to vector<8x256xf32>
    %457 = vector.shape_cast %453 : vector<8x256xf32> to vector<1x8x256xf32>
    tpu.vector_store %arg5[%c6, %c0_93, %c0_94], %457 {strides = array<i32>} : memref<8x8x256xf32, #tpu.memory_space<vmem>>, vector<1x8x256xf32>,
    %cst_95 = arith.constant dense<0.000000e+00> : vector<8x1024xf32>
    %458 = tpu.matmul %453, %7, %cst_95 {dimension_numbers = #tpu.dot_dimension_numbers<[1], [0], [0], [1], [0, 0, 1, 1], [], []>} : vector<8x256xf32>, vector<256x1024xf32>, vector<8x1024xf32> -> vector<8x1024xf32>
    %c56_96 = arith.constant 56 : index
    %c0_97 = arith.constant 0 : index
    %459 = vector.load %arg6[%c56_96, %c0_97] : memref<64x1024xf32, #tpu.memory_space<vmem>>, vector<8x512xf32>
    %460 = vector.extract_strided_slice %458 {offsets = [0, 0], sizes = [8, 512], strides = [1, 1]} : vector<8x1024xf32> to vector<8x512xf32>
    %461 = arith.addf %459, %460 : vector<8x512xf32>
    %c0_98 = arith.constant 0 : index
    %c512_99 = arith.constant 512 : index
    %462 = vector.load %arg6[%c0_98, %c512_99] : memref<64x1024xf32, #tpu.memory_space<vmem>>, vector<8x512xf32>
    %463 = vector.extract_strided_slice %458 {offsets = [0, 512], sizes = [8, 512], strides = [1, 1]} : vector<8x1024xf32> to vector<8x512xf32>
    %464 = arith.addf %462, %463 : vector<8x512xf32>
    %465 = vector.extract_strided_slice %454 {offsets = [0, 0], sizes = [8, 128], strides = [1, 1]} : vector<8x256xf32> to vector<8x128xf32>
    %466 = vector.extract_strided_slice %461 {offsets = [0, 0], sizes = [8, 128], strides = [1, 1]} : vector<8x512xf32> to vector<8x128xf32>
    %467 = arith.negf %466 : vector<8x128xf32>
    %468 = math.exp %467 : vector<8x128xf32>
    %cst_100 = arith.constant 1.000000e+00 : f32
    %469 = vector.broadcast %cst_100 : f32 to vector<8x128xf32>
    %470 = arith.addf %469, %468 : vector<8x128xf32>
    %471 = arith.divf %469, %470 : vector<8x128xf32>
    %472 = vector.extract_strided_slice %461 {offsets = [0, 128], sizes = [8, 128], strides = [1, 1]} : vector<8x512xf32> to vector<8x128xf32>
    %473 = arith.negf %472 : vector<8x128xf32>
    %474 = math.exp %473 : vector<8x128xf32>
    %cst_101 = arith.constant 1.000000e+00 : f32
    %475 = vector.broadcast %cst_101 : f32 to vector<8x128xf32>
    %476 = arith.addf %475, %474 : vector<8x128xf32>
    %477 = arith.divf %475, %476 : vector<8x128xf32>
    %478 = vector.extract_strided_slice %461 {offsets = [0, 256], sizes = [8, 128], strides = [1, 1]} : vector<8x512xf32> to vector<8x128xf32>
    %479 = math.tanh %478 : vector<8x128xf32>
    %480 = vector.extract_strided_slice %461 {offsets = [0, 384], sizes = [8, 128], strides = [1, 1]} : vector<8x512xf32> to vector<8x128xf32>
    %481 = arith.negf %480 : vector<8x128xf32>
    %482 = math.exp %481 : vector<8x128xf32>
    %cst_102 = arith.constant 1.000000e+00 : f32
    %483 = vector.broadcast %cst_102 : f32 to vector<8x128xf32>
    %484 = arith.addf %483, %482 : vector<8x128xf32>
    %485 = arith.divf %483, %484 : vector<8x128xf32>
    %486 = arith.mulf %477, %465 : vector<8x128xf32>
    %487 = arith.mulf %471, %479 : vector<8x128xf32>
    %488 = arith.addf %486, %487 : vector<8x128xf32>
    %489 = math.tanh %488 : vector<8x128xf32>
    %490 = arith.mulf %485, %489 : vector<8x128xf32>
    %491 = vector.extract_strided_slice %454 {offsets = [0, 128], sizes = [8, 128], strides = [1, 1]} : vector<8x256xf32> to vector<8x128xf32>
    %492 = vector.extract_strided_slice %464 {offsets = [0, 0], sizes = [8, 128], strides = [1, 1]} : vector<8x512xf32> to vector<8x128xf32>
    %493 = arith.negf %492 : vector<8x128xf32>
    %494 = math.exp %493 : vector<8x128xf32>
    %cst_103 = arith.constant 1.000000e+00 : f32
    %495 = vector.broadcast %cst_103 : f32 to vector<8x128xf32>
    %496 = arith.addf %495, %494 : vector<8x128xf32>
    %497 = arith.divf %495, %496 : vector<8x128xf32>
    %498 = vector.extract_strided_slice %464 {offsets = [0, 128], sizes = [8, 128], strides = [1, 1]} : vector<8x512xf32> to vector<8x128xf32>
    %499 = arith.negf %498 : vector<8x128xf32>
    %500 = math.exp %499 : vector<8x128xf32>
    %cst_104 = arith.constant 1.000000e+00 : f32
    %501 = vector.broadcast %cst_104 : f32 to vector<8x128xf32>
    %502 = arith.addf %501, %500 : vector<8x128xf32>
    %503 = arith.divf %501, %502 : vector<8x128xf32>
    %504 = vector.extract_strided_slice %464 {offsets = [0, 256], sizes = [8, 128], strides = [1, 1]} : vector<8x512xf32> to vector<8x128xf32>
    %505 = math.tanh %504 : vector<8x128xf32>
    %506 = vector.extract_strided_slice %464 {offsets = [0, 384], sizes = [8, 128], strides = [1, 1]} : vector<8x512xf32> to vector<8x128xf32>
    %507 = arith.negf %506 : vector<8x128xf32>
    %508 = math.exp %507 : vector<8x128xf32>
    %cst_105 = arith.constant 1.000000e+00 : f32
    %509 = vector.broadcast %cst_105 : f32 to vector<8x128xf32>
    %510 = arith.addf %509, %508 : vector<8x128xf32>
    %511 = arith.divf %509, %510 : vector<8x128xf32>
    %512 = arith.mulf %503, %491 : vector<8x128xf32>
    %513 = arith.mulf %497, %505 : vector<8x128xf32>
    %514 = arith.addf %512, %513 : vector<8x128xf32>
    %515 = math.tanh %514 : vector<8x128xf32>
    %516 = arith.mulf %511, %515 : vector<8x128xf32>
    %517 = tpu.concatenate %490, %516 in 1 : vector<8x128xf32>, vector<8x128xf32> -> vector<8x256xf32>
    %c7 = arith.constant 7 : index
    %c0_106 = arith.constant 0 : index
    %c0_107 = arith.constant 0 : index
    %518 = vector.load %arg5[%c7, %c0_106, %c0_107] : memref<8x8x256xf32, #tpu.memory_space<vmem>>, vector<1x8x256xf32>
    %519 = vector.shape_cast %518 : vector<1x8x256xf32> to vector<8x256xf32>
    %520 = vector.shape_cast %517 : vector<8x256xf32> to vector<1x8x256xf32>
    tpu.vector_store %arg5[%c7, %c0_106, %c0_107], %520 {strides = array<i32>} : memref<8x8x256xf32, #tpu.memory_space<vmem>>, vector<1x8x256xf32>,
    return
  }
  func.func @transform_0(%arg0: i32) -> (i32, i32) {
    %c0_i32 = arith.constant 0 : i32
    %c0_i32_0 = arith.constant 0 : i32
    %c0_i32_1 = arith.constant 0 : i32
    return %c0_i32, %c0_i32_0 : i32, i32
  }
  func.func @transform_1(%arg0: i32) -> (i32, i32) {
    %c0_i32 = arith.constant 0 : i32
    %c0_i32_0 = arith.constant 0 : i32
    %c0_i32_1 = arith.constant 0 : i32
    return %c0_i32, %c0_i32_0 : i32, i32
  }
  func.func @transform_2(%arg0: i32) -> (i32, i32) {
    %c0_i32 = arith.constant 0 : i32
    %c0_i32_0 = arith.constant 0 : i32
    %c0_i32_1 = arith.constant 0 : i32
    return %c0_i32, %c0_i32_0 : i32, i32
  }
  func.func @transform_3(%arg0: i32) -> (i32, i32) {
    %c0_i32 = arith.constant 0 : i32
    %c0_i32_0 = arith.constant 0 : i32
    %c0_i32_1 = arith.constant 0 : i32
    return %c0_i32, %c0_i32_0 : i32, i32
  }
  func.func @transform_4(%arg0: i32) -> (i32, i32, i32) {
    %c0_i32 = arith.constant 0 : i32
    %c0_i32_0 = arith.constant 0 : i32
    %c0_i32_1 = arith.constant 0 : i32
    %c0_i32_2 = arith.constant 0 : i32
    return %c0_i32, %c0_i32_0, %c0_i32_1 : i32, i32, i32
  }
}

</mosaic_0001>

<bundles_post_ra>
// kernel: lstm_forward.1
= control target key start
LH: loop header
LB: loop body
LE: loop exit
PB: predicated region body
PF: predicated region fallthrough
CT: control target
= control target key end

     0   :  { %9 = vsyncpa [#allocation4], 0  ;;  %s8121_s0 = inlined_call_operand.vmem [shape: f32[64,39], index: 0, kind: input, shape index: {}]   ;;  %s8122_s1 = inlined_call_operand.hbm [shape: f32[39,1024], index: 1, kind: input, shape index: {}]   ;;  %s8123_s2 = inlined_call_operand.vmem [shape: f32[1,1024], index: 2, kind: input, shape index: {}]   ;;  %s8124_s3 = inlined_call_operand.hbm [shape: f32[256,1024], index: 3, kind: input, shape index: {}]   ;;  %s8125_s4 = inlined_call_operand.vmem [shape: f32[8,8,256], index: 4, kind: output, shape index: {}]  }
   0x1   :  { %10 = vsyncpa [#allocation6], 0  ;;  %s6389_s15 = smov [#allocation3]   ;;  %s6341_s19 = scalar_lea.hbm %s8122_s1, 5120 }
   0x2   :  { %s18_s16 = sshll.u32 %s6389_s15, 4  ;;  %p6342_p0 = scmp.ne.s32.totalorder %s8122_s1, %s6341_s19  ;;  %s19_s16 = int_to_ptr.vmem [resolvable:$true] %s18_s16 }
   0x3   :  { %p6345_p1 = scmp.lt.u32.totalorder %s6341_s19, %s8122_s1 }
   0x5   :  { %p6347_p2 = pnand %p6345_p1, %p6342_p0 }
   0x7   :  { %6350 = shalt.err (!%p6347_p2)
}
   0x8   :  { %s6351_s24 = scalar_lea.vmem %s19_s16, 5120  ;;  %p6356_p4 = scmp.lt.s32.totalorder %s19_s16, %s19_s16 }
   0x9   :  { %p6352_p3 = scmp.ne.s32.totalorder %s19_s16, %s6351_s24  ;;  %p6357_p5 = scmp.lt.s32.totalorder %s6351_s24, %s6351_s24 }
   0xb   :  { %p6358_p6 = por %p6357_p5, %p6356_p4 }
   0xd   :  { %p6359_p7 = pnand %p6358_p6, %p6352_p3 }
   0xf   :  { %6362 = shalt.err (!%p6359_p7)
}
  0x10   :  { %s6390_s25 = smov 1024   ;;  %s6391_s26 = smov 64  }
  0x11   :  { %24 = dma.hbm_to_vmem [thread:$0]  %s8122_s1, 5120, %s19_s16, [#allocation4], %s6390_s25, %s6390_s25, %s6391_s26  }
  0x12   :  { %s6392_s29 = smov [#allocation5]   ;;  %s6363_s7 = scalar_lea.hbm %s8124_s3, 32768 }
  0x13   :  { %s32_s30 = sshll.u32 %s6392_s29, 4  ;;  %p6364_p8 = scmp.ne.s32.totalorder %s8124_s3, %s6363_s7  ;;  %s33_s30 = int_to_ptr.vmem [resolvable:$true] %s32_s30 }
  0x14   :  { %p6367_p9 = scmp.lt.u32.totalorder %s6363_s7, %s8124_s3 }
  0x16   :  { %p6369_p10 = pnand %p6367_p9, %p6364_p8 }
  0x18   :  { %6372 = shalt.err (!%p6369_p10)
}
  0x19   :  { %s6373_s12 = scalar_lea.vmem %s33_s30, 32768  ;;  %p6378_p12 = scmp.lt.s32.totalorder %s33_s30, %s33_s30 }
  0x1a   :  { %p6374_p11 = scmp.ne.s32.totalorder %s33_s30, %s6373_s12  ;;  %p6379_p13 = scmp.lt.s32.totalorder %s6373_s12, %s6373_s12 }
  0x1c   :  { %p6380_p0 = por %p6379_p13, %p6378_p12 }
  0x1e   :  { %p6381_p1 = pnand %p6380_p0, %p6374_p11 }
  0x20   :  { %6384 = shalt.err (!%p6381_p1)
}
  0x21   :  { %38 = dma.hbm_to_vmem [thread:$0]  %s8124_s3, 32768, %s33_s30, [#allocation6], %s6390_s25, %s6390_s25, %s6391_s26  }
  0x22   :  { %6385 = dma.done.wait [#allocation4], 5120  }
  0x23   :  { %6386 = vsyncadd [#allocation4], 4294962176 }
  0x24   :  { %6387 = dma.done.wait [#allocation6], 32768  }
  0x25   :  { %6388 = vsyncadd [#allocation6], 4294934528  ;;  %v8126_v0 = vmov 0.0   ;;  %v54_v1 = vld [vmem:[#allocation3 + $0x8] sm:$0xff]  ;;  %v56_v3 = vld [vmem:[#allocation3 + $0x18] sm:$0xff]  ;;  %vm160_vm0 = vcmask 1046528  }
  0x26   :  { %249 = vmatprep.mubr.f32.mxu0 %v8126_v0  ;;  %362 = vmatprep.mubr.f32.mxu1 %v8126_v0  ;;  %v62_v2 = vld [vmem:[#allocation3 + $0x48] sm:$0xff]  ;;  %v64_v5 = vld [vmem:[#allocation3 + $0x58] sm:$0xff]  ;;  %v53_v6 = vld [vmem:[#allocation3] sm:$0xff]  ;;  %vm135_vm1 = vcmask 318464  }
  0x27   :  { %v3872_v4 = vpack.c.bf16 %v62_v2, %v54_v1  ;;  %v61_v7 = vld [vmem:[#allocation3 + $0x40] sm:$0xff]  ;;  %v3880_v8 = vpack.c.bf16 %v64_v5, %v56_v3  ;;  %v55_v10 = vld [vmem:[#allocation3 + $0x10] sm:$0xff]  ;;  %v70_v12 = vld [vmem:[#allocation3 + $0x88] sm:$0xff] }
  0x28   :  { %v3874_v9 = vpack.c.bf16 %v61_v7, %v53_v6  ;;  %v63_v11 = vld [vmem:[#allocation3 + $0x50] sm:$0xff]  ;;  %v78_v14 = vld [vmem:[#allocation3 + $0xc8] sm:$0xff]  ;;  %v72_v15 = vld [vmem:[#allocation3 + $0x98] sm:$0xff] }
  0x29   :  { %3873 = vmatprep.subr.bf16.mxu0 %v3872_v4  ;;  %v3882_v13 = vpack.c.bf16 %v63_v11, %v55_v10  ;;  %v80_v16 = vld [vmem:[#allocation3 + $0xd8] sm:$0xff]  ;;  %3881 = vmatprep.subr.bf16.mxu1 %v3880_v8  ;;  %v3876_v17 = vpack.c.bf16 %v78_v14, %v70_v12  ;;  %v69_v19 = vld [vmem:[#allocation3 + $0x80] sm:$0xff]  ;;  %v71_v21 = vld [vmem:[#allocation3 + $0x90] sm:$0xff] }
  0x2a   :  { %3875 = vmatpush1.bf16.msra.mxu0 %v3874_v9  ;;  %v3884_v18 = vpack.c.bf16 %v80_v16, %v72_v15  ;;  %v77_v20 = vld [vmem:[#allocation3 + $0xc0] sm:$0xff]  ;;  %v79_v23 = vld [vmem:[#allocation3 + $0xd0] sm:$0xff]  ;;  %v86_v25 = vld [vmem:[#allocation3 + $0x108] sm:$0x7f] }
  0x2b   :  { %3883 = vmatpush1.bf16.msra.mxu1 %v3882_v13  ;;  %v3878_v22 = vpack.c.bf16 %v77_v20, %v69_v19  ;;  %3877 = vmatprep.subr.bf16.mxu0 %v3876_v17  ;;  %v3886_v24 = vpack.c.bf16 %v79_v23, %v71_v21  ;;  %v88_v26 = vld [vmem:[#allocation3 + $0x118] sm:$0x7f]  ;;  %v58_v27 = vld [vmem:[#allocation3 + $0x28] sm:$0xff]  ;;  %v57_v29 = vld [vmem:[#allocation3 + $0x20] sm:$0xff] }
  0x2c   :  { %3885 = vmatprep.subr.bf16.mxu1 %v3884_v18  ;;  %v66_v28 = vld [vmem:[#allocation3 + $0x68] sm:$0xff]  ;;  %v65_v30 = vld [vmem:[#allocation3 + $0x60] sm:$0xff]  ;;  %v87_v34 = vld [vmem:[#allocation3 + $0x110] sm:$0x7f] }
  0x2d   :  { %v85_v31 = vld [vmem:[#allocation3 + $0x100] sm:$0x7f]  ;;  %v74_v32 = vld [vmem:[#allocation3 + $0xa8] sm:$0xff]  ;;  %v3888_v36 = vpack.c.bf16 %v66_v28, %v58_v27  ;;  %v60_v37 = vld [vmem:[#allocation3 + $0x38] sm:$0xff]  ;;  %v3890_v38 = vpack.c.bf16 %v65_v30, %v57_v29 }
  0x2e   :  { %3879 = vmatpush1.bf16.msra.mxu0 %v3878_v22  ;;  %v82_v33 = vld [vmem:[#allocation3 + $0xe8] sm:$0xff]  ;;  %v6450_v35 = vld [vmem:[%s8121_s0] sm:$0xff]  ;;  %v68_v39 = vld [vmem:[#allocation3 + $0x78] sm:$0xff] }
  0x2f   :  { %3887 = vmatpush1.bf16.msra.mxu1 %v3886_v24  ;;  %3770 = vmatprep.subr.msk.mxu0 %vm160_vm0, %v86_v25  ;;  %v3892_v40 = vpack.c.bf16 %v82_v33, %v74_v32  ;;  %v73_v41 = vld [vmem:[#allocation3 + $0xa0] sm:$0xff]  ;;  %v3896_v43 = vpack.c.bf16 %v68_v39, %v60_v37  ;;  %v59_v44 = vld [vmem:[#allocation3 + $0x30] sm:$0xff]  ;;  %v6461_v46 = vld [vmem:[%s8121_s0 + $0x8] sm:$0xff] }
  0x30   :  { %3780 = vmatprep.subr.msk.mxu1 %vm160_vm0, %v88_v26  ;;  %v81_v42 = vld [vmem:[#allocation3 + $0xe0] sm:$0xff]  ;;  %v67_v45 = vld [vmem:[#allocation3 + $0x70] sm:$0xff]  ;;  %v76_v47 = vld [vmem:[#allocation3 + $0xb8] sm:$0xff] }
  0x31   :  { %v84_v48 = vld [vmem:[#allocation3 + $0xf8] sm:$0xff]  ;;  %v3894_v49 = vpack.c.bf16 %v81_v42, %v73_v41  ;;  %v3898_v50 = vpack.c.bf16 %v67_v45, %v59_v44  ;;  %v90_v51 = vld [vmem:[#allocation3 + $0x128] sm:$0x7f]  ;;  %v75_v52 = vld [vmem:[#allocation3 + $0xb0] sm:$0xff] }
  0x32   :  { %3771 = vmatpush1.msk.msra.mxu0 %vm160_vm0, %v85_v31  ;;  %v3900_v53 = vpack.c.bf16 %v84_v48, %v76_v47  ;;  %v83_v54 = vld [vmem:[#allocation3 + $0xf0] sm:$0xff]  ;;  %v702_v55 = vld [vmem:[#allocation5 + $0x8] sm:$0xff]  ;;  %v89_v58 = vld [vmem:[#allocation3 + $0x120] sm:$0x7f] }
  0x33   :  { %3781 = vmatpush1.msk.msra.mxu1 %vm160_vm0, %v87_v34  ;;  %3772 = vmatmul.mubr.msk.f32.vlgmr.msra.gmra.mrb[0].mxu0 %vm135_vm1, %v6450_v35  ;;  %v710_v56 = vld [vmem:[#allocation5 + $0x48] sm:$0xff]  ;;  %v6473_v57 = vld [vmem:[%s8121_s0 + $0x10] sm:$0xff]  ;;  %v3902_v59 = vpack.c.bf16 %v83_v54, %v75_v52  ;;  %v6484_v61 = vld [vmem:[%s8121_s0 + $0x18] sm:$0xff] }
  0x34   :  { %3782 = vmatmul.mubr.msk.f32.vlgmr.msra.gmra.mrb[0].mxu1 %vm135_vm1, %v6450_v35  ;;  %3889 = vmatprep.subr.bf16.mxu0 %v3888_v36  ;;  %v6477_v60 = vpack.c.bf16 %v710_v56, %v702_v55  ;;  %v92_v62 = vld [vmem:[#allocation3 + $0x138] sm:$0x7f]  ;;  %v91_v2 = vld [vmem:[#allocation3 + $0x130] sm:$0x7f]  ;;  %v6503_v4 = vld [vmem:[%s8121_s0 + $0x20] sm:$0xff] }
  0x35   :  { %3891 = vmatpush1.bf16.msra.mxu0 %v3890_v38  ;;  %255 = vmatprep.mubr.f32.mxu0 %v8126_v0  ;;  %v704_v63 = vld [vmem:[#allocation5 + $0x18] sm:$0xff]  ;;  %v6516_v5 = vld [vmem:[%s8121_s0 + $0x28] sm:$0xff]  ;;  %v6527_v6 = vld [vmem:[%s8121_s0 + $0x30] sm:$0xff] }
  0x36   :  { %368 = vmatprep.mubr.f32.mxu1 %v8126_v0  ;;  %3893 = vmatprep.subr.bf16.mxu0 %v3892_v40  ;;  %8411 = vst [vmem:[#allocation9_spill] sm:$0xff] %v6477_v60  ;;  %v712_v1 = vld [vmem:[#allocation5 + $0x58] sm:$0xff]  ;;  %v701_v8 = vld [vmem:[#allocation5] sm:$0xff]  ;;  %v703_v10 = vld [vmem:[#allocation5 + $0x10] sm:$0xff] }
  0x37   :  { %3773 = vmatmul.mubr.msk.f32.gmra.mrb[2].mxu0 %vm135_vm1, %v6461_v46  ;;  %3897 = vmatprep.subr.bf16.mxu1 %v3896_v43  ;;  %v6495_v3 = vpack.c.bf16 %v712_v1, %v704_v63  ;;  %v6538_v7 = vld [vmem:[%s8121_s0 + $0x38] sm:$0xff]  ;;  %v709_v9 = vld [vmem:[#allocation5 + $0x40] sm:$0xff]  ;;  %v711_v11 = vld [vmem:[#allocation5 + $0x50] sm:$0xff] }
  0x38   :  { %3783 = vmatmul.mubr.msk.f32.gmra.mrb[2].mxu1 %vm135_vm1, %v6461_v46  ;;  %261 = vmatprep.mubr.f32.mxu0 %v8126_v0  ;;  %v718_v12 = vld [vmem:[#allocation5 + $0x88] sm:$0xff]  ;;  %v720_v14 = vld [vmem:[#allocation5 + $0x98] sm:$0xff]  ;;  %v6546_v16 = vpack.c.bf16 %v709_v9, %v701_v8  ;;  %v6549_v17 = vpack.c.bf16 %v711_v11, %v703_v10  ;;  %v717_v19 = vld [vmem:[#allocation5 + $0x80] sm:$0xff] }
  0x39   :  { %374 = vmatprep.mubr.f32.mxu1 %v8126_v0  ;;  %3895 = vmatpush1.bf16.msra.mxu0 %v3894_v49  ;;  %8412 = vst [vmem:[#allocation10_spill] sm:$0xff] %v6495_v3  ;;  %v726_v13 = vld [vmem:[#allocation5 + $0xc8] sm:$0xff]  ;;  %v728_v15 = vld [vmem:[#allocation5 + $0xd8] sm:$0xff]  ;;  %v725_v20 = vld [vmem:[#allocation5 + $0xc0] sm:$0xff] }
  0x3a   :  { %3899 = vmatpush1.bf16.msra.mxu1 %v3898_v50  ;;  %3790 = vmatprep.subr.msk.mxu0 %vm160_vm0, %v90_v51  ;;  %8413 = vst [vmem:[#allocation11_spill] sm:$0xff] %v6546_v16  ;;  %8414 = vst [vmem:[#allocation12_spill] sm:$0xff] %v6549_v17  ;;  %v6551_v18 = vpack.c.bf16 %v726_v13, %v718_v12  ;;  %v719_v21 = vld [vmem:[#allocation5 + $0x90] sm:$0xff]  ;;  %v6553_v22 = vpack.c.bf16 %v728_v15, %v720_v14  ;;  %v734_v24 = vld [vmem:[#allocation5 + $0x108] sm:$0xff] }
  0x3b   :  { %3774 = vmatmul.mubr.msk.f32.gmra.mrb[4].mxu0 %vm135_vm1, %v6473_v57  ;;  %3901 = vmatprep.subr.bf16.mxu1 %v3900_v53  ;;  %v727_v23 = vld [vmem:[#allocation5 + $0xd0] sm:$0xff]  ;;  %v742_v25 = vld [vmem:[#allocation5 + $0x148] sm:$0xff]  ;;  %v736_v26 = vld [vmem:[#allocation5 + $0x118] sm:$0xff]  ;;  %v6560_v28 = vpack.c.bf16 %v725_v20, %v717_v19 }
  0x3c   :  { %3784 = vmatmul.mubr.msk.f32.gmra.mrb[4].mxu1 %vm135_vm1, %v6473_v57  ;;  %267 = vmatprep.mubr.f32.mxu0 %v8126_v0  ;;  %8415 = vst [vmem:[#allocation13_spill] sm:$0xff] %v6551_v18  ;;  %8416 = vst [vmem:[#allocation14_spill] sm:$0xff] %v6553_v22  ;;  %v744_v27 = vld [vmem:[#allocation5 + $0x158] sm:$0xff]  ;;  %v6564_v29 = vpack.c.bf16 %v727_v23, %v719_v21  ;;  %v6566_v30 = vpack.c.bf16 %v742_v25, %v734_v24  ;;  %v733_v31 = vld [vmem:[#allocation5 + $0x100] sm:$0xff] }
  0x3d   :  { %380 = vmatprep.mubr.f32.mxu1 %v8126_v0  ;;  %3791 = vmatpush1.msk.msra.mxu0 %vm160_vm0, %v89_v58  ;;  %8417 = vst [vmem:[#allocation15_spill] sm:$0xff] %v6560_v28  ;;  %v741_v32 = vld [vmem:[#allocation5 + $0x140] sm:$0xff]  ;;  %v735_v33 = vld [vmem:[#allocation5 + $0x110] sm:$0xff]  ;;  %v6569_v34 = vpack.c.bf16 %v744_v27, %v736_v26  ;;  %v750_v36 = vld [vmem:[#allocation5 + $0x188] sm:$0xff] }
  0x3e   :  { %3903 = vmatpush1.bf16.msra.mxu1 %v3902_v59  ;;  %3905 = vmatprep.subr.bf16.mxu0 %v6477_v60  ;;  %8418 = vst [vmem:[#allocation16_spill] sm:$0xff] %v6564_v29  ;;  %8419 = vst [vmem:[#allocation17_spill] sm:$0xff] %v6566_v30  ;;  %v758_v37 = vld [vmem:[#allocation5 + $0x1c8] sm:$0xff]  ;;  %v752_v38 = vld [vmem:[#allocation5 + $0x198] sm:$0xff]  ;;  %v6576_v40 = vpack.c.bf16 %v741_v32, %v733_v31 }
  0x3f   :  { %3775 = vmatmul.mubr.msk.f32.gmra.mrb[6].mxu0 %vm135_vm1, %v6484_v61  ;;  %3800 = vmatprep.subr.msk.mxu1 %vm160_vm0, %v92_v62  ;;  %8420 = vst [vmem:[#allocation18_spill] sm:$0xff] %v6569_v34  ;;  %v760_v39 = vld [vmem:[#allocation5 + $0x1d8] sm:$0xff]  ;;  %v6584_v42 = vpack.c.bf16 %v758_v37, %v750_v36  ;;  %v749_v43 = vld [vmem:[#allocation5 + $0x180] sm:$0xff]  ;;  %v751_v45 = vld [vmem:[#allocation5 + $0x190] sm:$0xff] }
  0x40   :  { %3785 = vmatmul.mubr.msk.f32.gmra.mrb[6].mxu1 %vm135_vm1, %v6484_v61  ;;  %273 = vmatprep.mubr.f32.mxu0 %v8126_v0  ;;  %8421 = vst [vmem:[#allocation19_spill] sm:$0xff] %v6576_v40  ;;  %v757_v44 = vld [vmem:[#allocation5 + $0x1c0] sm:$0xff]  ;;  %v6587_v47 = vpack.c.bf16 %v760_v39, %v752_v38  ;;  %v759_v48 = vld [vmem:[#allocation5 + $0x1d0] sm:$0xff]  ;;  %v766_v49 = vld [vmem:[#allocation5 + $0x208] sm:$0xff] }
  0x41   :  { %386 = vmatprep.mubr.f32.mxu1 %v8126_v0  ;;  %8423 = vst [vmem:[#allocation21_spill] sm:$0xff] %v6584_v42  ;;  %v774_v50 = vld [vmem:[#allocation5 + $0x248] sm:$0xff]  ;;  %v776_v51 = vld [vmem:[#allocation5 + $0x258] sm:$0xff]  ;;  %v6594_v52 = vpack.c.bf16 %v757_v44, %v749_v43  ;;  %v6600_v53 = vpack.c.bf16 %v759_v48, %v751_v45  ;;  %v765_v55 = vld [vmem:[#allocation5 + $0x200] sm:$0xff] }
  0x42   :  { %3801 = vmatpush1.msk.msra.mxu1 %vm160_vm0, %v91_v2  ;;  %8424 = vst [vmem:[#allocation22_spill] sm:$0xff] %v6587_v47  ;;  %v6602_v54 = vpack.c.bf16 %v774_v50, %v766_v49  ;;  %v773_v56 = vld [vmem:[#allocation5 + $0x240] sm:$0xff]  ;;  %v767_v58 = vld [vmem:[#allocation5 + $0x210] sm:$0xff]  ;;  %v782_v63 = vld [vmem:[#allocation5 + $0x288] sm:$0xff] }
  0x43   :  { %3776 = vmatmul.mubr.msk.f32.gmra.mrb[8].mxu0 %vm135_vm1, %v6503_v4  ;;  %3969 = vmatprep.subr.bf16.mxu1 %v6495_v3  ;;  %8425 = vst [vmem:[#allocation23_spill] sm:$0xff] %v6594_v52  ;;  %8426 = vst [vmem:[#allocation24_spill] sm:$0xff] %v6600_v53  ;;  %v775_v62 = vld [vmem:[#allocation5 + $0x250] sm:$0xff]  ;;  %v790_v1 = vld [vmem:[#allocation5 + $0x2c8] sm:$0xff]  ;;  %v6612_v8 = vpack.c.bf16 %v773_v56, %v765_v55 }
  0x44   :  { %3786 = vmatmul.mubr.msk.f32.gmra.mrb[8].mxu1 %vm135_vm1, %v6503_v4  ;;  %279 = vmatprep.mubr.f32.mxu0 %v8126_v0  ;;  %8427 = vst [vmem:[#allocation25_spill] sm:$0xff] %v6602_v54  ;;  %v792_v2 = vld [vmem:[#allocation5 + $0x2d8] sm:$0xff]  ;;  %v6618_v9 = vpack.c.bf16 %v775_v62, %v767_v58  ;;  %v6620_v10 = vpack.c.bf16 %v790_v1, %v782_v63  ;;  %v781_v11 = vld [vmem:[#allocation5 + $0x280] sm:$0xff]  ;;  %v783_v13 = vld [vmem:[#allocation5 + $0x290] sm:$0xff] }
  0x45   :  { %392 = vmatprep.mubr.f32.mxu1 %v8126_v0  ;;  %8429 = vst [vmem:[#allocation27_spill] sm:$0xff] %v6612_v8  ;;  %v789_v12 = vld [vmem:[#allocation5 + $0x2c0] sm:$0xff]  ;;  %v791_v15 = vld [vmem:[#allocation5 + $0x2d0] sm:$0xff]  ;;  %v798_v19 = vld [vmem:[#allocation5 + $0x308] sm:$0xff] }
  0x46   :  { %8430 = vst [vmem:[#allocation28_spill] sm:$0xff] %v6618_v9  ;;  %8431 = vst [vmem:[#allocation29_spill] sm:$0xff] %v6620_v10  ;;  %v806_v20 = vld [vmem:[#allocation5 + $0x348] sm:$0xff]  ;;  %v808_v21 = vld [vmem:[#allocation5 + $0x358] sm:$0xff]  ;;  %v6630_v23 = vpack.c.bf16 %v789_v12, %v781_v11  ;;  %v6636_v24 = vpack.c.bf16 %v791_v15, %v783_v13 }
  0x47   :  { %3777 = vmatmul.mubr.msk.f32.gmra.mrb[10].mxu0 %vm135_vm1, %v6516_v5  ;;  %v6638_v25 = vpack.c.bf16 %v806_v20, %v798_v19  ;;  %v797_v26 = vld [vmem:[#allocation5 + $0x300] sm:$0xff]  ;;  %v799_v31 = vld [vmem:[#allocation5 + $0x310] sm:$0xff]  ;;  %v822_v36 = vld [vmem:[#allocation5 + $0x3c8] sm:$0xff] }
  0x48   :  { %3787 = vmatmul.mubr.msk.f32.gmra.mrb[10].mxu1 %vm135_vm1, %v6516_v5  ;;  %285 = vmatprep.mubr.f32.mxu0 %v8126_v0  ;;  %8433 = vst [vmem:[#allocation31_spill] sm:$0xff] %v6630_v23  ;;  %8434 = vst [vmem:[#allocation32_spill] sm:$0xff] %v6636_v24  ;;  %v805_v27 = vld [vmem:[#allocation5 + $0x340] sm:$0xff]  ;;  %v824_v37 = vld [vmem:[#allocation5 + $0x3d8] sm:$0xff] }
  0x49   :  { %398 = vmatprep.mubr.f32.mxu1 %v8126_v0  ;;  %8435 = vst [vmem:[#allocation33_spill] sm:$0xff] %v6638_v25  ;;  %v6648_v38 = vpack.c.bf16 %v805_v27, %v797_v26  ;;  %v813_v44 = vld [vmem:[#allocation5 + $0x380] sm:$0xff]  ;;  %v815_v48 = vld [vmem:[#allocation5 + $0x390] sm:$0xff]  ;;  %v840_v55 = vld [vmem:[#allocation5 + $0x458] sm:$0xff] }
  0x4a   :  { %v821_v45 = vld [vmem:[#allocation5 + $0x3c0] sm:$0xff]  ;;  %v823_v50 = vld [vmem:[#allocation5 + $0x3d0] sm:$0xff]  ;;  %v846_v12 = vld [vmem:[#allocation5 + $0x488] sm:$0xff] }
  0x4b   :  { %3778 = vmatmul.mubr.msk.f32.gmra.mrb[12].mxu0 %vm135_vm1, %v6527_v6  ;;  %8437 = vst [vmem:[#allocation35_spill] sm:$0xff] %v6648_v38  ;;  %v6666_v56 = vpack.c.bf16 %v821_v45, %v813_v44  ;;  %v6672_v58 = vpack.c.bf16 %v823_v50, %v815_v48  ;;  %v829_v63 = vld [vmem:[#allocation5 + $0x400] sm:$0xff]  ;;  %v839_v11 = vld [vmem:[#allocation5 + $0x450] sm:$0xff]  ;;  %v854_v13 = vld [vmem:[#allocation5 + $0x4c8] sm:$0xff] }
  0x4c   :  { %3788 = vmatmul.mubr.msk.f32.gmra.mrb[12].mxu1 %vm135_vm1, %v6527_v6  ;;  %291 = vmatprep.mubr.f32.mxu0 %v8126_v0  ;;  %v837_v1 = vld [vmem:[#allocation5 + $0x440] sm:$0xff]  ;;  %v856_v15 = vld [vmem:[#allocation5 + $0x4d8] sm:$0xff]  ;;  %v847_v27 = vld [vmem:[#allocation5 + $0x490] sm:$0xff] }
  0x4d   :  { %404 = vmatprep.mubr.f32.mxu1 %v8126_v0  ;;  %8441 = vst [vmem:[#allocation39_spill] sm:$0xff] %v6666_v56  ;;  %8442 = vst [vmem:[#allocation40_spill] sm:$0xff] %v6672_v58  ;;  %v6684_v19 = vpack.c.bf16 %v837_v1, %v829_v63  ;;  %v853_v26 = vld [vmem:[#allocation5 + $0x4c0] sm:$0xff]  ;;  %v886_v63 = vld [vmem:[#allocation5 + $0x5c8] sm:$0xff] }
  0x4e   :  { %v861_v48 = vld [vmem:[#allocation5 + $0x500] sm:$0xff]  ;;  %v880_v1 = vld [vmem:[#allocation5 + $0x598] sm:$0xff] }
  0x4f   :  { %3779 = vmatmul.mubr.msk.f32.gmra.mrb[14].mxu0 %vm135_vm1, %v6538_v7  ;;  %8445 = vst [vmem:[#allocation43_spill] sm:$0xff] %v6684_v19  ;;  %v869_v50 = vld [vmem:[#allocation5 + $0x540] sm:$0xff] }
  0x50   :  { %3789 = vmatmul.mubr.msk.f32.gmra.mrb[14].mxu1 %vm135_vm1, %v6538_v7  ;;  %475 = vmatprep.mubr.f32.mxu0 %v8126_v0 }
  0x51   :  { %588 = vmatprep.mubr.f32.mxu1 %v8126_v0 }
  0x53   :  { %3792 = vmatmul.mubr.msk.f32.vlgmr.msra.gmra.mrb[16].mxu0 %vm135_vm1, %v6450_v35 }
  0x54   :  { %3802 = vmatmul.mubr.msk.f32.vlgmr.msra.gmra.mrb[16].mxu1 %vm135_vm1, %v6450_v35  ;;  %3907 = vmatpush1.bf16.msra.mxu0 %v6546_v16  ;;  %v743_v35 = vld [vmem:[#allocation5 + $0x150] sm:$0xff] }
  0x55   :  { %3971 = vmatpush1.bf16.msra.mxu1 %v6549_v17  ;;  %3909 = vmatprep.subr.bf16.mxu0 %v6551_v18  ;;  %v6582_v41 = vpack.c.bf16 %v743_v35, %v735_v33  ;;  %v807_v33 = vld [vmem:[#allocation5 + $0x350] sm:$0xff]  ;;  %v814_v35 = vld [vmem:[#allocation5 + $0x388] sm:$0xff] }
  0x56   :  { %3973 = vmatprep.subr.bf16.mxu1 %v6553_v22  ;;  %481 = vmatprep.mubr.f32.mxu0 %v8126_v0  ;;  %v6654_v39 = vpack.c.bf16 %v807_v33, %v799_v31  ;;  %v6656_v43 = vpack.c.bf16 %v822_v36, %v814_v35  ;;  %v855_v33 = vld [vmem:[#allocation5 + $0x4d0] sm:$0xff]  ;;  %v862_v35 = vld [vmem:[#allocation5 + $0x508] sm:$0xff] }
  0x57   :  { %594 = vmatprep.mubr.f32.mxu1 %v8126_v0  ;;  %3793 = vmatmul.mubr.msk.f32.gmra.mrb[18].mxu0 %vm135_vm1, %v6461_v46  ;;  %8422 = vst [vmem:[#allocation20_spill] sm:$0xff] %v6582_v41  ;;  %v870_v36 = vld [vmem:[#allocation5 + $0x548] sm:$0xff]  ;;  %v6704_v44 = vpack.c.bf16 %v855_v33, %v847_v27  ;;  %v887_v27 = vld [vmem:[#allocation5 + $0x5d0] sm:$0xff] }
  0x58   :  { %3911 = vmatpush1.bf16.msra.mxu0 %v6560_v28  ;;  %3803 = vmatmul.mubr.msk.f32.gmra.mrb[18].mxu1 %vm135_vm1, %v6461_v46  ;;  %v768_v46 = vld [vmem:[#allocation5 + $0x218] sm:$0xff]  ;;  %8438 = vst [vmem:[#allocation36_spill] sm:$0xff] %v6654_v39  ;;  %8439 = vst [vmem:[#allocation37_spill] sm:$0xff] %v6656_v43  ;;  %v6706_v45 = vpack.c.bf16 %v870_v36, %v862_v35  ;;  %v894_v33 = vld [vmem:[#allocation5 + $0x608] sm:$0xff] }
  0x59   :  { %3975 = vmatpush1.bf16.msra.mxu1 %v6564_v29  ;;  %3913 = vmatprep.subr.bf16.mxu0 %v6566_v30  ;;  %v6605_v59 = vpack.c.bf16 %v776_v51, %v768_v46  ;;  %v830_v46 = vld [vmem:[#allocation5 + $0x408] sm:$0xff]  ;;  %8450 = vst [vmem:[#allocation48_spill] sm:$0xff] %v6704_v44  ;;  %v896_v36 = vld [vmem:[#allocation5 + $0x618] sm:$0xff] }
  0x5a   :  { %3977 = vmatprep.subr.bf16.mxu1 %v6569_v34  ;;  %487 = vmatprep.mubr.f32.mxu0 %v8126_v0  ;;  %v838_v51 = vld [vmem:[#allocation5 + $0x448] sm:$0xff]  ;;  %8451 = vst [vmem:[#allocation49_spill] sm:$0xff] %v6706_v45 }
  0x5b   :  { %600 = vmatprep.mubr.f32.mxu1 %v8126_v0  ;;  %3794 = vmatmul.mubr.msk.f32.gmra.mrb[20].mxu0 %vm135_vm1, %v6473_v57  ;;  %8428 = vst [vmem:[#allocation26_spill] sm:$0xff] %v6605_v59  ;;  %v6674_v62 = vpack.c.bf16 %v838_v51, %v830_v46  ;;  %v863_v46 = vld [vmem:[#allocation5 + $0x510] sm:$0xff]  ;;  %v902_v35 = vld [vmem:[#allocation5 + $0x648] sm:$0xff] }
  0x5c   :  { %3915 = vmatpush1.bf16.msra.mxu0 %v6576_v40  ;;  %3804 = vmatmul.mubr.msk.f32.gmra.mrb[20].mxu1 %vm135_vm1, %v6473_v57  ;;  %v784_v57 = vld [vmem:[#allocation5 + $0x298] sm:$0xff] }
  0x5d   :  { %3979 = vmatpush1.bf16.msra.mxu1 %v6582_v41  ;;  %3917 = vmatprep.subr.bf16.mxu0 %v6584_v42  ;;  %v6623_v14 = vpack.c.bf16 %v792_v2, %v784_v57  ;;  %8443 = vst [vmem:[#allocation41_spill] sm:$0xff] %v6674_v62  ;;  %v831_v57 = vld [vmem:[#allocation5 + $0x410] sm:$0xff] }
  0x5e   :  { %3981 = vmatprep.subr.bf16.mxu1 %v6587_v47  ;;  %493 = vmatprep.mubr.f32.mxu0 %v8126_v0  ;;  %v6690_v20 = vpack.c.bf16 %v839_v11, %v831_v57  ;;  %v888_v57 = vld [vmem:[#allocation5 + $0x5d8] sm:$0xff]  ;;  %v6712_v11 = vpack.c.bf16 %v869_v50, %v861_v48  ;;  %v6730_v50 = vpack.c.bf16 %v902_v35, %v894_v33  ;;  %v909_v33 = vld [vmem:[#allocation5 + $0x680] sm:$0xff] }
  0x5f   :  { %606 = vmatprep.mubr.f32.mxu1 %v8126_v0  ;;  %3795 = vmatmul.mubr.msk.f32.gmra.mrb[22].mxu0 %vm135_vm1, %v6484_v61  ;;  %8432 = vst [vmem:[#allocation30_spill] sm:$0xff] %v6623_v14  ;;  %v917_v35 = vld [vmem:[#allocation5 + $0x6c0] sm:$0xff] }
  0x60   :  { %3919 = vmatpush1.bf16.msra.mxu0 %v6594_v52  ;;  %3805 = vmatmul.mubr.msk.f32.gmra.mrb[22].mxu1 %vm135_vm1, %v6484_v61  ;;  %v800_v61 = vld [vmem:[#allocation5 + $0x318] sm:$0xff]  ;;  %8446 = vst [vmem:[#allocation44_spill] sm:$0xff] %v6690_v20  ;;  %8453 = vst [vmem:[#allocation51_spill] sm:$0xff] %v6712_v11 }
  0x61   :  { %3983 = vmatpush1.bf16.msra.mxu1 %v6600_v53  ;;  %3921 = vmatprep.subr.bf16.mxu0 %v6602_v54  ;;  %v6641_v32 = vpack.c.bf16 %v808_v21, %v800_v61  ;;  %v6692_v61 = vpack.c.bf16 %v854_v13, %v846_v12  ;;  %v845_v21 = vld [vmem:[#allocation5 + $0x480] sm:$0xff]  ;;  %8459 = vst [vmem:[#allocation57_spill] sm:$0xff] %v6730_v50 }
  0x62   :  { %3985 = vmatprep.subr.bf16.mxu1 %v6605_v59  ;;  %499 = vmatprep.mubr.f32.mxu0 %v8126_v0 }
  0x63   :  { %612 = vmatprep.mubr.f32.mxu1 %v8126_v0  ;;  %3796 = vmatmul.mubr.msk.f32.gmra.mrb[24].mxu0 %vm135_vm1, %v6503_v4  ;;  %8436 = vst [vmem:[#allocation34_spill] sm:$0xff] %v6641_v32  ;;  %8447 = vst [vmem:[#allocation45_spill] sm:$0xff] %v6692_v61 }
  0x64   :  { %3923 = vmatpush1.bf16.msra.mxu0 %v6612_v8  ;;  %3806 = vmatmul.mubr.msk.f32.gmra.mrb[24].mxu1 %vm135_vm1, %v6503_v4  ;;  %v816_v4 = vld [vmem:[#allocation5 + $0x398] sm:$0xff] }
  0x65   :  { %3987 = vmatpush1.bf16.msra.mxu1 %v6618_v9  ;;  %3925 = vmatprep.subr.bf16.mxu0 %v6620_v10  ;;  %v6659_v49 = vpack.c.bf16 %v824_v37, %v816_v4  ;;  %v872_v4 = vld [vmem:[#allocation5 + $0x558] sm:$0xff]  ;;  %v6700_v37 = vpack.c.bf16 %v853_v26, %v845_v21  ;;  %v879_v21 = vld [vmem:[#allocation5 + $0x590] sm:$0xff]  ;;  %v6721_v26 = vpack.c.bf16 %v888_v57, %v880_v1  ;;  %v910_v57 = vld [vmem:[#allocation5 + $0x688] sm:$0xff] }
  0x66   :  { %3989 = vmatprep.subr.bf16.mxu1 %v6623_v14  ;;  %505 = vmatprep.mubr.f32.mxu0 %v8126_v0  ;;  %v6728_v48 = vpack.c.bf16 %v887_v27, %v879_v21  ;;  %v903_v1 = vld [vmem:[#allocation5 + $0x650] sm:$0xff] }
  0x67   :  { %618 = vmatprep.mubr.f32.mxu1 %v8126_v0  ;;  %3797 = vmatmul.mubr.msk.f32.gmra.mrb[26].mxu0 %vm135_vm1, %v6516_v5  ;;  %8440 = vst [vmem:[#allocation38_spill] sm:$0xff] %v6659_v49  ;;  %8449 = vst [vmem:[#allocation47_spill] sm:$0xff] %v6700_v37 }
  0x68   :  { %3927 = vmatpush1.bf16.msra.mxu0 %v6630_v23  ;;  %3807 = vmatmul.mubr.msk.f32.gmra.mrb[26].mxu1 %vm135_vm1, %v6516_v5  ;;  %v832_v5 = vld [vmem:[#allocation5 + $0x418] sm:$0xff]  ;;  %8456 = vst [vmem:[#allocation54_spill] sm:$0xff] %v6721_v26  ;;  %8458 = vst [vmem:[#allocation56_spill] sm:$0xff] %v6728_v48 }
  0x69   :  { %3991 = vmatpush1.bf16.msra.mxu1 %v6636_v24  ;;  %3929 = vmatprep.subr.bf16.mxu0 %v6638_v25  ;;  %v6677_v2 = vpack.c.bf16 %v840_v55, %v832_v5  ;;  %v871_v5 = vld [vmem:[#allocation5 + $0x550] sm:$0xff]  ;;  %v878_v55 = vld [vmem:[#allocation5 + $0x588] sm:$0xff] }
  0x6a   :  { %3993 = vmatprep.subr.bf16.mxu1 %v6641_v32  ;;  %511 = vmatprep.mubr.f32.mxu0 %v8126_v0  ;;  %v6716_v12 = vpack.c.bf16 %v871_v5, %v863_v46  ;;  %v6718_v13 = vpack.c.bf16 %v886_v63, %v878_v55  ;;  %v893_v46 = vld [vmem:[#allocation5 + $0x600] sm:$0xff]  ;;  %v895_v55 = vld [vmem:[#allocation5 + $0x610] sm:$0xff] }
  0x6b   :  { %624 = vmatprep.mubr.f32.mxu1 %v8126_v0  ;;  %3798 = vmatmul.mubr.msk.f32.gmra.mrb[28].mxu0 %vm135_vm1, %v6527_v6  ;;  %8444 = vst [vmem:[#allocation42_spill] sm:$0xff] %v6677_v2  ;;  %v901_v5 = vld [vmem:[#allocation5 + $0x640] sm:$0xff]  ;;  %v6740_v21 = vpack.c.bf16 %v903_v1, %v895_v55 }
  0x6c   :  { %3931 = vmatpush1.bf16.msra.mxu0 %v6648_v38  ;;  %3808 = vmatmul.mubr.msk.f32.gmra.mrb[28].mxu1 %vm135_vm1, %v6527_v6  ;;  %v848_v6 = vld [vmem:[#allocation5 + $0x498] sm:$0xff]  ;;  %8454 = vst [vmem:[#allocation52_spill] sm:$0xff] %v6716_v12  ;;  %8455 = vst [vmem:[#allocation53_spill] sm:$0xff] %v6718_v13  ;;  %v925_v1 = vld [vmem:[#allocation5 + $0x700] sm:$0xff] }
  0x6d   :  { %3995 = vmatpush1.bf16.msra.mxu1 %v6654_v39  ;;  %3933 = vmatprep.subr.bf16.mxu0 %v6656_v43  ;;  %v6695_v31 = vpack.c.bf16 %v856_v15, %v848_v6  ;;  %v877_v6 = vld [vmem:[#allocation5 + $0x580] sm:$0xff]  ;;  %8462 = vst [vmem:[#allocation60_spill] sm:$0xff] %v6740_v21 }
  0x6e   :  { %3997 = vmatprep.subr.bf16.mxu1 %v6659_v49  ;;  %517 = vmatprep.mubr.f32.mxu0 %v8126_v0  ;;  %v885_v15 = vld [vmem:[#allocation5 + $0x5c0] sm:$0xff] }
  0x6f   :  { %630 = vmatprep.mubr.f32.mxu1 %v8126_v0  ;;  %3799 = vmatmul.mubr.msk.f32.gmra.mrb[30].mxu0 %vm135_vm1, %v6538_v7  ;;  %8448 = vst [vmem:[#allocation46_spill] sm:$0xff] %v6695_v31 }
  0x70   :  { %3935 = vmatpush1.bf16.msra.mxu0 %v6666_v56  ;;  %3809 = vmatmul.mubr.msk.f32.gmra.mrb[30].mxu1 %vm135_vm1, %v6538_v7  ;;  %v864_v7 = vld [vmem:[#allocation5 + $0x518] sm:$0xff] }
  0x71   :  { %3999 = vmatpush1.bf16.msra.mxu1 %v6672_v58  ;;  %3937 = vmatprep.subr.bf16.mxu0 %v6674_v62  ;;  %v6709_v51 = vpack.c.bf16 %v872_v4, %v864_v7  ;;  %v904_v7 = vld [vmem:[#allocation5 + $0x658] sm:$0xff]  ;;  %v6724_v4 = vpack.c.bf16 %v885_v15, %v877_v6 }
  0x72   :  { %4001 = vmatprep.subr.bf16.mxu1 %v6677_v2  ;;  %1021 = vmatprep.mubr.f32.mxu0 %v8126_v0  ;;  %v6733_v63 = vpack.c.bf16 %v904_v7, %v896_v36  ;;  %v912_v6 = vld [vmem:[#allocation5 + $0x698] sm:$0xff]  ;;  %v911_v36 = vld [vmem:[#allocation5 + $0x690] sm:$0xff] }
  0x73   :  { %1092 = vmatprep.mubr.f32.mxu1 %v8126_v0  ;;  %8452 = vst [vmem:[#allocation50_spill] sm:$0xff] %v6709_v51  ;;  %8457 = vst [vmem:[#allocation55_spill] sm:$0xff] %v6724_v4  ;;  %v918_v0 = vld [vmem:[#allocation5 + $0x6c8] sm:$0xff]  ;;  %v920_v15 = vld [vmem:[#allocation5 + $0x6d8] sm:$0xff] }
  0x74   :  { %3939 = vmatpush1.bf16.msra.mxu0 %v6684_v19  ;;  %8460 = vst [vmem:[#allocation58_spill] sm:$0xff] %v6733_v63  ;;  %v6742_v27 = vpack.c.bf16 %v918_v0, %v910_v57  ;;  %v6745_v7 = vpack.c.bf16 %v920_v15, %v912_v6  ;;  %v933_v57 = vld [vmem:[#allocation5 + $0x740] sm:$0xff]  ;;  %v927_v6 = vld [vmem:[#allocation5 + $0x710] sm:$0xff] }
  0x75   :  { %4003 = vmatpush1.bf16.msra.mxu1 %v6690_v20  ;;  %3941 = vmatprep.subr.bf16.mxu0 %v6692_v61 }
  0x76   :  { %4005 = vmatprep.subr.bf16.mxu1 %v6695_v31  ;;  %8463 = vst [vmem:[#allocation61_spill] sm:$0xff] %v6742_v27  ;;  %8464 = vst [vmem:[#allocation62_spill] sm:$0xff] %v6745_v7 }
  0x78   :  { %3943 = vmatpush1.bf16.msra.mxu0 %v6700_v37 }
  0x79   :  { %4007 = vmatpush1.bf16.msra.mxu1 %v6704_v44  ;;  %3945 = vmatprep.subr.bf16.mxu0 %v6706_v45 }
  0x7a   :  { %4009 = vmatprep.subr.bf16.mxu1 %v6709_v51 }
  0x7c   :  { %3947 = vmatpush1.bf16.msra.mxu0 %v6712_v11  ;;  %v754_v11 = vld [vmem:[#allocation5 + $0x1a8] sm:$0xff] }
  0x7d   :  { %4011 = vmatpush1.bf16.msra.mxu1 %v6716_v12  ;;  %3949 = vmatprep.subr.bf16.mxu0 %v6718_v13  ;;  %v6736_v12 = vpack.c.bf16 %v901_v5, %v893_v46  ;;  %v926_v13 = vld [vmem:[#allocation5 + $0x708] sm:$0xff]  ;;  %v928_v46 = vld [vmem:[#allocation5 + $0x718] sm:$0xff] }
  0x7e   :  { %4013 = vmatprep.subr.bf16.mxu1 %v6721_v26  ;;  %v919_v26 = vld [vmem:[#allocation5 + $0x6d0] sm:$0xff]  ;;  %v936_v5 = vld [vmem:[#allocation5 + $0x758] sm:$0xff] }
  0x7f   :  { %8461 = vst [vmem:[#allocation59_spill] sm:$0xff] %v6736_v12  ;;  %v6752_v0 = vpack.c.bf16 %v919_v26, %v911_v36  ;;  %v6757_v15 = vpack.c.bf16 %v936_v5, %v928_v46  ;;  %v949_v36 = vld [vmem:[#allocation5 + $0x7c0] sm:$0xff]  ;;  %v943_v46 = vld [vmem:[#allocation5 + $0x790] sm:$0xff] }
  0x80   :  { %3951 = vmatpush1.bf16.msra.mxu0 %v6724_v4  ;;  %v934_v4 = vld [vmem:[#allocation5 + $0x748] sm:$0xff] }
  0x81   :  { %4015 = vmatpush1.bf16.msra.mxu1 %v6728_v48  ;;  %3953 = vmatprep.subr.bf16.mxu0 %v6730_v50  ;;  %v6748_v48 = vpack.c.bf16 %v917_v35, %v909_v33  ;;  %8466 = vst [vmem:[#allocation64_spill] sm:$0xff] %v6752_v0  ;;  %v6754_v55 = vpack.c.bf16 %v934_v4, %v926_v13  ;;  %8468 = vst [vmem:[#allocation66_spill] sm:$0xff] %v6757_v15  ;;  %v942_v50 = vld [vmem:[#allocation5 + $0x788] sm:$0xff]  ;;  %v944_v33 = vld [vmem:[#allocation5 + $0x798] sm:$0xff] }
  0x82   :  { %4017 = vmatprep.subr.bf16.mxu1 %v6733_v63  ;;  %v935_v63 = vld [vmem:[#allocation5 + $0x750] sm:$0xff]  ;;  %v952_v35 = vld [vmem:[#allocation5 + $0x7d8] sm:$0xff]  ;;  %v941_v4 = vld [vmem:[#allocation5 + $0x780] sm:$0xff] }
  0x83   :  { %8465 = vst [vmem:[#allocation63_spill] sm:$0xff] %v6748_v48  ;;  %8467 = vst [vmem:[#allocation65_spill] sm:$0xff] %v6754_v55  ;;  %v6764_v13 = vpack.c.bf16 %v935_v63, %v927_v6  ;;  %v6769_v5 = vpack.c.bf16 %v952_v35, %v944_v33  ;;  %v705_v63 = vld [vmem:[#allocation5 + $0x20] sm:$0xff]  ;;  %v707_v33 = vld [vmem:[#allocation5 + $0x30] sm:$0xff] }
  0x84   :  { %3955 = vmatpush1.bf16.msra.mxu0 %v6736_v12  ;;  %v950_v12 = vld [vmem:[#allocation5 + $0x7c8] sm:$0xff]  ;;  %v713_v6 = vld [vmem:[#allocation5 + $0x60] sm:$0xff] }
  0x85   :  { %4019 = vmatpush1.bf16.msra.mxu1 %v6740_v21  ;;  %3957 = vmatprep.subr.bf16.mxu0 %v6742_v27  ;;  %v6760_v21 = vpack.c.bf16 %v933_v57, %v925_v1  ;;  %8470 = vst [vmem:[#allocation68_spill] sm:$0xff] %v6764_v13  ;;  %v6766_v26 = vpack.c.bf16 %v950_v12, %v942_v50  ;;  %8472 = vst [vmem:[#allocation70_spill] sm:$0xff] %v6769_v5  ;;  %v706_v27 = vld [vmem:[#allocation5 + $0x28] sm:$0xff]  ;;  %v708_v1 = vld [vmem:[#allocation5 + $0x38] sm:$0xff] }
  0x86   :  { %4021 = vmatprep.subr.bf16.mxu1 %v6745_v7  ;;  %v951_v7 = vld [vmem:[#allocation5 + $0x7d0] sm:$0xff]  ;;  %v716_v57 = vld [vmem:[#allocation5 + $0x78] sm:$0xff] }
  0x87   :  { %8469 = vst [vmem:[#allocation67_spill] sm:$0xff] %v6760_v21  ;;  %8471 = vst [vmem:[#allocation69_spill] sm:$0xff] %v6766_v26  ;;  %v6776_v12 = vpack.c.bf16 %v951_v7, %v943_v46  ;;  %v6781_v35 = vpack.c.bf16 %v716_v57, %v708_v1  ;;  %v721_v7 = vld [vmem:[#allocation5 + $0xa0] sm:$0xff]  ;;  %v723_v1 = vld [vmem:[#allocation5 + $0xb0] sm:$0xff] }
  0x88   :  { %3959 = vmatpush1.bf16.msra.mxu0 %v6748_v48  ;;  %v714_v48 = vld [vmem:[#allocation5 + $0x68] sm:$0xff]  ;;  %v729_v46 = vld [vmem:[#allocation5 + $0xe0] sm:$0xff] }
  0x89   :  { %4023 = vmatpush1.bf16.msra.mxu1 %v6752_v0  ;;  %3961 = vmatprep.subr.bf16.mxu0 %v6754_v55  ;;  %v6772_v0 = vpack.c.bf16 %v949_v36, %v941_v4  ;;  %8474 = vst [vmem:[#allocation72_spill] sm:$0xff] %v6776_v12  ;;  %v6778_v50 = vpack.c.bf16 %v714_v48, %v706_v27  ;;  %8476 = vst [vmem:[#allocation74_spill] sm:$0xff] %v6781_v35  ;;  %v722_v55 = vld [vmem:[#allocation5 + $0xa8] sm:$0xff]  ;;  %v724_v4 = vld [vmem:[#allocation5 + $0xb8] sm:$0xff] }
  0x8a   :  { %4025 = vmatprep.subr.bf16.mxu1 %v6757_v15  ;;  %v715_v15 = vld [vmem:[#allocation5 + $0x70] sm:$0xff]  ;;  %v732_v36 = vld [vmem:[#allocation5 + $0xf8] sm:$0xff] }
  0x8b   :  { %8473 = vst [vmem:[#allocation71_spill] sm:$0xff] %v6772_v0  ;;  %8475 = vst [vmem:[#allocation73_spill] sm:$0xff] %v6778_v50  ;;  %v6788_v48 = vpack.c.bf16 %v715_v15, %v707_v33  ;;  %v6793_v57 = vpack.c.bf16 %v732_v36, %v724_v4  ;;  %v737_v33 = vld [vmem:[#allocation5 + $0x120] sm:$0xff]  ;;  %v739_v36 = vld [vmem:[#allocation5 + $0x130] sm:$0xff] }
  0x8c   :  { %3963 = vmatpush1.bf16.msra.mxu0 %v6760_v21  ;;  %v730_v21 = vld [vmem:[#allocation5 + $0xe8] sm:$0xff]  ;;  %v745_v4 = vld [vmem:[#allocation5 + $0x160] sm:$0xff] }
  0x8d   :  { %4027 = vmatpush1.bf16.msra.mxu1 %v6764_v13  ;;  %3965 = vmatprep.subr.bf16.mxu0 %v6766_v26  ;;  %v6784_v13 = vpack.c.bf16 %v713_v6, %v705_v63  ;;  %8478 = vst [vmem:[#allocation76_spill] sm:$0xff] %v6788_v48  ;;  %v6790_v27 = vpack.c.bf16 %v730_v21, %v722_v55  ;;  %8480 = vst [vmem:[#allocation78_spill] sm:$0xff] %v6793_v57  ;;  %v738_v26 = vld [vmem:[#allocation5 + $0x128] sm:$0xff]  ;;  %v8481_v63 = vmov 0.0   ;;  %v740_v6 = vld [vmem:[#allocation5 + $0x138] sm:$0xff] }
  0x8e   :  { %4029 = vmatprep.subr.bf16.mxu1 %v6769_v5  ;;  %v731_v5 = vld [vmem:[#allocation5 + $0xf0] sm:$0xff]  ;;  %v6798_v21 = vpack.c.bf16 %v729_v46, %v721_v7  ;;  %v756_v7 = vld [vmem:[#allocation5 + $0x1b8] sm:$0xff] }
  0x8f   :  { %8477 = vst [vmem:[#allocation75_spill] sm:$0xff] %v6784_v13  ;;  %8479 = vst [vmem:[#allocation77_spill] sm:$0xff] %v6790_v27  ;;  %v6802_v55 = vpack.c.bf16 %v731_v5, %v723_v1  ;;  %v764_v46 = vld [vmem:[#allocation5 + $0x1f8] sm:$0xff]  ;;  %v761_v1 = vld [vmem:[#allocation5 + $0x1e0] sm:$0xff] }
  0x90   :  { %3967 = vmatpush1.bf16.msra.mxu0 %v6772_v0  ;;  %v746_v0 = vld [vmem:[#allocation5 + $0x168] sm:$0xff]  ;;  %8482 = vst [vmem:[#allocation79_spill] sm:$0xff] %v6798_v21 }
  0x91   :  { %4031 = vmatpush1.bf16.msra.mxu1 %v6776_v12  ;;  %4033 = vmatprep.subr.bf16.mxu0 %v6778_v50  ;;  %v748_v12 = vld [vmem:[#allocation5 + $0x178] sm:$0xff]  ;;  %8483 = vst [vmem:[#allocation80_spill] sm:$0xff] %v6802_v55  ;;  %v6804_v15 = vpack.c.bf16 %v746_v0, %v738_v26  ;;  %v747_v50 = vld [vmem:[#allocation5 + $0x170] sm:$0xff]  ;;  %v6812_v0 = vpack.c.bf16 %v745_v4, %v737_v33 }
  0x92   :  { %4097 = vmatprep.subr.bf16.mxu1 %v6781_v35  ;;  %v6807_v35 = vpack.c.bf16 %v748_v12, %v740_v6  ;;  %v6816_v26 = vpack.c.bf16 %v747_v50, %v739_v36  ;;  %v753_v12 = vld [vmem:[#allocation5 + $0x1a0] sm:$0xff]  ;;  %v755_v6 = vld [vmem:[#allocation5 + $0x1b0] sm:$0xff]  ;;  %v772_v33 = vld [vmem:[#allocation5 + $0x238] sm:$0xff] }
  0x93   :  { %1022 = vmatmul.mubr.f32.vlgmr.msra.gmra.mrb[0].mxu0 %v8481_v63  ;;  %8484 = vst [vmem:[#allocation81_spill] sm:$0xff] %v6804_v15  ;;  %8486 = vst [vmem:[#allocation83_spill] sm:$0xff] %v6812_v0  ;;  %v780_v4 = vld [vmem:[#allocation5 + $0x278] sm:$0xff]  ;;  %v769_v50 = vld [vmem:[#allocation5 + $0x220] sm:$0xff] }
  0x94   :  { %1093 = vmatmul.mubr.f32.vlgmr.msra.gmra.mrb[0].mxu1 %v8481_v63  ;;  %4035 = vmatpush1.bf16.msra.mxu0 %v6784_v13  ;;  %8485 = vst [vmem:[#allocation82_spill] sm:$0xff] %v6807_v35  ;;  %v762_v13 = vld [vmem:[#allocation5 + $0x1e8] sm:$0xff]  ;;  %8487 = vst [vmem:[#allocation84_spill] sm:$0xff] %v6816_v26  ;;  %v777_v36 = vld [vmem:[#allocation5 + $0x260] sm:$0xff] }
  0x95   :  { %4099 = vmatpush1.bf16.msra.mxu1 %v6788_v48  ;;  %4037 = vmatprep.subr.bf16.mxu0 %v6790_v27  ;;  %v6818_v5 = vpack.c.bf16 %v762_v13, %v754_v11  ;;  %v763_v27 = vld [vmem:[#allocation5 + $0x1f0] sm:$0xff]  ;;  %v770_v48 = vld [vmem:[#allocation5 + $0x228] sm:$0xff] }
  0x96   :  { %4101 = vmatprep.subr.bf16.mxu1 %v6793_v57  ;;  %1163 = vmatprep.mubr.f32.mxu0 %v8481_v63  ;;  %v6821_v57 = vpack.c.bf16 %v764_v46, %v756_v7  ;;  %v6828_v11 = vpack.c.bf16 %v763_v27, %v755_v6  ;;  %v771_v7 = vld [vmem:[#allocation5 + $0x230] sm:$0xff]  ;;  %v6833_v46 = vpack.c.bf16 %v780_v4, %v772_v33  ;;  %v793_v6 = vld [vmem:[#allocation5 + $0x2e0] sm:$0xff] }
  0x97   :  { %1234 = vmatprep.mubr.f32.mxu1 %v8481_v63  ;;  %8488 = vst [vmem:[#allocation85_spill] sm:$0xff] %v6818_v5  ;;  %v787_v33 = vld [vmem:[#allocation5 + $0x2b0] sm:$0xff] }
  0x98   :  { %4039 = vmatpush1.bf16.msra.mxu0 %v6798_v21  ;;  %8489 = vst [vmem:[#allocation86_spill] sm:$0xff] %v6821_v57  ;;  %v778_v21 = vld [vmem:[#allocation5 + $0x268] sm:$0xff]  ;;  %8491 = vst [vmem:[#allocation88_spill] sm:$0xff] %v6828_v11 }
  0x99   :  { %4103 = vmatpush1.bf16.msra.mxu1 %v6802_v55  ;;  %4041 = vmatprep.subr.bf16.mxu0 %v6804_v15  ;;  %v6824_v55 = vpack.c.bf16 %v761_v1, %v753_v12  ;;  %v6830_v13 = vpack.c.bf16 %v778_v21, %v770_v48  ;;  %8493 = vst [vmem:[#allocation90_spill] sm:$0xff] %v6833_v46  ;;  %v786_v15 = vld [vmem:[#allocation5 + $0x2a8] sm:$0xff]  ;;  %v788_v12 = vld [vmem:[#allocation5 + $0x2b8] sm:$0xff]  ;;  %v785_v21 = vld [vmem:[#allocation5 + $0x2a0] sm:$0xff] }
  0x9a   :  { %4105 = vmatprep.subr.bf16.mxu1 %v6807_v35  ;;  %v779_v35 = vld [vmem:[#allocation5 + $0x270] sm:$0xff]  ;;  %v796_v1 = vld [vmem:[#allocation5 + $0x2f8] sm:$0xff] }
  0x9b   :  { %8490 = vst [vmem:[#allocation87_spill] sm:$0xff] %v6824_v55  ;;  %8492 = vst [vmem:[#allocation89_spill] sm:$0xff] %v6830_v13  ;;  %v6840_v48 = vpack.c.bf16 %v779_v35, %v771_v7  ;;  %v6845_v4 = vpack.c.bf16 %v796_v1, %v788_v12  ;;  %v809_v7 = vld [vmem:[#allocation5 + $0x360] sm:$0xff]  ;;  %v803_v12 = vld [vmem:[#allocation5 + $0x330] sm:$0xff] }
  0x9c   :  { %4043 = vmatpush1.bf16.msra.mxu0 %v6812_v0  ;;  %v794_v0 = vld [vmem:[#allocation5 + $0x2e8] sm:$0xff] }
  0x9d   :  { %4107 = vmatpush1.bf16.msra.mxu1 %v6816_v26  ;;  %4045 = vmatprep.subr.bf16.mxu0 %v6818_v5  ;;  %v6836_v26 = vpack.c.bf16 %v777_v36, %v769_v50  ;;  %8495 = vst [vmem:[#allocation92_spill] sm:$0xff] %v6840_v48  ;;  %v6842_v27 = vpack.c.bf16 %v794_v0, %v786_v15  ;;  %8497 = vst [vmem:[#allocation94_spill] sm:$0xff] %v6845_v4  ;;  %v802_v5 = vld [vmem:[#allocation5 + $0x328] sm:$0xff]  ;;  %v804_v50 = vld [vmem:[#allocation5 + $0x338] sm:$0xff] }
  0x9e   :  { %4109 = vmatprep.subr.bf16.mxu1 %v6821_v57  ;;  %v795_v57 = vld [vmem:[#allocation5 + $0x2f0] sm:$0xff]  ;;  %v812_v36 = vld [vmem:[#allocation5 + $0x378] sm:$0xff]  ;;  %v801_v0 = vld [vmem:[#allocation5 + $0x320] sm:$0xff] }
  0x9f   :  { %8494 = vst [vmem:[#allocation91_spill] sm:$0xff] %v6836_v26  ;;  %8496 = vst [vmem:[#allocation93_spill] sm:$0xff] %v6842_v27  ;;  %v6852_v35 = vpack.c.bf16 %v795_v57, %v787_v33  ;;  %v6857_v1 = vpack.c.bf16 %v812_v36, %v804_v50  ;;  %v825_v33 = vld [vmem:[#allocation5 + $0x3e0] sm:$0xff]  ;;  %v819_v50 = vld [vmem:[#allocation5 + $0x3b0] sm:$0xff] }
  0xa0   :  { %4047 = vmatpush1.bf16.msra.mxu0 %v6824_v55  ;;  %v810_v55 = vld [vmem:[#allocation5 + $0x368] sm:$0xff] }
  0xa1   :  { %4111 = vmatpush1.bf16.msra.mxu1 %v6828_v11  ;;  %4049 = vmatprep.subr.bf16.mxu0 %v6830_v13  ;;  %v6848_v11 = vpack.c.bf16 %v793_v6, %v785_v21  ;;  %8499 = vst [vmem:[#allocation96_spill] sm:$0xff] %v6852_v35  ;;  %v6854_v15 = vpack.c.bf16 %v810_v55, %v802_v5  ;;  %8501 = vst [vmem:[#allocation98_spill] sm:$0xff] %v6857_v1  ;;  %v818_v13 = vld [vmem:[#allocation5 + $0x3a8] sm:$0xff]  ;;  %v820_v21 = vld [vmem:[#allocation5 + $0x3b8] sm:$0xff] }
  0xa2   :  { %4113 = vmatprep.subr.bf16.mxu1 %v6833_v46  ;;  %v811_v46 = vld [vmem:[#allocation5 + $0x370] sm:$0xff]  ;;  %v828_v6 = vld [vmem:[#allocation5 + $0x3f8] sm:$0xff]  ;;  %v817_v5 = vld [vmem:[#allocation5 + $0x3a0] sm:$0xff] }
  0xa3   :  { %8498 = vst [vmem:[#allocation95_spill] sm:$0xff] %v6848_v11  ;;  %8500 = vst [vmem:[#allocation97_spill] sm:$0xff] %v6854_v15  ;;  %v6864_v57 = vpack.c.bf16 %v811_v46, %v803_v12  ;;  %v6869_v36 = vpack.c.bf16 %v828_v6, %v820_v21  ;;  %v833_v46 = vld [vmem:[#allocation5 + $0x420] sm:$0xff]  ;;  %v835_v21 = vld [vmem:[#allocation5 + $0x430] sm:$0xff] }
  0xa4   :  { %4051 = vmatpush1.bf16.msra.mxu0 %v6836_v26  ;;  %v826_v26 = vld [vmem:[#allocation5 + $0x3e8] sm:$0xff]  ;;  %v841_v12 = vld [vmem:[#allocation5 + $0x460] sm:$0xff] }
  0xa5   :  { %4115 = vmatpush1.bf16.msra.mxu1 %v6840_v48  ;;  %4053 = vmatprep.subr.bf16.mxu0 %v6842_v27  ;;  %v6860_v48 = vpack.c.bf16 %v809_v7, %v801_v0  ;;  %8503 = vst [vmem:[#allocation100_spill] sm:$0xff] %v6864_v57  ;;  %v6866_v55 = vpack.c.bf16 %v826_v26, %v818_v13  ;;  %8505 = vst [vmem:[#allocation102_spill] sm:$0xff] %v6869_v36  ;;  %v834_v27 = vld [vmem:[#allocation5 + $0x428] sm:$0xff]  ;;  %v836_v0 = vld [vmem:[#allocation5 + $0x438] sm:$0xff] }
  0xa6   :  { %4117 = vmatprep.subr.bf16.mxu1 %v6845_v4  ;;  %v827_v4 = vld [vmem:[#allocation5 + $0x3f0] sm:$0xff]  ;;  %v844_v7 = vld [vmem:[#allocation5 + $0x478] sm:$0xff] }
  0xa7   :  { %8502 = vst [vmem:[#allocation99_spill] sm:$0xff] %v6860_v48  ;;  %8504 = vst [vmem:[#allocation101_spill] sm:$0xff] %v6866_v55  ;;  %v6876_v26 = vpack.c.bf16 %v827_v4, %v819_v50  ;;  %v6881_v6 = vpack.c.bf16 %v844_v7, %v836_v0  ;;  %v849_v4 = vld [vmem:[#allocation5 + $0x4a0] sm:$0xff]  ;;  %v851_v0 = vld [vmem:[#allocation5 + $0x4b0] sm:$0xff] }
  0xa8   :  { %4055 = vmatpush1.bf16.msra.mxu0 %v6848_v11  ;;  %v842_v11 = vld [vmem:[#allocation5 + $0x468] sm:$0xff]  ;;  %v857_v50 = vld [vmem:[#allocation5 + $0x4e0] sm:$0xff] }
  0xa9   :  { %4119 = vmatpush1.bf16.msra.mxu1 %v6852_v35  ;;  %4057 = vmatprep.subr.bf16.mxu0 %v6854_v15  ;;  %v6872_v35 = vpack.c.bf16 %v825_v33, %v817_v5  ;;  %8507 = vst [vmem:[#allocation104_spill] sm:$0xff] %v6876_v26  ;;  %v6878_v13 = vpack.c.bf16 %v842_v11, %v834_v27  ;;  %8509 = vst [vmem:[#allocation106_spill] sm:$0xff] %v6881_v6  ;;  %v850_v15 = vld [vmem:[#allocation5 + $0x4a8] sm:$0xff]  ;;  %v852_v5 = vld [vmem:[#allocation5 + $0x4b8] sm:$0xff] }
  0xaa   :  { %4121 = vmatprep.subr.bf16.mxu1 %v6857_v1  ;;  %v843_v1 = vld [vmem:[#allocation5 + $0x470] sm:$0xff]  ;;  %v860_v33 = vld [vmem:[#allocation5 + $0x4f8] sm:$0xff] }
  0xab   :  { %8506 = vst [vmem:[#allocation103_spill] sm:$0xff] %v6872_v35  ;;  %8508 = vst [vmem:[#allocation105_spill] sm:$0xff] %v6878_v13  ;;  %v6888_v11 = vpack.c.bf16 %v843_v1, %v835_v21  ;;  %v6893_v7 = vpack.c.bf16 %v860_v33, %v852_v5  ;;  %v865_v1 = vld [vmem:[#allocation5 + $0x520] sm:$0xff]  ;;  %v867_v5 = vld [vmem:[#allocation5 + $0x530] sm:$0xff] }
  0xac   :  { %4059 = vmatpush1.bf16.msra.mxu0 %v6860_v48  ;;  %v858_v48 = vld [vmem:[#allocation5 + $0x4e8] sm:$0xff]  ;;  %v873_v21 = vld [vmem:[#allocation5 + $0x560] sm:$0xff] }
  0xad   :  { %4123 = vmatpush1.bf16.msra.mxu1 %v6864_v57  ;;  %4061 = vmatprep.subr.bf16.mxu0 %v6866_v55  ;;  %v6884_v57 = vpack.c.bf16 %v841_v12, %v833_v46  ;;  %8511 = vst [vmem:[#allocation108_spill] sm:$0xff] %v6888_v11  ;;  %v6890_v27 = vpack.c.bf16 %v858_v48, %v850_v15  ;;  %8513 = vst [vmem:[#allocation110_spill] sm:$0xff] %v6893_v7  ;;  %v866_v55 = vld [vmem:[#allocation5 + $0x528] sm:$0xff]  ;;  %v868_v46 = vld [vmem:[#allocation5 + $0x538] sm:$0xff] }
  0xae   :  { %4125 = vmatprep.subr.bf16.mxu1 %v6869_v36  ;;  %v859_v36 = vld [vmem:[#allocation5 + $0x4f0] sm:$0xff]  ;;  %v876_v12 = vld [vmem:[#allocation5 + $0x578] sm:$0xff] }
  0xaf   :  { %8510 = vst [vmem:[#allocation107_spill] sm:$0xff] %v6884_v57  ;;  %8512 = vst [vmem:[#allocation109_spill] sm:$0xff] %v6890_v27  ;;  %v6900_v48 = vpack.c.bf16 %v859_v36, %v851_v0  ;;  %v6905_v33 = vpack.c.bf16 %v876_v12, %v868_v46  ;;  %v881_v36 = vld [vmem:[#allocation5 + $0x5a0] sm:$0xff]  ;;  %v883_v46 = vld [vmem:[#allocation5 + $0x5b0] sm:$0xff] }
  0xb0   :  { %4063 = vmatpush1.bf16.msra.mxu0 %v6872_v35  ;;  %v874_v35 = vld [vmem:[#allocation5 + $0x568] sm:$0xff]  ;;  %v889_v0 = vld [vmem:[#allocation5 + $0x5e0] sm:$0xff] }
  0xb1   :  { %4127 = vmatpush1.bf16.msra.mxu1 %v6876_v26  ;;  %4065 = vmatprep.subr.bf16.mxu0 %v6878_v13  ;;  %v6896_v26 = vpack.c.bf16 %v857_v50, %v849_v4  ;;  %8515 = vst [vmem:[#allocation112_spill] sm:$0xff] %v6900_v48  ;;  %v6902_v15 = vpack.c.bf16 %v874_v35, %v866_v55  ;;  %8517 = vst [vmem:[#allocation114_spill] sm:$0xff] %v6905_v33  ;;  %v882_v13 = vld [vmem:[#allocation5 + $0x5a8] sm:$0xff]  ;;  %v884_v4 = vld [vmem:[#allocation5 + $0x5b8] sm:$0xff] }
  0xb2   :  { %4129 = vmatprep.subr.bf16.mxu1 %v6881_v6  ;;  %v875_v6 = vld [vmem:[#allocation5 + $0x570] sm:$0xff]  ;;  %v892_v50 = vld [vmem:[#allocation5 + $0x5f8] sm:$0xff] }
  0xb3   :  { %8514 = vst [vmem:[#allocation111_spill] sm:$0xff] %v6896_v26  ;;  %8516 = vst [vmem:[#allocation113_spill] sm:$0xff] %v6902_v15  ;;  %v6912_v35 = vpack.c.bf16 %v875_v6, %v867_v5  ;;  %v6917_v12 = vpack.c.bf16 %v892_v50, %v884_v4  ;;  %v897_v6 = vld [vmem:[#allocation5 + $0x620] sm:$0xff]  ;;  %v899_v4 = vld [vmem:[#allocation5 + $0x630] sm:$0xff] }
  0xb4   :  { %4067 = vmatpush1.bf16.msra.mxu0 %v6884_v57  ;;  %v890_v57 = vld [vmem:[#allocation5 + $0x5e8] sm:$0xff]  ;;  %v905_v5 = vld [vmem:[#allocation5 + $0x660] sm:$0xff] }
  0xb5   :  { %4131 = vmatpush1.bf16.msra.mxu1 %v6888_v11  ;;  %4069 = vmatprep.subr.bf16.mxu0 %v6890_v27  ;;  %v6908_v11 = vpack.c.bf16 %v873_v21, %v865_v1  ;;  %8519 = vst [vmem:[#allocation116_spill] sm:$0xff] %v6912_v35  ;;  %v6914_v55 = vpack.c.bf16 %v890_v57, %v882_v13  ;;  %8521 = vst [vmem:[#allocation118_spill] sm:$0xff] %v6917_v12  ;;  %v898_v27 = vld [vmem:[#allocation5 + $0x628] sm:$0xff]  ;;  %v900_v1 = vld [vmem:[#allocation5 + $0x638] sm:$0xff] }
  0xb6   :  { %4133 = vmatprep.subr.bf16.mxu1 %v6893_v7  ;;  %v891_v7 = vld [vmem:[#allocation5 + $0x5f0] sm:$0xff]  ;;  %v908_v21 = vld [vmem:[#allocation5 + $0x678] sm:$0xff] }
  0xb7   :  { %8518 = vst [vmem:[#allocation115_spill] sm:$0xff] %v6908_v11  ;;  %8520 = vst [vmem:[#allocation117_spill] sm:$0xff] %v6914_v55  ;;  %v6924_v57 = vpack.c.bf16 %v891_v7, %v883_v46  ;;  %v6929_v50 = vpack.c.bf16 %v908_v21, %v900_v1  ;;  %v913_v7 = vld [vmem:[#allocation5 + $0x6a0] sm:$0xff]  ;;  %v915_v1 = vld [vmem:[#allocation5 + $0x6b0] sm:$0xff] }
  0xb8   :  { %4071 = vmatpush1.bf16.msra.mxu0 %v6896_v26  ;;  %v906_v26 = vld [vmem:[#allocation5 + $0x668] sm:$0xff]  ;;  %v921_v46 = vld [vmem:[#allocation5 + $0x6e0] sm:$0xff] }
  0xb9   :  { %4135 = vmatpush1.bf16.msra.mxu1 %v6900_v48  ;;  %4073 = vmatprep.subr.bf16.mxu0 %v6902_v15  ;;  %v6920_v48 = vpack.c.bf16 %v889_v0, %v881_v36  ;;  %8523 = vst [vmem:[#allocation120_spill] sm:$0xff] %v6924_v57  ;;  %v6926_v13 = vpack.c.bf16 %v906_v26, %v898_v27  ;;  %8525 = vst [vmem:[#allocation122_spill] sm:$0xff] %v6929_v50  ;;  %v914_v15 = vld [vmem:[#allocation5 + $0x6a8] sm:$0xff]  ;;  %v916_v36 = vld [vmem:[#allocation5 + $0x6b8] sm:$0xff] }
  0xba   :  { %4137 = vmatprep.subr.bf16.mxu1 %v6905_v33  ;;  %v907_v33 = vld [vmem:[#allocation5 + $0x670] sm:$0xff]  ;;  %v924_v0 = vld [vmem:[#allocation5 + $0x6f8] sm:$0xff] }
  0xbb   :  { %8522 = vst [vmem:[#allocation119_spill] sm:$0xff] %v6920_v48  ;;  %8524 = vst [vmem:[#allocation121_spill] sm:$0xff] %v6926_v13  ;;  %v6936_v26 = vpack.c.bf16 %v907_v33, %v899_v4  ;;  %v6941_v21 = vpack.c.bf16 %v924_v0, %v916_v36  ;;  %v929_v33 = vld [vmem:[#allocation5 + $0x720] sm:$0xff]  ;;  %v931_v36 = vld [vmem:[#allocation5 + $0x730] sm:$0xff] }
  0xbc   :  { %4075 = vmatpush1.bf16.msra.mxu0 %v6908_v11  ;;  %v922_v11 = vld [vmem:[#allocation5 + $0x6e8] sm:$0xff]  ;;  %v937_v4 = vld [vmem:[#allocation5 + $0x760] sm:$0xff] }
  0xbd   :  { %4139 = vmatpush1.bf16.msra.mxu1 %v6912_v35  ;;  %4077 = vmatprep.subr.bf16.mxu0 %v6914_v55  ;;  %v6932_v35 = vpack.c.bf16 %v905_v5, %v897_v6  ;;  %8527 = vst [vmem:[#allocation124_spill] sm:$0xff] %v6936_v26  ;;  %v6938_v27 = vpack.c.bf16 %v922_v11, %v914_v15  ;;  %8529 = vst [vmem:[#allocation126_spill] sm:$0xff] %v6941_v21  ;;  %v930_v55 = vld [vmem:[#allocation5 + $0x728] sm:$0xff]  ;;  %v932_v6 = vld [vmem:[#allocation5 + $0x738] sm:$0xff] }
  0xbe   :  { %4141 = vmatprep.subr.bf16.mxu1 %v6917_v12  ;;  %v923_v12 = vld [vmem:[#allocation5 + $0x6f0] sm:$0xff]  ;;  %v940_v5 = vld [vmem:[#allocation5 + $0x778] sm:$0xff] }
  0xbf   :  { %8526 = vst [vmem:[#allocation123_spill] sm:$0xff] %v6932_v35  ;;  %8528 = vst [vmem:[#allocation125_spill] sm:$0xff] %v6938_v27  ;;  %v6948_v11 = vpack.c.bf16 %v923_v12, %v915_v1  ;;  %v6953_v0 = vpack.c.bf16 %v940_v5, %v932_v6  ;;  %v945_v12 = vld [vmem:[#allocation5 + $0x7a0] sm:$0xff]  ;;  %v947_v5 = vld [vmem:[#allocation5 + $0x7b0] sm:$0xff] }
  0xc0   :  { %4079 = vmatpush1.bf16.msra.mxu0 %v6920_v48  ;;  %v938_v48 = vld [vmem:[#allocation5 + $0x768] sm:$0xff]  ;;  %v953_v1 = vld [vmem:[#allocation5 + $0x7e0] sm:$0xff] }
  0xc1   :  { %4143 = vmatpush1.bf16.msra.mxu1 %v6924_v57  ;;  %4081 = vmatprep.subr.bf16.mxu0 %v6926_v13  ;;  %v6944_v57 = vpack.c.bf16 %v921_v46, %v913_v7  ;;  %8531 = vst [vmem:[#allocation128_spill] sm:$0xff] %v6948_v11  ;;  %v6950_v15 = vpack.c.bf16 %v938_v48, %v930_v55  ;;  %8533 = vst [vmem:[#allocation130_spill] sm:$0xff] %v6953_v0  ;;  %v946_v13 = vld [vmem:[#allocation5 + $0x7a8] sm:$0xff]  ;;  %v948_v7 = vld [vmem:[#allocation5 + $0x7b8] sm:$0xff] }
  0xc2   :  { %4145 = vmatprep.subr.bf16.mxu1 %v6929_v50  ;;  %v939_v50 = vld [vmem:[#allocation5 + $0x770] sm:$0xff]  ;;  %v956_v46 = vld [vmem:[#allocation5 + $0x7f8] sm:$0xff] }
  0xc3   :  { %8530 = vst [vmem:[#allocation127_spill] sm:$0xff] %v6944_v57  ;;  %8532 = vst [vmem:[#allocation129_spill] sm:$0xff] %v6950_v15  ;;  %v6960_v48 = vpack.c.bf16 %v939_v50, %v931_v36  ;;  %v6965_v6 = vpack.c.bf16 %v956_v46, %v948_v7  ;;  %v8545_v36 = vld [vmem:[#allocation56_spill] sm:$0xff]  ;;  %v8546_v7 = vld [vmem:[#allocation57_spill] sm:$0xff] }
  0xc4   :  { %4083 = vmatpush1.bf16.msra.mxu0 %v6932_v35  ;;  %v954_v35 = vld [vmem:[#allocation5 + $0x7e8] sm:$0xff] }
  0xc5   :  { %4147 = vmatpush1.bf16.msra.mxu1 %v6936_v26  ;;  %4085 = vmatprep.subr.bf16.mxu0 %v6938_v27  ;;  %v6956_v26 = vpack.c.bf16 %v937_v4, %v929_v33  ;;  %8535 = vst [vmem:[#allocation132_spill] sm:$0xff] %v6960_v48  ;;  %v6962_v55 = vpack.c.bf16 %v954_v35, %v946_v13  ;;  %8537 = vst [vmem:[#allocation134_spill] sm:$0xff] %v6965_v6  ;;  %v8541_v35 = vld [vmem:[#allocation52_spill] sm:$0xff]  ;;  %v8542_v13 = vld [vmem:[#allocation53_spill] sm:$0xff] }
  0xc6   :  { %4149 = vmatprep.subr.bf16.mxu1 %v6941_v21  ;;  %v955_v21 = vld [vmem:[#allocation5 + $0x7f0] sm:$0xff]  ;;  %v6968_v33 = vpack.c.bf16 %v953_v1, %v945_v12  ;;  %v8547_v46 = vld [vmem:[#allocation58_spill] sm:$0xff]  ;;  %v8549_v1 = vld [vmem:[#allocation60_spill] sm:$0xff] }
  0xc7   :  { %8534 = vst [vmem:[#allocation131_spill] sm:$0xff] %v6956_v26  ;;  %8536 = vst [vmem:[#allocation133_spill] sm:$0xff] %v6962_v55  ;;  %v6972_v50 = vpack.c.bf16 %v955_v21, %v947_v5  ;;  %v8543_v21 = vld [vmem:[#allocation54_spill] sm:$0xff]  ;;  %v8544_v4 = vld [vmem:[#allocation55_spill] sm:$0xff] }
  0xc8   :  { %4087 = vmatpush1.bf16.msra.mxu0 %v6944_v57  ;;  %8538 = vst [vmem:[#allocation135_spill] sm:$0xff] %v6968_v33  ;;  %v8548_v12 = vld [vmem:[#allocation59_spill] sm:$0xff]  ;;  %v8550_v5 = vld [vmem:[#allocation61_spill] sm:$0xff] }
  0xc9   :  { %4151 = vmatpush1.bf16.msra.mxu1 %v6948_v11  ;;  %4089 = vmatprep.subr.bf16.mxu0 %v6950_v15  ;;  %8539 = vst [vmem:[#allocation136_spill] sm:$0xff] %v6972_v50 }
  0xca   :  { %4153 = vmatprep.subr.bf16.mxu1 %v6953_v0 }
  0xcc   :  { %4091 = vmatpush1.bf16.msra.mxu0 %v6956_v26 }
  0xcd   :  { %4155 = vmatpush1.bf16.msra.mxu1 %v6960_v48  ;;  %4093 = vmatprep.subr.bf16.mxu0 %v6962_v55 }
  0xce   :  { %4157 = vmatprep.subr.bf16.mxu1 %v6965_v6 }
  0xd0   :  { %4095 = vmatpush1.bf16.msra.mxu0 %v6968_v33 }
  0xd1   :  { %4159 = vmatpush1.bf16.msra.mxu1 %v6972_v50  ;;  %4161 = vmatprep.subr.bf16.mxu0 %v6477_v60 }
  0xd2   :  { %4225 = vmatprep.subr.bf16.mxu1 %v6495_v3 }
  0xd3   :  { %1164 = vmatmul.mubr.f32.vlgmr.msra.gmra.mrb[30].mxu0 %v8481_v63 }
  0xd4   :  { %1235 = vmatmul.mubr.f32.vlgmr.msra.gmra.mrb[30].mxu1 %v8481_v63  ;;  %4163 = vmatpush1.bf16.msra.mxu0 %v6546_v16  ;;  %v8540_v63 = vld [vmem:[#allocation51_spill] sm:$0xff] }
  0xd5   :  { %4227 = vmatpush1.bf16.msra.mxu1 %v6549_v17  ;;  %4165 = vmatprep.subr.bf16.mxu0 %v6551_v18 }
  0xd6   :  { %4229 = vmatprep.subr.bf16.mxu1 %v6553_v22 }
  0xd8   :  { %4167 = vmatpush1.bf16.msra.mxu0 %v6560_v28 }
  0xd9   :  { %4231 = vmatpush1.bf16.msra.mxu1 %v6564_v29  ;;  %4169 = vmatprep.subr.bf16.mxu0 %v6566_v30 }
  0xda   :  { %4233 = vmatprep.subr.bf16.mxu1 %v6569_v34 }
  0xdc   :  { %4171 = vmatpush1.bf16.msra.mxu0 %v6576_v40 }
  0xdd   :  { %4235 = vmatpush1.bf16.msra.mxu1 %v6582_v41  ;;  %4173 = vmatprep.subr.bf16.mxu0 %v6584_v42 }
  0xde   :  { %4237 = vmatprep.subr.bf16.mxu1 %v6587_v47 }
  0xe0   :  { %4175 = vmatpush1.bf16.msra.mxu0 %v6594_v52 }
  0xe1   :  { %4239 = vmatpush1.bf16.msra.mxu1 %v6600_v53  ;;  %4177 = vmatprep.subr.bf16.mxu0 %v6602_v54 }
  0xe2   :  { %4241 = vmatprep.subr.bf16.mxu1 %v6605_v59 }
  0xe4   :  { %4179 = vmatpush1.bf16.msra.mxu0 %v6612_v8 }
  0xe5   :  { %4243 = vmatpush1.bf16.msra.mxu1 %v6618_v9  ;;  %4181 = vmatprep.subr.bf16.mxu0 %v6620_v10 }
  0xe6   :  { %4245 = vmatprep.subr.bf16.mxu1 %v6623_v14 }
  0xe8   :  { %4183 = vmatpush1.bf16.msra.mxu0 %v6630_v23 }
  0xe9   :  { %4247 = vmatpush1.bf16.msra.mxu1 %v6636_v24  ;;  %4185 = vmatprep.subr.bf16.mxu0 %v6638_v25 }
  0xea   :  { %4249 = vmatprep.subr.bf16.mxu1 %v6641_v32 }
  0xec   :  { %4187 = vmatpush1.bf16.msra.mxu0 %v6648_v38 }
  0xed   :  { %4251 = vmatpush1.bf16.msra.mxu1 %v6654_v39  ;;  %4189 = vmatprep.subr.bf16.mxu0 %v6656_v43 }
  0xee   :  { %4253 = vmatprep.subr.bf16.mxu1 %v6659_v49 }
  0xf0   :  { %4191 = vmatpush1.bf16.msra.mxu0 %v6666_v56 }
  0xf1   :  { %4255 = vmatpush1.bf16.msra.mxu1 %v6672_v58  ;;  %4193 = vmatprep.subr.bf16.mxu0 %v6674_v62 }
  0xf2   :  { %4257 = vmatprep.subr.bf16.mxu1 %v6677_v2 }
  0xf4   :  { %4195 = vmatpush1.bf16.msra.mxu0 %v6684_v19 }
  0xf5   :  { %4259 = vmatpush1.bf16.msra.mxu1 %v6690_v20  ;;  %4197 = vmatprep.subr.bf16.mxu0 %v6692_v61 }
  0xf6   :  { %4261 = vmatprep.subr.bf16.mxu1 %v6695_v31 }
  0xf8   :  { %4199 = vmatpush1.bf16.msra.mxu0 %v6700_v37 }
  0xf9   :  { %4263 = vmatpush1.bf16.msra.mxu1 %v6704_v44  ;;  %4201 = vmatprep.subr.bf16.mxu0 %v6706_v45 }
  0xfa   :  { %4265 = vmatprep.subr.bf16.mxu1 %v6709_v51 }
  0xfc   :  { %4203 = vmatpush1.bf16.msra.mxu0 %v8540_v63  ;;  %v8551_v63 = vld [vmem:[#allocation62_spill] sm:$0xff] }
  0xfd   :  { %4267 = vmatpush1.bf16.msra.mxu1 %v8541_v35  ;;  %4205 = vmatprep.subr.bf16.mxu0 %v8542_v13  ;;  %v8552_v35 = vld [vmem:[#allocation63_spill] sm:$0xff]  ;;  %v8553_v13 = vld [vmem:[#allocation64_spill] sm:$0xff] }
  0xfe   :  { %4269 = vmatprep.subr.bf16.mxu1 %v8543_v21  ;;  %v8554_v21 = vld [vmem:[#allocation65_spill] sm:$0xff] }
 0x100   :  { %4207 = vmatpush1.bf16.msra.mxu0 %v8544_v4  ;;  %v8555_v4 = vld [vmem:[#allocation66_spill] sm:$0xff] }
 0x101   :  { %4271 = vmatpush1.bf16.msra.mxu1 %v8545_v36  ;;  %4209 = vmatprep.subr.bf16.mxu0 %v8546_v7  ;;  %v8556_v36 = vld [vmem:[#allocation67_spill] sm:$0xff]  ;;  %v8557_v7 = vld [vmem:[#allocation68_spill] sm:$0xff] }
 0x102   :  { %4273 = vmatprep.subr.bf16.mxu1 %v8547_v46  ;;  %v8558_v46 = vld [vmem:[#allocation69_spill] sm:$0xff] }
 0x104   :  { %4211 = vmatpush1.bf16.msra.mxu0 %v8548_v12  ;;  %v8559_v12 = vld [vmem:[#allocation70_spill] sm:$0xff] }
 0x105   :  { %4275 = vmatpush1.bf16.msra.mxu1 %v8549_v1  ;;  %4213 = vmatprep.subr.bf16.mxu0 %v8550_v5  ;;  %v8560_v1 = vld [vmem:[#allocation71_spill] sm:$0xff]  ;;  %v8561_v5 = vld [vmem:[#allocation72_spill] sm:$0xff] }
 0x106   :  { %4277 = vmatprep.subr.bf16.mxu1 %v8551_v63  ;;  %v8562_v63 = vld [vmem:[#allocation73_spill] sm:$0xff] }
 0x108   :  { %4215 = vmatpush1.bf16.msra.mxu0 %v8552_v35  ;;  %v8563_v35 = vld [vmem:[#allocation74_spill] sm:$0xff] }
 0x109   :  { %4279 = vmatpush1.bf16.msra.mxu1 %v8553_v13  ;;  %4217 = vmatprep.subr.bf16.mxu0 %v8554_v21  ;;  %v95_v13 = vlaneseq }
 0x10a   :  { %4281 = vmatprep.subr.bf16.mxu1 %v8555_v4 }
 0x10b   :  { %v7045_v21 = vshrl.u32 %v95_v13, 7 }
 0x10c   :  { %4219 = vmatpush1.bf16.msra.mxu0 %v8556_v36 }
 0x10d   :  { %4283 = vmatpush1.bf16.msra.mxu1 %v8557_v7  ;;  %4221 = vmatprep.subr.bf16.mxu0 %v8558_v46  ;;  %v97_v4 = vsub.s32 0, %v7045_v21  ;;  %v93_v7 = vld [vmem:[%s8123_s2] sm:$0xff]  ;;  %v101_v46 = vsub.s32 1, %v7045_v21 }
 0x10e   :  { %4285 = vmatprep.subr.bf16.mxu1 %v8559_v12 }
 0x10f   :  { %v7052_v12 = vrot.slane %v93_v7, %v97_v4  ;;  %v105_v4 = vsub.s32 2, %v7045_v21 }
 0x110   :  { %4223 = vmatpush1.bf16.msra.mxu0 %v8560_v1  ;;  %v7054_v1 = vrot.slane %v93_v7, %v101_v46 }
 0x111   :  { %4287 = vmatpush1.bf16.msra.mxu1 %v8561_v5  ;;  %4289 = vmatprep.subr.bf16.mxu0 %v8562_v63  ;;  %8564 = vst [vmem:[#allocation137_spill] sm:$0xff] %v7052_v12  ;;  %v109_v63 = vsub.s32 3, %v7045_v21  ;;  %v7063_v61 = vrot.slane %v93_v7, %v105_v4 }
 0x112   :  { %4353 = vmatprep.subr.bf16.mxu1 %v8563_v35  ;;  %8565 = vst [vmem:[#allocation138_spill] sm:$0xff] %v7054_v1 }
 0x113   :  { %v7059_v31 = vrot.slane %v93_v7, %v109_v63  ;;  %8567 = vst [vmem:[#allocation140_spill] sm:$0xff] %v7063_v61 }
 0x115   :  { %8566 = vst [vmem:[#allocation139_spill] sm:$0xff] %v7059_v31 }
 0x166   :  { %v1023_v5 = vpop.f32.mrb[0].mxu0 }
 0x167   :  { %v5952_v35 = vadd.f32 %v1023_v5, %v7052_v12  ;;  %v1094_v36 = vpop.f32.mrb[0].mxu1  ;;  %v1025_v13 = vpop.f32.mrb[1].mxu0 }
 0x168   :  { %v5953_v51 = vadd.f32 %v1025_v13, %v7054_v1  ;;  %v1096_v45 = vpop.f32.mrb[1].mxu1  ;;  %v5968_v5 = vadd.f32 %v1094_v36, %v7063_v61 }
 0x169   :  { %v3810_v44 = vmul.f32 -1.442695, %v5952_v35  ;;  %v5969_v46 = vadd.f32 %v1096_v45, %v7059_v31 }
 0x16a   :  { %v3811_v37 = vmul.f32 -1.442695, %v5953_v51 }
 0x16b   :  { %6085 = vpow2.f32 %v3810_v44  ;;  %v3812_v20 = vmul.f32 -1.442695, %v5969_v46 }
 0x16c   :  { %6087 = vpow2.f32 %v3811_v37 }
 0x16d   :  { %6089 = vpow2.f32 %v3812_v20 }
 0x16e   :  { %6091 = vtanh.f32 %v5968_v5 }
 0x175   :  { %v6086_v12 = vpop.eup %6085 }
 0x176   :  { %v6088_v19 = vpop.eup %6087  ;;  %v1260_v2 = vadd.f32 1.0, %v6086_v12 }
 0x177   :  { %v1266_v35 = vadd.f32 1.0, %v6088_v19  ;;  %v6090_v51 = vpop.eup %6089  ;;  %v117_v19 = vsub.s32 5, %v7045_v21 }
 0x178   :  { %6093 = vrcp.f32 %v1260_v2  ;;  %v6092_v44 = vpop.eup %6091  ;;  %v1273_v1 = vadd.f32 1.0, %v6090_v51  ;;  %v113_v2 = vsub.s32 4, %v7045_v21 }
 0x179   :  { %6095 = vrcp.f32 %v1266_v35  ;;  %v7079_v5 = vrot.slane %v93_v7, %v117_v19  ;;  %v125_v35 = vsub.s32 7, %v7045_v21 }
 0x17a   :  { %6097 = vrcp.f32 %v1273_v1  ;;  %v7077_v20 = vrot.slane %v93_v7, %v113_v2  ;;  %v121_v2 = vsub.s32 6, %v7045_v21 }
 0x17c   :  { %8569 = vst [vmem:[#allocation142_spill] sm:$0xff] %v7077_v20 }
 0x182   :  { %v6094_v63 = vpop.eup %6093 }
 0x183   :  { %v6096_v13 = vpop.eup %6095  ;;  %v1277_v37 = vmul.f32 %v6094_v63, %v6092_v44 }
 0x184   :  { %v1276_v45 = vmul.f32 0.0, %v6096_v13  ;;  %v6098_v36 = vpop.eup %6097 }
 0x186   :  { %v7066_v4 = vadd.f32 %v1277_v37, %v1276_v45 }
 0x188   :  { %8568 = vst [vmem:[#allocation141_spill] sm:$0xff] %v7066_v4  ;;  %6099 = vtanh.f32 %v7066_v4  ;;  %v7088_v4 = vrot.slane %v93_v7, %v121_v2 }
 0x192   :  { %v6100_v46 = vpop.eup %6099 }
 0x193   :  { %v7069_v12 = vmul.f32 %v6100_v46, %v6098_v36  ;;  %v7084_v46 = vrot.slane %v93_v7, %v125_v35 }
 0x195   :  { %1305 = vst [vmem:[%s8125_s4] sm:$0xff] %v7069_v12 }
 0x1a6   :  { %v1165_v1 = vpop.f32.mrb[30].mxu0 }
 0x1a7   :  { %v5998_v51 = vadd.f32 %v1165_v1, %v7077_v20  ;;  %v1236_v44 = vpop.f32.mrb[30].mxu1  ;;  %v1167_v63 = vpop.f32.mrb[31].mxu0 }
 0x1a8   :  { %v5999_v13 = vadd.f32 %v1167_v63, %v7079_v5  ;;  %v1238_v37 = vpop.f32.mrb[31].mxu1  ;;  %v6014_v1 = vadd.f32 %v1236_v44, %v7088_v4 }
 0x1a9   :  { %v3813_v45 = vmul.f32 -1.442695, %v5998_v51  ;;  %v6015_v19 = vadd.f32 %v1238_v37, %v7084_v46 }
 0x1aa   :  { %v3814_v36 = vmul.f32 -1.442695, %v5999_v13 }
 0x1ab   :  { %6101 = vpow2.f32 %v3813_v45  ;;  %v3815_v61 = vmul.f32 -1.442695, %v6015_v19  ;;  %v8573_v19 = vld [vmem:[#allocation78_spill] sm:$0xff] }
 0x1ac   :  { %6103 = vpow2.f32 %v3814_v36 }
 0x1ad   :  { %6105 = vpow2.f32 %v3815_v61  ;;  %v8571_v61 = vld [vmem:[#allocation76_spill] sm:$0xff] }
 0x1ae   :  { %6107 = vtanh.f32 %v6014_v1  ;;  %v8574_v1 = vld [vmem:[#allocation79_spill] sm:$0xff] }
 0x1b5   :  { %v6102_v20 = vpop.eup %6101 }
 0x1b6   :  { %v6104_v31 = vpop.eup %6103  ;;  %v1284_v62 = vadd.f32 1.0, %v6102_v20 }
 0x1b7   :  { %v1290_v51 = vadd.f32 1.0, %v6104_v31  ;;  %v6106_v35 = vpop.eup %6105  ;;  %v8572_v31 = vld [vmem:[#allocation77_spill] sm:$0xff] }
 0x1b8   :  { %6109 = vrcp.f32 %v1284_v62  ;;  %v6108_v63 = vpop.eup %6107  ;;  %v1297_v36 = vadd.f32 1.0, %v6106_v35  ;;  %v8570_v62 = vld [vmem:[#allocation75_spill] sm:$0xff]  ;;  %v8576_v35 = vld [vmem:[#allocation81_spill] sm:$0xff] }
 0x1b9   :  { %6111 = vrcp.f32 %v1290_v51  ;;  %v8575_v51 = vld [vmem:[#allocation80_spill] sm:$0xff] }
 0x1ba   :  { %6113 = vrcp.f32 %v1297_v36  ;;  %v8581_v36 = vld [vmem:[#allocation86_spill] sm:$0xff] }
 0x1c2   :  { %v6110_v13 = vpop.eup %6109 }
 0x1c3   :  { %v6112_v21 = vpop.eup %6111  ;;  %v1301_v45 = vmul.f32 %v6110_v13, %v6108_v63  ;;  %v8577_v63 = vld [vmem:[#allocation82_spill] sm:$0xff]  ;;  %v8578_v13 = vld [vmem:[#allocation83_spill] sm:$0xff] }
 0x1c4   :  { %v1300_v37 = vmul.f32 0.0, %v6112_v21  ;;  %v6114_v44 = vpop.eup %6113  ;;  %v8579_v21 = vld [vmem:[#allocation84_spill] sm:$0xff] }
 0x1c6   :  { %v7091_v7 = vadd.f32 %v1301_v45, %v1300_v37  ;;  %v8580_v45 = vld [vmem:[#allocation85_spill] sm:$0xff]  ;;  %v8582_v37 = vld [vmem:[#allocation87_spill] sm:$0xff] }
 0x1c8   :  { %6115 = vtanh.f32 %v7091_v7 }
 0x1d2   :  { %v6116_v2 = vpop.eup %6115 }
 0x1d3   :  { %v1304_v20 = vmul.f32 %v6116_v2, %v6114_v44  ;;  %v8583_v44 = vld [vmem:[#allocation88_spill] sm:$0xff]  ;;  %v8584_v2 = vld [vmem:[#allocation89_spill] sm:$0xff] }
 0x1d5   :  { %1306 = vst [vmem:[%s8125_s4 + $0x8] sm:$0xff] %v1304_v20  ;;  %1371 = vmatprep.mubr.f32.mxu0 %v1304_v20  ;;  %1442 = vmatprep.mubr.f32.mxu1 %v1304_v20 }
 0x1d6   :  { %1372 = vmatmul.mubr.f32.vlgmr.msra.gmra.mrb[2].mxu0 %v7069_v12  ;;  %1443 = vmatmul.mubr.f32.vlgmr.msra.gmra.mrb[2].mxu1 %v7069_v12 }
 0x1d7   :  { %4291 = vmatpush1.bf16.msra.mxu0 %v8570_v62  ;;  %4355 = vmatpush1.bf16.msra.mxu1 %v8571_v61 }
 0x1d8   :  { %1513 = vmatprep.mubr.f32.mxu0 %v1304_v20  ;;  %1584 = vmatprep.mubr.f32.mxu1 %v1304_v20  ;;  %v8585_v20 = vld [vmem:[#allocation90_spill] sm:$0xff] }
 0x1d9   :  { %4293 = vmatprep.subr.bf16.mxu0 %v8572_v31  ;;  %4357 = vmatprep.subr.bf16.mxu1 %v8573_v19 }
 0x1db   :  { %4295 = vmatpush1.bf16.msra.mxu0 %v8574_v1  ;;  %4359 = vmatpush1.bf16.msra.mxu1 %v8575_v51  ;;  %v8586_v51 = vld [vmem:[#allocation91_spill] sm:$0xff] }
 0x1dc   :  { %4297 = vmatprep.subr.bf16.mxu0 %v8576_v35  ;;  %4361 = vmatprep.subr.bf16.mxu1 %v8577_v63  ;;  %v8587_v35 = vld [vmem:[#allocation92_spill] sm:$0xff]  ;;  %v8588_v63 = vld [vmem:[#allocation93_spill] sm:$0xff] }
 0x1df   :  { %4299 = vmatpush1.bf16.msra.mxu0 %v8578_v13  ;;  %4363 = vmatpush1.bf16.msra.mxu1 %v8579_v21  ;;  %v8589_v13 = vld [vmem:[#allocation94_spill] sm:$0xff]  ;;  %v8590_v21 = vld [vmem:[#allocation95_spill] sm:$0xff] }
 0x1e0   :  { %4301 = vmatprep.subr.bf16.mxu0 %v8580_v45  ;;  %4365 = vmatprep.subr.bf16.mxu1 %v8581_v36  ;;  %v8591_v45 = vld [vmem:[#allocation96_spill] sm:$0xff]  ;;  %v8592_v36 = vld [vmem:[#allocation97_spill] sm:$0xff] }
 0x1e3   :  { %4303 = vmatpush1.bf16.msra.mxu0 %v8582_v37  ;;  %4367 = vmatpush1.bf16.msra.mxu1 %v8583_v44  ;;  %v8593_v37 = vld [vmem:[#allocation98_spill] sm:$0xff]  ;;  %v8594_v44 = vld [vmem:[#allocation99_spill] sm:$0xff] }
 0x1e4   :  { %4305 = vmatprep.subr.bf16.mxu0 %v8584_v2  ;;  %4369 = vmatprep.subr.bf16.mxu1 %v8585_v20  ;;  %v8595_v2 = vld [vmem:[#allocation100_spill] sm:$0xff]  ;;  %v8596_v20 = vld [vmem:[#allocation101_spill] sm:$0xff] }
 0x1e7   :  { %4307 = vmatpush1.bf16.msra.mxu0 %v8586_v51  ;;  %4371 = vmatpush1.bf16.msra.mxu1 %v8587_v35  ;;  %v8597_v51 = vld [vmem:[#allocation102_spill] sm:$0xff]  ;;  %v8598_v35 = vld [vmem:[#allocation103_spill] sm:$0xff] }
 0x1e8   :  { %4309 = vmatprep.subr.bf16.mxu0 %v8588_v63  ;;  %4373 = vmatprep.subr.bf16.mxu1 %v8589_v13  ;;  %v8599_v63 = vld [vmem:[#allocation104_spill] sm:$0xff]  ;;  %v8600_v13 = vld [vmem:[#allocation105_spill] sm:$0xff] }
 0x1eb   :  { %4311 = vmatpush1.bf16.msra.mxu0 %v8590_v21  ;;  %4375 = vmatpush1.bf16.msra.mxu1 %v8591_v45  ;;  %v8601_v21 = vld [vmem:[#allocation106_spill] sm:$0xff]  ;;  %v8602_v45 = vld [vmem:[#allocation107_spill] sm:$0xff] }
 0x1ec   :  { %4313 = vmatprep.subr.bf16.mxu0 %v8592_v36  ;;  %4377 = vmatprep.subr.bf16.mxu1 %v8593_v37  ;;  %v8603_v36 = vld [vmem:[#allocation108_spill] sm:$0xff]  ;;  %v8604_v37 = vld [vmem:[#allocation109_spill] sm:$0xff] }
 0x1ef   :  { %4315 = vmatpush1.bf16.msra.mxu0 %v8594_v44  ;;  %4379 = vmatpush1.bf16.msra.mxu1 %v8595_v2  ;;  %v8605_v44 = vld [vmem:[#allocation110_spill] sm:$0xff]  ;;  %v8606_v2 = vld [vmem:[#allocation111_spill] sm:$0xff] }
 0x1f0   :  { %4317 = vmatprep.subr.bf16.mxu0 %v8596_v20  ;;  %4381 = vmatprep.subr.bf16.mxu1 %v8597_v51  ;;  %v8607_v20 = vld [vmem:[#allocation112_spill] sm:$0xff]  ;;  %v8608_v51 = vld [vmem:[#allocation113_spill] sm:$0xff] }
 0x1f3   :  { %4319 = vmatpush1.bf16.msra.mxu0 %v8598_v35  ;;  %4383 = vmatpush1.bf16.msra.mxu1 %v8599_v63  ;;  %v8609_v35 = vld [vmem:[#allocation114_spill] sm:$0xff]  ;;  %v8610_v63 = vld [vmem:[#allocation115_spill] sm:$0xff] }
 0x1f4   :  { %4321 = vmatprep.subr.bf16.mxu0 %v8600_v13  ;;  %4385 = vmatprep.subr.bf16.mxu1 %v8601_v21  ;;  %v8611_v13 = vld [vmem:[#allocation116_spill] sm:$0xff]  ;;  %v8612_v21 = vld [vmem:[#allocation117_spill] sm:$0xff] }
 0x1f7   :  { %4323 = vmatpush1.bf16.msra.mxu0 %v8602_v45  ;;  %4387 = vmatpush1.bf16.msra.mxu1 %v8603_v36  ;;  %v8613_v45 = vld [vmem:[#allocation118_spill] sm:$0xff]  ;;  %v8614_v36 = vld [vmem:[#allocation119_spill] sm:$0xff] }
 0x1f8   :  { %4325 = vmatprep.subr.bf16.mxu0 %v8604_v37  ;;  %4389 = vmatprep.subr.bf16.mxu1 %v8605_v44  ;;  %v8615_v37 = vld [vmem:[#allocation120_spill] sm:$0xff]  ;;  %v8616_v44 = vld [vmem:[#allocation121_spill] sm:$0xff] }
 0x1fb   :  { %4327 = vmatpush1.bf16.msra.mxu0 %v8606_v2  ;;  %4391 = vmatpush1.bf16.msra.mxu1 %v8607_v20  ;;  %v8617_v2 = vld [vmem:[#allocation122_spill] sm:$0xff]  ;;  %v8618_v20 = vld [vmem:[#allocation123_spill] sm:$0xff] }
 0x1fc   :  { %4329 = vmatprep.subr.bf16.mxu0 %v8608_v51  ;;  %4393 = vmatprep.subr.bf16.mxu1 %v8609_v35  ;;  %v8619_v51 = vld [vmem:[#allocation124_spill] sm:$0xff] }
 0x1ff   :  { %4331 = vmatpush1.bf16.msra.mxu0 %v8610_v63  ;;  %4395 = vmatpush1.bf16.msra.mxu1 %v8611_v13  ;;  %v8620_v63 = vld [vmem:[#allocation126_spill] sm:$0xff] }
 0x200   :  { %4333 = vmatprep.subr.bf16.mxu0 %v8612_v21  ;;  %4397 = vmatprep.subr.bf16.mxu1 %v8613_v45 }
 0x203   :  { %4335 = vmatpush1.bf16.msra.mxu0 %v8614_v36  ;;  %4399 = vmatpush1.bf16.msra.mxu1 %v8615_v37 }
 0x204   :  { %4337 = vmatprep.subr.bf16.mxu0 %v8616_v44  ;;  %4401 = vmatprep.subr.bf16.mxu1 %v8617_v2 }
 0x207   :  { %4339 = vmatpush1.bf16.msra.mxu0 %v8618_v20  ;;  %4403 = vmatpush1.bf16.msra.mxu1 %v8619_v51 }
 0x208   :  { %4341 = vmatprep.subr.bf16.mxu0 %v6938_v27  ;;  %4405 = vmatprep.subr.bf16.mxu1 %v8620_v63 }
 0x20b   :  { %4343 = vmatpush1.bf16.msra.mxu0 %v6944_v57  ;;  %4407 = vmatpush1.bf16.msra.mxu1 %v6948_v11 }
 0x20c   :  { %4345 = vmatprep.subr.bf16.mxu0 %v6950_v15  ;;  %4409 = vmatprep.subr.bf16.mxu1 %v6953_v0 }
 0x20f   :  { %4347 = vmatpush1.bf16.msra.mxu0 %v6956_v26  ;;  %4411 = vmatpush1.bf16.msra.mxu1 %v6960_v48 }
 0x210   :  { %4349 = vmatprep.subr.bf16.mxu0 %v6962_v55  ;;  %4413 = vmatprep.subr.bf16.mxu1 %v6965_v6 }
 0x213   :  { %4351 = vmatpush1.bf16.msra.mxu0 %v6968_v33  ;;  %4415 = vmatpush1.bf16.msra.mxu1 %v6972_v50 }
 0x214   :  { %4417 = vmatprep.subr.bf16.mxu0 %v6477_v60  ;;  %4481 = vmatprep.subr.bf16.mxu1 %v6495_v3 }
 0x216   :  { %1514 = vmatmul.mubr.f32.vlgmr.msra.gmra.mrb[28].mxu0 %v7069_v12  ;;  %1585 = vmatmul.mubr.f32.vlgmr.msra.gmra.mrb[28].mxu1 %v7069_v12  ;;  %v8621_v12 = vld [vmem:[#allocation41_spill] sm:$0xff] }
 0x217   :  { %4419 = vmatpush1.bf16.msra.mxu0 %v6546_v16  ;;  %4483 = vmatpush1.bf16.msra.mxu1 %v6549_v17 }
 0x218   :  { %4421 = vmatprep.subr.bf16.mxu0 %v6551_v18  ;;  %4485 = vmatprep.subr.bf16.mxu1 %v6553_v22 }
 0x21b   :  { %4423 = vmatpush1.bf16.msra.mxu0 %v6560_v28  ;;  %4487 = vmatpush1.bf16.msra.mxu1 %v6564_v29 }
 0x21c   :  { %4425 = vmatprep.subr.bf16.mxu0 %v6566_v30  ;;  %4489 = vmatprep.subr.bf16.mxu1 %v6569_v34 }
 0x21f   :  { %4427 = vmatpush1.bf16.msra.mxu0 %v6576_v40  ;;  %4491 = vmatpush1.bf16.msra.mxu1 %v6582_v41 }
 0x220   :  { %4429 = vmatprep.subr.bf16.mxu0 %v6584_v42  ;;  %4493 = vmatprep.subr.bf16.mxu1 %v6587_v47 }
 0x223   :  { %4431 = vmatpush1.bf16.msra.mxu0 %v6594_v52  ;;  %4495 = vmatpush1.bf16.msra.mxu1 %v6600_v53 }
 0x224   :  { %4433 = vmatprep.subr.bf16.mxu0 %v6602_v54  ;;  %4497 = vmatprep.subr.bf16.mxu1 %v6605_v59 }
 0x227   :  { %4435 = vmatpush1.bf16.msra.mxu0 %v6612_v8  ;;  %4499 = vmatpush1.bf16.msra.mxu1 %v6618_v9  ;;  %v8656_v9 = vld [vmem:[#allocation138_spill] sm:$0xff] }
 0x228   :  { %4437 = vmatprep.subr.bf16.mxu0 %v6620_v10  ;;  %4501 = vmatprep.subr.bf16.mxu1 %v6623_v14  ;;  %v8655_v14 = vld [vmem:[#allocation137_spill] sm:$0xff] }
 0x22b   :  { %4439 = vmatpush1.bf16.msra.mxu0 %v6630_v23  ;;  %4503 = vmatpush1.bf16.msra.mxu1 %v6636_v24  ;;  %v8622_v23 = vld [vmem:[#allocation42_spill] sm:$0xff]  ;;  %v8623_v24 = vld [vmem:[#allocation43_spill] sm:$0xff] }
 0x22c   :  { %4441 = vmatprep.subr.bf16.mxu0 %v6638_v25  ;;  %4505 = vmatprep.subr.bf16.mxu1 %v6641_v32  ;;  %v8624_v25 = vld [vmem:[#allocation44_spill] sm:$0xff]  ;;  %v8625_v32 = vld [vmem:[#allocation45_spill] sm:$0xff] }
 0x22f   :  { %4443 = vmatpush1.bf16.msra.mxu0 %v6648_v38  ;;  %4507 = vmatpush1.bf16.msra.mxu1 %v6654_v39  ;;  %v8626_v38 = vld [vmem:[#allocation46_spill] sm:$0xff]  ;;  %v8627_v39 = vld [vmem:[#allocation47_spill] sm:$0xff] }
 0x230   :  { %4445 = vmatprep.subr.bf16.mxu0 %v6656_v43  ;;  %4509 = vmatprep.subr.bf16.mxu1 %v6659_v49  ;;  %v8628_v43 = vld [vmem:[#allocation48_spill] sm:$0xff]  ;;  %v8629_v49 = vld [vmem:[#allocation49_spill] sm:$0xff] }
 0x233   :  { %4447 = vmatpush1.bf16.msra.mxu0 %v6666_v56  ;;  %4511 = vmatpush1.bf16.msra.mxu1 %v6672_v58  ;;  %v8630_v56 = vld [vmem:[#allocation50_spill] sm:$0xff]  ;;  %v8631_v58 = vld [vmem:[#allocation51_spill] sm:$0xff] }
 0x234   :  { %4449 = vmatprep.subr.bf16.mxu0 %v8621_v12  ;;  %4513 = vmatprep.subr.bf16.mxu1 %v8622_v23  ;;  %v8632_v12 = vld [vmem:[#allocation52_spill] sm:$0xff]  ;;  %v8633_v23 = vld [vmem:[#allocation53_spill] sm:$0xff] }
 0x237   :  { %4451 = vmatpush1.bf16.msra.mxu0 %v8623_v24  ;;  %4515 = vmatpush1.bf16.msra.mxu1 %v8624_v25  ;;  %v8634_v24 = vld [vmem:[#allocation54_spill] sm:$0xff]  ;;  %v8635_v25 = vld [vmem:[#allocation55_spill] sm:$0xff] }
 0x238   :  { %4453 = vmatprep.subr.bf16.mxu0 %v8625_v32  ;;  %4517 = vmatprep.subr.bf16.mxu1 %v8626_v38  ;;  %v8636_v32 = vld [vmem:[#allocation56_spill] sm:$0xff]  ;;  %v8637_v38 = vld [vmem:[#allocation57_spill] sm:$0xff] }
 0x23b   :  { %4455 = vmatpush1.bf16.msra.mxu0 %v8627_v39  ;;  %4519 = vmatpush1.bf16.msra.mxu1 %v8628_v43  ;;  %v8638_v39 = vld [vmem:[#allocation58_spill] sm:$0xff]  ;;  %v8639_v43 = vld [vmem:[#allocation59_spill] sm:$0xff] }
 0x23c   :  { %4457 = vmatprep.subr.bf16.mxu0 %v8629_v49  ;;  %4521 = vmatprep.subr.bf16.mxu1 %v8630_v56  ;;  %v8640_v49 = vld [vmem:[#allocation60_spill] sm:$0xff]  ;;  %v8641_v56 = vld [vmem:[#allocation61_spill] sm:$0xff] }
 0x23f   :  { %4459 = vmatpush1.bf16.msra.mxu0 %v8631_v58  ;;  %4523 = vmatpush1.bf16.msra.mxu1 %v8632_v12  ;;  %v8642_v58 = vld [vmem:[#allocation62_spill] sm:$0xff]  ;;  %v8643_v12 = vld [vmem:[#allocation63_spill] sm:$0xff] }
 0x240   :  { %4461 = vmatprep.subr.bf16.mxu0 %v8633_v23  ;;  %4525 = vmatprep.subr.bf16.mxu1 %v8634_v24  ;;  %v8644_v23 = vld [vmem:[#allocation64_spill] sm:$0xff]  ;;  %v8645_v24 = vld [vmem:[#allocation65_spill] sm:$0xff] }
 0x243   :  { %4463 = vmatpush1.bf16.msra.mxu0 %v8635_v25  ;;  %4527 = vmatpush1.bf16.msra.mxu1 %v8636_v32  ;;  %v8646_v25 = vld [vmem:[#allocation66_spill] sm:$0xff]  ;;  %v8647_v32 = vld [vmem:[#allocation67_spill] sm:$0xff] }
 0x244   :  { %4465 = vmatprep.subr.bf16.mxu0 %v8637_v38  ;;  %4529 = vmatprep.subr.bf16.mxu1 %v8638_v39  ;;  %v8648_v38 = vld [vmem:[#allocation68_spill] sm:$0xff]  ;;  %v8649_v39 = vld [vmem:[#allocation69_spill] sm:$0xff] }
 0x247   :  { %4467 = vmatpush1.bf16.msra.mxu0 %v8639_v43  ;;  %4531 = vmatpush1.bf16.msra.mxu1 %v8640_v49  ;;  %v8650_v43 = vld [vmem:[#allocation70_spill] sm:$0xff]  ;;  %v8651_v49 = vld [vmem:[#allocation71_spill] sm:$0xff] }
 0x248   :  { %4469 = vmatprep.subr.bf16.mxu0 %v8641_v56  ;;  %4533 = vmatprep.subr.bf16.mxu1 %v8642_v58  ;;  %v8652_v56 = vld [vmem:[#allocation72_spill] sm:$0xff]  ;;  %v8653_v58 = vld [vmem:[#allocation73_spill] sm:$0xff] }
 0x24b   :  { %4471 = vmatpush1.bf16.msra.mxu0 %v8643_v12  ;;  %4535 = vmatpush1.bf16.msra.mxu1 %v8644_v23  ;;  %v8654_v12 = vld [vmem:[#allocation74_spill] sm:$0xff] }
 0x24c   :  { %4473 = vmatprep.subr.bf16.mxu0 %v8645_v24  ;;  %4537 = vmatprep.subr.bf16.mxu1 %v8646_v25 }
 0x24f   :  { %4475 = vmatpush1.bf16.msra.mxu0 %v8647_v32  ;;  %4539 = vmatpush1.bf16.msra.mxu1 %v8648_v38 }
 0x250   :  { %4477 = vmatprep.subr.bf16.mxu0 %v8649_v39  ;;  %4541 = vmatprep.subr.bf16.mxu1 %v8650_v43  ;;  %v8657_v43 = vld [vmem:[#allocation139_spill] sm:$0xff] }
 0x253   :  { %4479 = vmatpush1.bf16.msra.mxu0 %v8651_v49  ;;  %4543 = vmatpush1.bf16.msra.mxu1 %v8652_v56  ;;  %v8658_v56 = vld [vmem:[#allocation140_spill] sm:$0xff] }
 0x254   :  { %4545 = vmatprep.subr.bf16.mxu0 %v8653_v58  ;;  %4609 = vmatprep.subr.bf16.mxu1 %v8654_v12 }
 0x2a9   :  { %v1373_v23 = vpop.f32.mrb[2].mxu0  ;;  %v1444_v24 = vpop.f32.mrb[2].mxu1 }
 0x2aa   :  { %v5954_v25 = vadd.f32 %v1373_v23, %v8655_v14  ;;  %v1375_v10 = vpop.f32.mrb[3].mxu0  ;;  %v1446_v32 = vpop.f32.mrb[3].mxu1  ;;  %v5970_v54 = vadd.f32 %v1444_v24, %v8658_v56 }
 0x2ab   :  { %v5955_v38 = vadd.f32 %v1375_v10, %v8656_v9  ;;  %v5971_v49 = vadd.f32 %v1446_v32, %v8657_v43 }
 0x2ac   :  { %v3816_v8 = vmul.f32 -1.442695, %v5954_v25 }
 0x2ad   :  { %v3817_v39 = vmul.f32 -1.442695, %v5955_v38  ;;  %v3818_v59 = vmul.f32 -1.442695, %v5971_v49 }
 0x2ae   :  { %6117 = vpow2.f32 %v3816_v8 }
 0x2af   :  { %6119 = vpow2.f32 %v3817_v39  ;;  %v8659_v39 = vld [vmem:[#allocation141_spill] sm:$0xff] }
 0x2b0   :  { %6121 = vpow2.f32 %v3818_v59 }
 0x2b1   :  { %6123 = vtanh.f32 %v5970_v54  ;;  %v8661_v54 = vld [vmem:[#allocation142_spill] sm:$0xff] }
 0x2b8   :  { %v6118_v58 = vpop.eup %6117 }
 0x2b9   :  { %v6120_v53 = vpop.eup %6119  ;;  %v1610_v12 = vadd.f32 1.0, %v6118_v58 }
 0x2ba   :  { %v1616_v52 = vadd.f32 1.0, %v6120_v53  ;;  %v6122_v23 = vpop.eup %6121 }
 0x2bb   :  { %6125 = vrcp.f32 %v1610_v12  ;;  %v6124_v14 = vpop.eup %6123  ;;  %v1623_v8 = vadd.f32 1.0, %v6122_v23 }
 0x2bc   :  { %6127 = vrcp.f32 %v1616_v52 }
 0x2bd   :  { %6129 = vrcp.f32 %v1623_v8 }
 0x2c5   :  { %v6126_v10 = vpop.eup %6125 }
 0x2c6   :  { %v6128_v25 = vpop.eup %6127  ;;  %v1627_v38 = vmul.f32 %v6126_v10, %v6124_v14 }
 0x2c7   :  { %v1626_v9 = vmul.f32 %v6128_v25, %v8659_v39  ;;  %v6130_v24 = vpop.eup %6129 }
 0x2c9   :  { %v7234_v32 = vadd.f32 %v1627_v38, %v1626_v9 }
 0x2cb   :  { %8660 = vst [vmem:[#allocation75_spill] sm:$0xff] %v7234_v32  ;;  %6131 = vtanh.f32 %v7234_v32 }
 0x2d5   :  { %v6132_v49 = vpop.eup %6131 }
 0x2d6   :  { %v7237_v59 = vmul.f32 %v6132_v49, %v6130_v24 }
 0x2d8   :  { %3822 = vst [vmem:[%s8125_s4 + $0x10] sm:$0xff] %v7237_v59 }
 0x2e9   :  { %v1515_v52 = vpop.f32.mrb[28].mxu0  ;;  %v1586_v53 = vpop.f32.mrb[28].mxu1 }
 0x2ea   :  { %v5996_v14 = vadd.f32 %v1515_v52, %v8661_v54  ;;  %v1517_v58 = vpop.f32.mrb[29].mxu0  ;;  %v1588_v12 = vpop.f32.mrb[29].mxu1  ;;  %v6012_v8 = vadd.f32 %v1586_v53, %v7088_v4 }
 0x2eb   :  { %v5997_v9 = vadd.f32 %v1517_v58, %v7079_v5  ;;  %v6013_v25 = vadd.f32 %v1588_v12, %v7084_v46 }
 0x2ec   :  { %v3819_v23 = vmul.f32 -1.442695, %v5996_v14 }
 0x2ed   :  { %v3820_v10 = vmul.f32 -1.442695, %v5997_v9  ;;  %v3821_v38 = vmul.f32 -1.442695, %v6013_v25 }
 0x2ee   :  { %6133 = vpow2.f32 %v3819_v23 }
 0x2ef   :  { %6135 = vpow2.f32 %v3820_v10 }
 0x2f0   :  { %6137 = vpow2.f32 %v3821_v38 }
 0x2f1   :  { %6139 = vtanh.f32 %v6012_v8  ;;  %v8665_v8 = vld [vmem:[#allocation83_spill] sm:$0xff] }
 0x2f8   :  { %v6134_v39 = vpop.eup %6133 }
 0x2f9   :  { %v6136_v24 = vpop.eup %6135  ;;  %v1634_v49 = vadd.f32 1.0, %v6134_v39  ;;  %v8666_v39 = vld [vmem:[#allocation84_spill] sm:$0xff] }
 0x2fa   :  { %v1640_v32 = vadd.f32 1.0, %v6136_v24  ;;  %v6138_v52 = vpop.eup %6137  ;;  %v8667_v24 = vld [vmem:[#allocation85_spill] sm:$0xff] }
 0x2fb   :  { %6141 = vrcp.f32 %v1634_v49  ;;  %v6140_v54 = vpop.eup %6139  ;;  %v1647_v23 = vadd.f32 1.0, %v6138_v52  ;;  %v8668_v49 = vld [vmem:[#allocation86_spill] sm:$0xff]  ;;  %v8669_v52 = vld [vmem:[#allocation87_spill] sm:$0xff] }
 0x2fc   :  { %6143 = vrcp.f32 %v1640_v32  ;;  %v8663_v32 = vld [vmem:[#allocation81_spill] sm:$0xff] }
 0x2fd   :  { %6145 = vrcp.f32 %v1647_v23  ;;  %v8673_v23 = vld [vmem:[#allocation91_spill] sm:$0xff] }
 0x305   :  { %v6142_v58 = vpop.eup %6141 }
 0x306   :  { %v6144_v14 = vpop.eup %6143  ;;  %v1651_v9 = vmul.f32 %v6142_v58, %v6140_v54  ;;  %v8664_v54 = vld [vmem:[#allocation82_spill] sm:$0xff]  ;;  %v8670_v58 = vld [vmem:[#allocation88_spill] sm:$0xff] }
 0x307   :  { %v1650_v10 = vmul.f32 %v6144_v14, %v7091_v7  ;;  %v6146_v53 = vpop.eup %6145  ;;  %v8662_v7 = vld [vmem:[#allocation80_spill] sm:$0xff]  ;;  %v8671_v14 = vld [vmem:[#allocation89_spill] sm:$0xff] }
 0x309   :  { %v7248_v12 = vadd.f32 %v1651_v9, %v1650_v10  ;;  %v8672_v9 = vld [vmem:[#allocation90_spill] sm:$0xff]  ;;  %v8674_v10 = vld [vmem:[#allocation92_spill] sm:$0xff] }
 0x30b   :  { %6147 = vtanh.f32 %v7248_v12 }
 0x315   :  { %v6148_v25 = vpop.eup %6147 }
 0x316   :  { %v1654_v38 = vmul.f32 %v6148_v25, %v6146_v53  ;;  %v8675_v53 = vld [vmem:[#allocation93_spill] sm:$0xff]  ;;  %v8676_v25 = vld [vmem:[#allocation94_spill] sm:$0xff] }
 0x318   :  { %3823 = vst [vmem:[%s8125_s4 + $0x18] sm:$0xff] %v1654_v38  ;;  %1722 = vmatprep.mubr.f32.mxu0 %v1654_v38  ;;  %1793 = vmatprep.mubr.f32.mxu1 %v1654_v38 }
 0x319   :  { %1723 = vmatmul.mubr.f32.vlgmr.msra.gmra.mrb[4].mxu0 %v7237_v59  ;;  %1794 = vmatmul.mubr.f32.vlgmr.msra.gmra.mrb[4].mxu1 %v7237_v59 }
 0x31a   :  { %4547 = vmatpush1.bf16.msra.mxu0 %v8570_v62  ;;  %4611 = vmatpush1.bf16.msra.mxu1 %v8571_v61 }
 0x31b   :  { %1864 = vmatprep.mubr.f32.mxu0 %v1654_v38  ;;  %1935 = vmatprep.mubr.f32.mxu1 %v1654_v38  ;;  %v8677_v38 = vld [vmem:[#allocation95_spill] sm:$0xff] }
 0x31c   :  { %4549 = vmatprep.subr.bf16.mxu0 %v8572_v31  ;;  %4613 = vmatprep.subr.bf16.mxu1 %v8573_v19 }
 0x31e   :  { %4551 = vmatpush1.bf16.msra.mxu0 %v8574_v1  ;;  %4615 = vmatpush1.bf16.msra.mxu1 %v8662_v7 }
 0x31f   :  { %4553 = vmatprep.subr.bf16.mxu0 %v8663_v32  ;;  %4617 = vmatprep.subr.bf16.mxu1 %v8664_v54 }
 0x322   :  { %4555 = vmatpush1.bf16.msra.mxu0 %v8665_v8  ;;  %4619 = vmatpush1.bf16.msra.mxu1 %v8666_v39 }
 0x323   :  { %4557 = vmatprep.subr.bf16.mxu0 %v8667_v24  ;;  %4621 = vmatprep.subr.bf16.mxu1 %v8668_v49  ;;  %v8678_v24 = vld [vmem:[#allocation96_spill] sm:$0xff]  ;;  %v8679_v49 = vld [vmem:[#allocation97_spill] sm:$0xff] }
 0x326   :  { %4559 = vmatpush1.bf16.msra.mxu0 %v8669_v52  ;;  %4623 = vmatpush1.bf16.msra.mxu1 %v8670_v58  ;;  %v8680_v52 = vld [vmem:[#allocation98_spill] sm:$0xff]  ;;  %v8681_v58 = vld [vmem:[#allocation99_spill] sm:$0xff] }
 0x327   :  { %4561 = vmatprep.subr.bf16.mxu0 %v8671_v14  ;;  %4625 = vmatprep.subr.bf16.mxu1 %v8672_v9  ;;  %v8682_v14 = vld [vmem:[#allocation100_spill] sm:$0xff]  ;;  %v8683_v9 = vld [vmem:[#allocation101_spill] sm:$0xff] }
 0x32a   :  { %4563 = vmatpush1.bf16.msra.mxu0 %v8673_v23  ;;  %4627 = vmatpush1.bf16.msra.mxu1 %v8674_v10  ;;  %v8684_v23 = vld [vmem:[#allocation102_spill] sm:$0xff]  ;;  %v8685_v10 = vld [vmem:[#allocation103_spill] sm:$0xff] }
 0x32b   :  { %4565 = vmatprep.subr.bf16.mxu0 %v8675_v53  ;;  %4629 = vmatprep.subr.bf16.mxu1 %v8676_v25  ;;  %v8686_v53 = vld [vmem:[#allocation104_spill] sm:$0xff]  ;;  %v8687_v25 = vld [vmem:[#allocation105_spill] sm:$0xff] }
 0x32e   :  { %4567 = vmatpush1.bf16.msra.mxu0 %v8677_v38  ;;  %4631 = vmatpush1.bf16.msra.mxu1 %v8678_v24  ;;  %v8688_v38 = vld [vmem:[#allocation106_spill] sm:$0xff]  ;;  %v8689_v24 = vld [vmem:[#allocation107_spill] sm:$0xff] }
 0x32f   :  { %4569 = vmatprep.subr.bf16.mxu0 %v8679_v49  ;;  %4633 = vmatprep.subr.bf16.mxu1 %v8680_v52  ;;  %v8690_v49 = vld [vmem:[#allocation108_spill] sm:$0xff]  ;;  %v8691_v52 = vld [vmem:[#allocation109_spill] sm:$0xff] }
 0x332   :  { %4571 = vmatpush1.bf16.msra.mxu0 %v8681_v58  ;;  %4635 = vmatpush1.bf16.msra.mxu1 %v8682_v14  ;;  %v8692_v58 = vld [vmem:[#allocation110_spill] sm:$0xff]  ;;  %v8693_v14 = vld [vmem:[#allocation111_spill] sm:$0xff] }
 0x333   :  { %4573 = vmatprep.subr.bf16.mxu0 %v8683_v9  ;;  %4637 = vmatprep.subr.bf16.mxu1 %v8684_v23  ;;  %v8694_v9 = vld [vmem:[#allocation112_spill] sm:$0xff]  ;;  %v8695_v23 = vld [vmem:[#allocation113_spill] sm:$0xff] }
 0x336   :  { %4575 = vmatpush1.bf16.msra.mxu0 %v8685_v10  ;;  %4639 = vmatpush1.bf16.msra.mxu1 %v8686_v53  ;;  %v8696_v53 = vld [vmem:[#allocation115_spill] sm:$0xff] }
 0x337   :  { %4577 = vmatprep.subr.bf16.mxu0 %v8687_v25  ;;  %4641 = vmatprep.subr.bf16.mxu1 %v8688_v38 }
 0x33a   :  { %4579 = vmatpush1.bf16.msra.mxu0 %v8689_v24  ;;  %4643 = vmatpush1.bf16.msra.mxu1 %v8690_v49 }
 0x33b   :  { %4581 = vmatprep.subr.bf16.mxu0 %v8691_v52  ;;  %4645 = vmatprep.subr.bf16.mxu1 %v8692_v58 }
 0x33e   :  { %4583 = vmatpush1.bf16.msra.mxu0 %v8693_v14  ;;  %4647 = vmatpush1.bf16.msra.mxu1 %v8694_v9 }
 0x33f   :  { %4585 = vmatprep.subr.bf16.mxu0 %v8695_v23  ;;  %4649 = vmatprep.subr.bf16.mxu1 %v8609_v35 }
 0x342   :  { %4587 = vmatpush1.bf16.msra.mxu0 %v8696_v53  ;;  %4651 = vmatpush1.bf16.msra.mxu1 %v8611_v13 }
 0x343   :  { %4589 = vmatprep.subr.bf16.mxu0 %v8612_v21  ;;  %4653 = vmatprep.subr.bf16.mxu1 %v8613_v45 }
 0x346   :  { %4591 = vmatpush1.bf16.msra.mxu0 %v8614_v36  ;;  %4655 = vmatpush1.bf16.msra.mxu1 %v8615_v37 }
 0x347   :  { %4593 = vmatprep.subr.bf16.mxu0 %v8616_v44  ;;  %4657 = vmatprep.subr.bf16.mxu1 %v8617_v2 }
 0x34a   :  { %4595 = vmatpush1.bf16.msra.mxu0 %v8618_v20  ;;  %4659 = vmatpush1.bf16.msra.mxu1 %v8619_v51 }
 0x34b   :  { %4597 = vmatprep.subr.bf16.mxu0 %v6938_v27  ;;  %4661 = vmatprep.subr.bf16.mxu1 %v8620_v63 }
 0x34e   :  { %4599 = vmatpush1.bf16.msra.mxu0 %v6944_v57  ;;  %4663 = vmatpush1.bf16.msra.mxu1 %v6948_v11 }
 0x34f   :  { %4601 = vmatprep.subr.bf16.mxu0 %v6950_v15  ;;  %4665 = vmatprep.subr.bf16.mxu1 %v6953_v0 }
 0x352   :  { %4603 = vmatpush1.bf16.msra.mxu0 %v6956_v26  ;;  %4667 = vmatpush1.bf16.msra.mxu1 %v6960_v48 }
 0x353   :  { %4605 = vmatprep.subr.bf16.mxu0 %v6962_v55  ;;  %4669 = vmatprep.subr.bf16.mxu1 %v6965_v6 }
 0x356   :  { %4607 = vmatpush1.bf16.msra.mxu0 %v6968_v33  ;;  %4671 = vmatpush1.bf16.msra.mxu1 %v6972_v50 }
 0x357   :  { %4673 = vmatprep.subr.bf16.mxu0 %v6477_v60  ;;  %4737 = vmatprep.subr.bf16.mxu1 %v6495_v3  ;;  %v8750_v3 = vld [vmem:[#allocation138_spill] sm:$0xff] }
 0x359   :  { %1865 = vmatmul.mubr.f32.vlgmr.msra.gmra.mrb[26].mxu0 %v7237_v59  ;;  %1936 = vmatmul.mubr.f32.vlgmr.msra.gmra.mrb[26].mxu1 %v7237_v59  ;;  %v8697_v59 = vld [vmem:[#allocation23_spill] sm:$0xff] }
 0x35a   :  { %4675 = vmatpush1.bf16.msra.mxu0 %v6546_v16  ;;  %4739 = vmatpush1.bf16.msra.mxu1 %v6549_v17  ;;  %v8749_v17 = vld [vmem:[#allocation137_spill] sm:$0xff] }
 0x35b   :  { %4677 = vmatprep.subr.bf16.mxu0 %v6551_v18  ;;  %4741 = vmatprep.subr.bf16.mxu1 %v6553_v22  ;;  %v8698_v18 = vld [vmem:[#allocation24_spill] sm:$0xff]  ;;  %v8699_v22 = vld [vmem:[#allocation25_spill] sm:$0xff] }
 0x35e   :  { %4679 = vmatpush1.bf16.msra.mxu0 %v6560_v28  ;;  %4743 = vmatpush1.bf16.msra.mxu1 %v6564_v29  ;;  %v8700_v28 = vld [vmem:[#allocation26_spill] sm:$0xff]  ;;  %v8701_v29 = vld [vmem:[#allocation27_spill] sm:$0xff] }
 0x35f   :  { %4681 = vmatprep.subr.bf16.mxu0 %v6566_v30  ;;  %4745 = vmatprep.subr.bf16.mxu1 %v6569_v34  ;;  %v8702_v30 = vld [vmem:[#allocation28_spill] sm:$0xff]  ;;  %v8703_v34 = vld [vmem:[#allocation29_spill] sm:$0xff] }
 0x362   :  { %4683 = vmatpush1.bf16.msra.mxu0 %v6576_v40  ;;  %4747 = vmatpush1.bf16.msra.mxu1 %v6582_v41  ;;  %v8704_v40 = vld [vmem:[#allocation30_spill] sm:$0xff]  ;;  %v8705_v41 = vld [vmem:[#allocation31_spill] sm:$0xff] }
 0x363   :  { %4685 = vmatprep.subr.bf16.mxu0 %v6584_v42  ;;  %4749 = vmatprep.subr.bf16.mxu1 %v6587_v47  ;;  %v8706_v42 = vld [vmem:[#allocation32_spill] sm:$0xff]  ;;  %v8707_v47 = vld [vmem:[#allocation33_spill] sm:$0xff] }
 0x366   :  { %4687 = vmatpush1.bf16.msra.mxu0 %v8697_v59  ;;  %4751 = vmatpush1.bf16.msra.mxu1 %v8698_v18  ;;  %v8708_v59 = vld [vmem:[#allocation34_spill] sm:$0xff]  ;;  %v8709_v18 = vld [vmem:[#allocation35_spill] sm:$0xff] }
 0x367   :  { %4689 = vmatprep.subr.bf16.mxu0 %v8699_v22  ;;  %4753 = vmatprep.subr.bf16.mxu1 %v8700_v28  ;;  %v8710_v22 = vld [vmem:[#allocation36_spill] sm:$0xff]  ;;  %v8711_v28 = vld [vmem:[#allocation37_spill] sm:$0xff] }
 0x36a   :  { %4691 = vmatpush1.bf16.msra.mxu0 %v8701_v29  ;;  %4755 = vmatpush1.bf16.msra.mxu1 %v8702_v30  ;;  %v8712_v29 = vld [vmem:[#allocation38_spill] sm:$0xff]  ;;  %v8713_v30 = vld [vmem:[#allocation39_spill] sm:$0xff] }
 0x36b   :  { %4693 = vmatprep.subr.bf16.mxu0 %v8703_v34  ;;  %4757 = vmatprep.subr.bf16.mxu1 %v8704_v40  ;;  %v8714_v34 = vld [vmem:[#allocation40_spill] sm:$0xff]  ;;  %v8715_v40 = vld [vmem:[#allocation41_spill] sm:$0xff] }
 0x36e   :  { %4695 = vmatpush1.bf16.msra.mxu0 %v8705_v41  ;;  %4759 = vmatpush1.bf16.msra.mxu1 %v8706_v42  ;;  %v8716_v41 = vld [vmem:[#allocation42_spill] sm:$0xff]  ;;  %v8717_v42 = vld [vmem:[#allocation43_spill] sm:$0xff] }
 0x36f   :  { %4697 = vmatprep.subr.bf16.mxu0 %v8707_v47  ;;  %4761 = vmatprep.subr.bf16.mxu1 %v8708_v59  ;;  %v8718_v47 = vld [vmem:[#allocation44_spill] sm:$0xff]  ;;  %v8719_v59 = vld [vmem:[#allocation45_spill] sm:$0xff] }
 0x372   :  { %4699 = vmatpush1.bf16.msra.mxu0 %v8709_v18  ;;  %4763 = vmatpush1.bf16.msra.mxu1 %v8710_v22  ;;  %v8720_v18 = vld [vmem:[#allocation46_spill] sm:$0xff]  ;;  %v8721_v22 = vld [vmem:[#allocation47_spill] sm:$0xff] }
 0x373   :  { %4701 = vmatprep.subr.bf16.mxu0 %v8711_v28  ;;  %4765 = vmatprep.subr.bf16.mxu1 %v8712_v29  ;;  %v8722_v28 = vld [vmem:[#allocation48_spill] sm:$0xff]  ;;  %v8723_v29 = vld [vmem:[#allocation49_spill] sm:$0xff] }
 0x376   :  { %4703 = vmatpush1.bf16.msra.mxu0 %v8713_v30  ;;  %4767 = vmatpush1.bf16.msra.mxu1 %v8714_v34  ;;  %v8724_v30 = vld [vmem:[#allocation50_spill] sm:$0xff]  ;;  %v8725_v34 = vld [vmem:[#allocation51_spill] sm:$0xff] }
 0x377   :  { %4705 = vmatprep.subr.bf16.mxu0 %v8715_v40  ;;  %4769 = vmatprep.subr.bf16.mxu1 %v8716_v41  ;;  %v8726_v40 = vld [vmem:[#allocation52_spill] sm:$0xff]  ;;  %v8727_v41 = vld [vmem:[#allocation53_spill] sm:$0xff] }
 0x37a   :  { %4707 = vmatpush1.bf16.msra.mxu0 %v8717_v42  ;;  %4771 = vmatpush1.bf16.msra.mxu1 %v8718_v47  ;;  %v8728_v42 = vld [vmem:[#allocation54_spill] sm:$0xff]  ;;  %v8729_v47 = vld [vmem:[#allocation55_spill] sm:$0xff] }
 0x37b   :  { %4709 = vmatprep.subr.bf16.mxu0 %v8719_v59  ;;  %4773 = vmatprep.subr.bf16.mxu1 %v8720_v18  ;;  %v8730_v59 = vld [vmem:[#allocation56_spill] sm:$0xff]  ;;  %v8731_v18 = vld [vmem:[#allocation57_spill] sm:$0xff] }
 0x37e   :  { %4711 = vmatpush1.bf16.msra.mxu0 %v8721_v22  ;;  %4775 = vmatpush1.bf16.msra.mxu1 %v8722_v28  ;;  %v8732_v22 = vld [vmem:[#allocation58_spill] sm:$0xff]  ;;  %v8733_v28 = vld [vmem:[#allocation59_spill] sm:$0xff] }
 0x37f   :  { %4713 = vmatprep.subr.bf16.mxu0 %v8723_v29  ;;  %4777 = vmatprep.subr.bf16.mxu1 %v8724_v30  ;;  %v8734_v29 = vld [vmem:[#allocation60_spill] sm:$0xff]  ;;  %v8735_v30 = vld [vmem:[#allocation61_spill] sm:$0xff] }
 0x382   :  { %4715 = vmatpush1.bf16.msra.mxu0 %v8725_v34  ;;  %4779 = vmatpush1.bf16.msra.mxu1 %v8726_v40  ;;  %v8736_v34 = vld [vmem:[#allocation62_spill] sm:$0xff]  ;;  %v8737_v40 = vld [vmem:[#allocation63_spill] sm:$0xff] }
 0x383   :  { %4717 = vmatprep.subr.bf16.mxu0 %v8727_v41  ;;  %4781 = vmatprep.subr.bf16.mxu1 %v8728_v42  ;;  %v8738_v41 = vld [vmem:[#allocation64_spill] sm:$0xff]  ;;  %v8739_v42 = vld [vmem:[#allocation65_spill] sm:$0xff] }
 0x386   :  { %4719 = vmatpush1.bf16.msra.mxu0 %v8729_v47  ;;  %4783 = vmatpush1.bf16.msra.mxu1 %v8730_v59  ;;  %v8740_v47 = vld [vmem:[#allocation66_spill] sm:$0xff]  ;;  %v8741_v59 = vld [vmem:[#allocation67_spill] sm:$0xff] }
 0x387   :  { %4721 = vmatprep.subr.bf16.mxu0 %v8731_v18  ;;  %4785 = vmatprep.subr.bf16.mxu1 %v8732_v22  ;;  %v8742_v18 = vld [vmem:[#allocation68_spill] sm:$0xff]  ;;  %v8743_v22 = vld [vmem:[#allocation69_spill] sm:$0xff] }
 0x38a   :  { %4723 = vmatpush1.bf16.msra.mxu0 %v8733_v28  ;;  %4787 = vmatpush1.bf16.msra.mxu1 %v8734_v29  ;;  %v8744_v28 = vld [vmem:[#allocation70_spill] sm:$0xff]  ;;  %v8745_v29 = vld [vmem:[#allocation71_spill] sm:$0xff] }
 0x38b   :  { %4725 = vmatprep.subr.bf16.mxu0 %v8735_v30  ;;  %4789 = vmatprep.subr.bf16.mxu1 %v8736_v34  ;;  %v8746_v30 = vld [vmem:[#allocation72_spill] sm:$0xff]  ;;  %v8747_v34 = vld [vmem:[#allocation73_spill] sm:$0xff] }
 0x38e   :  { %4727 = vmatpush1.bf16.msra.mxu0 %v8737_v40  ;;  %4791 = vmatpush1.bf16.msra.mxu1 %v8738_v41  ;;  %v8748_v40 = vld [vmem:[#allocation74_spill] sm:$0xff] }
 0x38f   :  { %4729 = vmatprep.subr.bf16.mxu0 %v8739_v42  ;;  %4793 = vmatprep.subr.bf16.mxu1 %v8740_v47 }
 0x392   :  { %4731 = vmatpush1.bf16.msra.mxu0 %v8741_v59  ;;  %4795 = vmatpush1.bf16.msra.mxu1 %v8742_v18 }
 0x393   :  { %4733 = vmatprep.subr.bf16.mxu0 %v8743_v22  ;;  %4797 = vmatprep.subr.bf16.mxu1 %v8744_v28 }
 0x396   :  { %4735 = vmatpush1.bf16.msra.mxu0 %v8745_v29  ;;  %4799 = vmatpush1.bf16.msra.mxu1 %v8746_v30 }
 0x397   :  { %4801 = vmatprep.subr.bf16.mxu0 %v8747_v34  ;;  %4865 = vmatprep.subr.bf16.mxu1 %v8748_v40 }
 0x3ec   :  { %v1724_v41 = vpop.f32.mrb[4].mxu0  ;;  %v1795_v42 = vpop.f32.mrb[4].mxu1 }
 0x3ed   :  { %v5956_v47 = vadd.f32 %v1724_v41, %v8749_v17  ;;  %v1726_v16 = vpop.f32.mrb[5].mxu0  ;;  %v1797_v59 = vpop.f32.mrb[5].mxu1  ;;  %v5972_v30 = vadd.f32 %v1795_v42, %v8658_v56 }
 0x3ee   :  { %v5957_v18 = vadd.f32 %v1726_v16, %v8750_v3  ;;  %v5973_v29 = vadd.f32 %v1797_v59, %v8657_v43 }
 0x3ef   :  { %v3824_v60 = vmul.f32 -1.442695, %v5956_v47 }
 0x3f0   :  { %v3825_v22 = vmul.f32 -1.442695, %v5957_v18  ;;  %v3826_v28 = vmul.f32 -1.442695, %v5973_v29 }
 0x3f1   :  { %6149 = vpow2.f32 %v3824_v60 }
 0x3f2   :  { %6151 = vpow2.f32 %v3825_v22  ;;  %v8751_v22 = vld [vmem:[#allocation75_spill] sm:$0xff] }
 0x3f3   :  { %6153 = vpow2.f32 %v3826_v28 }
 0x3f4   :  { %6155 = vtanh.f32 %v5972_v30 }
 0x3fb   :  { %v6150_v34 = vpop.eup %6149 }
 0x3fc   :  { %v6152_v50 = vpop.eup %6151  ;;  %v1961_v40 = vadd.f32 1.0, %v6150_v34 }
 0x3fd   :  { %v1967_v33 = vadd.f32 1.0, %v6152_v50  ;;  %v6154_v41 = vpop.eup %6153 }
 0x3fe   :  { %6157 = vrcp.f32 %v1961_v40  ;;  %v6156_v17 = vpop.eup %6155  ;;  %v1974_v60 = vadd.f32 1.0, %v6154_v41 }
 0x3ff   :  { %6159 = vrcp.f32 %v1967_v33 }
 0x400   :  { %6161 = vrcp.f32 %v1974_v60 }
 0x408   :  { %v6158_v16 = vpop.eup %6157 }
 0x409   :  { %v6160_v47 = vpop.eup %6159  ;;  %v1978_v18 = vmul.f32 %v6158_v16, %v6156_v17  ;;  %v8753_v17 = vld [vmem:[#allocation142_spill] sm:$0xff] }
 0x40a   :  { %v1977_v3 = vmul.f32 %v6160_v47, %v8751_v22  ;;  %v6162_v29 = vpop.eup %6161 }
 0x40c   :  { %v7391_v59 = vadd.f32 %v1978_v18, %v1977_v3 }
 0x40e   :  { %8752 = vst [vmem:[#allocation76_spill] sm:$0xff] %v7391_v59  ;;  %6163 = vtanh.f32 %v7391_v59 }
 0x418   :  { %v6164_v34 = vpop.eup %6163 }
 0x419   :  { %v7394_v28 = vmul.f32 %v6164_v34, %v6162_v29 }
 0x41b   :  { %3830 = vst [vmem:[%s8125_s4 + $0x20] sm:$0xff] %v7394_v28 }
 0x42c   :  { %v1866_v30 = vpop.f32.mrb[26].mxu0  ;;  %v1937_v40 = vpop.f32.mrb[26].mxu1 }
 0x42d   :  { %v5994_v42 = vadd.f32 %v1866_v30, %v8753_v17  ;;  %v1868_v33 = vpop.f32.mrb[27].mxu0  ;;  %v1939_v50 = vpop.f32.mrb[27].mxu1  ;;  %v6010_v60 = vadd.f32 %v1937_v40, %v7088_v4 }
 0x42e   :  { %v5995_v3 = vadd.f32 %v1868_v33, %v7079_v5  ;;  %v6011_v47 = vadd.f32 %v1939_v50, %v7084_v46 }
 0x42f   :  { %v3827_v41 = vmul.f32 -1.442695, %v5994_v42 }
 0x430   :  { %v3828_v16 = vmul.f32 -1.442695, %v5995_v3  ;;  %v3829_v18 = vmul.f32 -1.442695, %v6011_v47 }
 0x431   :  { %6165 = vpow2.f32 %v3827_v41 }
 0x432   :  { %6167 = vpow2.f32 %v3828_v16 }
 0x433   :  { %6169 = vpow2.f32 %v3829_v18 }
 0x434   :  { %6171 = vtanh.f32 %v6010_v60  ;;  %v8757_v60 = vld [vmem:[#allocation88_spill] sm:$0xff] }
 0x43b   :  { %v6166_v22 = vpop.eup %6165 }
 0x43c   :  { %v6168_v29 = vpop.eup %6167  ;;  %v1985_v34 = vadd.f32 1.0, %v6166_v22  ;;  %v8758_v22 = vld [vmem:[#allocation89_spill] sm:$0xff] }
 0x43d   :  { %v1991_v59 = vadd.f32 1.0, %v6168_v29  ;;  %v6170_v30 = vpop.eup %6169  ;;  %v8759_v29 = vld [vmem:[#allocation90_spill] sm:$0xff] }
 0x43e   :  { %6173 = vrcp.f32 %v1985_v34  ;;  %v6172_v17 = vpop.eup %6171  ;;  %v1998_v41 = vadd.f32 1.0, %v6170_v30  ;;  %v8760_v34 = vld [vmem:[#allocation91_spill] sm:$0xff]  ;;  %v8761_v30 = vld [vmem:[#allocation92_spill] sm:$0xff] }
 0x43f   :  { %6175 = vrcp.f32 %v1991_v59  ;;  %v8755_v59 = vld [vmem:[#allocation86_spill] sm:$0xff] }
 0x440   :  { %6177 = vrcp.f32 %v1998_v41  ;;  %v8765_v41 = vld [vmem:[#allocation96_spill] sm:$0xff] }
 0x448   :  { %v6174_v33 = vpop.eup %6173 }
 0x449   :  { %v6176_v42 = vpop.eup %6175  ;;  %v2002_v3 = vmul.f32 %v6174_v33, %v6172_v17  ;;  %v8756_v17 = vld [vmem:[#allocation87_spill] sm:$0xff]  ;;  %v8762_v33 = vld [vmem:[#allocation93_spill] sm:$0xff] }
 0x44a   :  { %v2001_v16 = vmul.f32 %v6176_v42, %v7248_v12  ;;  %v6178_v40 = vpop.eup %6177  ;;  %v8754_v12 = vld [vmem:[#allocation85_spill] sm:$0xff]  ;;  %v8763_v42 = vld [vmem:[#allocation94_spill] sm:$0xff] }
 0x44c   :  { %v7405_v50 = vadd.f32 %v2002_v3, %v2001_v16  ;;  %v8764_v3 = vld [vmem:[#allocation95_spill] sm:$0xff]  ;;  %v8766_v16 = vld [vmem:[#allocation97_spill] sm:$0xff] }
 0x44e   :  { %6179 = vtanh.f32 %v7405_v50 }
 0x458   :  { %v6180_v47 = vpop.eup %6179 }
 0x459   :  { %v2005_v18 = vmul.f32 %v6180_v47, %v6178_v40  ;;  %v8767_v40 = vld [vmem:[#allocation98_spill] sm:$0xff]  ;;  %v8768_v47 = vld [vmem:[#allocation99_spill] sm:$0xff] }
 0x45b   :  { %3831 = vst [vmem:[%s8125_s4 + $0x28] sm:$0xff] %v2005_v18  ;;  %2073 = vmatprep.mubr.f32.mxu0 %v2005_v18  ;;  %2144 = vmatprep.mubr.f32.mxu1 %v2005_v18 }
 0x45c   :  { %2074 = vmatmul.mubr.f32.vlgmr.msra.gmra.mrb[6].mxu0 %v7394_v28  ;;  %2145 = vmatmul.mubr.f32.vlgmr.msra.gmra.mrb[6].mxu1 %v7394_v28 }
 0x45d   :  { %4803 = vmatpush1.bf16.msra.mxu0 %v8570_v62  ;;  %4867 = vmatpush1.bf16.msra.mxu1 %v8571_v61 }
 0x45e   :  { %2215 = vmatprep.mubr.f32.mxu0 %v2005_v18  ;;  %2286 = vmatprep.mubr.f32.mxu1 %v2005_v18  ;;  %v8769_v18 = vld [vmem:[#allocation100_spill] sm:$0xff] }
 0x45f   :  { %4805 = vmatprep.subr.bf16.mxu0 %v8572_v31  ;;  %4869 = vmatprep.subr.bf16.mxu1 %v8573_v19 }
 0x461   :  { %4807 = vmatpush1.bf16.msra.mxu0 %v8574_v1  ;;  %4871 = vmatpush1.bf16.msra.mxu1 %v8662_v7 }
 0x462   :  { %4809 = vmatprep.subr.bf16.mxu0 %v8663_v32  ;;  %4873 = vmatprep.subr.bf16.mxu1 %v8664_v54 }
 0x465   :  { %4811 = vmatpush1.bf16.msra.mxu0 %v8665_v8  ;;  %4875 = vmatpush1.bf16.msra.mxu1 %v8666_v39 }
 0x466   :  { %4813 = vmatprep.subr.bf16.mxu0 %v8754_v12  ;;  %4877 = vmatprep.subr.bf16.mxu1 %v8755_v59 }
 0x469   :  { %4815 = vmatpush1.bf16.msra.mxu0 %v8756_v17  ;;  %4879 = vmatpush1.bf16.msra.mxu1 %v8757_v60 }
 0x46a   :  { %4817 = vmatprep.subr.bf16.mxu0 %v8758_v22  ;;  %4881 = vmatprep.subr.bf16.mxu1 %v8759_v29  ;;  %v8770_v29 = vld [vmem:[#allocation101_spill] sm:$0xff] }
 0x46d   :  { %4819 = vmatpush1.bf16.msra.mxu0 %v8760_v34  ;;  %4883 = vmatpush1.bf16.msra.mxu1 %v8761_v30  ;;  %v8771_v34 = vld [vmem:[#allocation102_spill] sm:$0xff] }
 0x46e   :  { %4821 = vmatprep.subr.bf16.mxu0 %v8762_v33  ;;  %4885 = vmatprep.subr.bf16.mxu1 %v8763_v42  ;;  %v8772_v33 = vld [vmem:[#allocation104_spill] sm:$0xff] }
 0x471   :  { %4823 = vmatpush1.bf16.msra.mxu0 %v8764_v3  ;;  %4887 = vmatpush1.bf16.msra.mxu1 %v8765_v41 }
 0x472   :  { %4825 = vmatprep.subr.bf16.mxu0 %v8766_v16  ;;  %4889 = vmatprep.subr.bf16.mxu1 %v8767_v40 }
 0x475   :  { %4827 = vmatpush1.bf16.msra.mxu0 %v8768_v47  ;;  %4891 = vmatpush1.bf16.msra.mxu1 %v8769_v18 }
 0x476   :  { %4829 = vmatprep.subr.bf16.mxu0 %v8770_v29  ;;  %4893 = vmatprep.subr.bf16.mxu1 %v8771_v34 }
 0x479   :  { %4831 = vmatpush1.bf16.msra.mxu0 %v8685_v10  ;;  %4895 = vmatpush1.bf16.msra.mxu1 %v8772_v33 }
 0x47a   :  { %4833 = vmatprep.subr.bf16.mxu0 %v8687_v25  ;;  %4897 = vmatprep.subr.bf16.mxu1 %v8688_v38 }
 0x47d   :  { %4835 = vmatpush1.bf16.msra.mxu0 %v8689_v24  ;;  %4899 = vmatpush1.bf16.msra.mxu1 %v8690_v49 }
 0x47e   :  { %4837 = vmatprep.subr.bf16.mxu0 %v8691_v52  ;;  %4901 = vmatprep.subr.bf16.mxu1 %v8692_v58 }
 0x481   :  { %4839 = vmatpush1.bf16.msra.mxu0 %v8693_v14  ;;  %4903 = vmatpush1.bf16.msra.mxu1 %v8694_v9 }
 0x482   :  { %4841 = vmatprep.subr.bf16.mxu0 %v8695_v23  ;;  %4905 = vmatprep.subr.bf16.mxu1 %v8609_v35 }
 0x485   :  { %4843 = vmatpush1.bf16.msra.mxu0 %v8696_v53  ;;  %4907 = vmatpush1.bf16.msra.mxu1 %v8611_v13 }
 0x486   :  { %4845 = vmatprep.subr.bf16.mxu0 %v8612_v21  ;;  %4909 = vmatprep.subr.bf16.mxu1 %v8613_v45 }
 0x489   :  { %4847 = vmatpush1.bf16.msra.mxu0 %v8614_v36  ;;  %4911 = vmatpush1.bf16.msra.mxu1 %v8615_v37 }
 0x48a   :  { %4849 = vmatprep.subr.bf16.mxu0 %v8616_v44  ;;  %4913 = vmatprep.subr.bf16.mxu1 %v8617_v2  ;;  %v8842_v2 = vld [vmem:[#allocation138_spill] sm:$0xff] }
 0x48d   :  { %4851 = vmatpush1.bf16.msra.mxu0 %v8618_v20  ;;  %4915 = vmatpush1.bf16.msra.mxu1 %v8619_v51  ;;  %v8773_v51 = vld [vmem:[#allocation135_spill] sm:$0xff] }
 0x48e   :  { %4853 = vmatprep.subr.bf16.mxu0 %v6938_v27  ;;  %4917 = vmatprep.subr.bf16.mxu1 %v8620_v63  ;;  %v8774_v27 = vld [vmem:[#allocation136_spill] sm:$0xff]  ;;  %v8775_v63 = vld [vmem:[#allocation9_spill] sm:$0xff] }
 0x491   :  { %4855 = vmatpush1.bf16.msra.mxu0 %v6944_v57  ;;  %4919 = vmatpush1.bf16.msra.mxu1 %v6948_v11  ;;  %v8776_v57 = vld [vmem:[#allocation10_spill] sm:$0xff]  ;;  %v8841_v11 = vld [vmem:[#allocation137_spill] sm:$0xff] }
 0x492   :  { %4857 = vmatprep.subr.bf16.mxu0 %v6950_v15  ;;  %4921 = vmatprep.subr.bf16.mxu1 %v6953_v0  ;;  %v8777_v0 = vld [vmem:[#allocation11_spill] sm:$0xff]  ;;  %v8786_v15 = vld [vmem:[#allocation20_spill] sm:$0xff] }
 0x495   :  { %4859 = vmatpush1.bf16.msra.mxu0 %v6956_v26  ;;  %4923 = vmatpush1.bf16.msra.mxu1 %v6960_v48  ;;  %v8778_v26 = vld [vmem:[#allocation12_spill] sm:$0xff]  ;;  %v8779_v48 = vld [vmem:[#allocation13_spill] sm:$0xff] }
 0x496   :  { %4861 = vmatprep.subr.bf16.mxu0 %v6962_v55  ;;  %4925 = vmatprep.subr.bf16.mxu1 %v6965_v6  ;;  %v8780_v55 = vld [vmem:[#allocation14_spill] sm:$0xff]  ;;  %v8781_v6 = vld [vmem:[#allocation15_spill] sm:$0xff] }
 0x499   :  { %4863 = vmatpush1.bf16.msra.mxu0 %v8773_v51  ;;  %4927 = vmatpush1.bf16.msra.mxu1 %v8774_v27  ;;  %v8782_v51 = vld [vmem:[#allocation16_spill] sm:$0xff]  ;;  %v8783_v27 = vld [vmem:[#allocation17_spill] sm:$0xff] }
 0x49a   :  { %4929 = vmatprep.subr.bf16.mxu0 %v8775_v63  ;;  %4993 = vmatprep.subr.bf16.mxu1 %v8776_v57  ;;  %v8784_v63 = vld [vmem:[#allocation18_spill] sm:$0xff]  ;;  %v8785_v57 = vld [vmem:[#allocation19_spill] sm:$0xff] }
 0x49c   :  { %2216 = vmatmul.mubr.f32.vlgmr.msra.gmra.mrb[24].mxu0 %v7394_v28  ;;  %2287 = vmatmul.mubr.f32.vlgmr.msra.gmra.mrb[24].mxu1 %v7394_v28  ;;  %v8787_v28 = vld [vmem:[#allocation21_spill] sm:$0xff] }
 0x49d   :  { %4931 = vmatpush1.bf16.msra.mxu0 %v8777_v0  ;;  %4995 = vmatpush1.bf16.msra.mxu1 %v8778_v26  ;;  %v8788_v0 = vld [vmem:[#allocation22_spill] sm:$0xff]  ;;  %v8789_v26 = vld [vmem:[#allocation23_spill] sm:$0xff] }
 0x49e   :  { %4933 = vmatprep.subr.bf16.mxu0 %v8779_v48  ;;  %4997 = vmatprep.subr.bf16.mxu1 %v8780_v55  ;;  %v8790_v48 = vld [vmem:[#allocation24_spill] sm:$0xff]  ;;  %v8791_v55 = vld [vmem:[#allocation25_spill] sm:$0xff] }
 0x4a1   :  { %4935 = vmatpush1.bf16.msra.mxu0 %v8781_v6  ;;  %4999 = vmatpush1.bf16.msra.mxu1 %v8782_v51  ;;  %v8792_v6 = vld [vmem:[#allocation26_spill] sm:$0xff]  ;;  %v8793_v51 = vld [vmem:[#allocation27_spill] sm:$0xff] }
 0x4a2   :  { %4937 = vmatprep.subr.bf16.mxu0 %v8783_v27  ;;  %5001 = vmatprep.subr.bf16.mxu1 %v8784_v63  ;;  %v8794_v27 = vld [vmem:[#allocation28_spill] sm:$0xff]  ;;  %v8795_v63 = vld [vmem:[#allocation29_spill] sm:$0xff] }
 0x4a5   :  { %4939 = vmatpush1.bf16.msra.mxu0 %v8785_v57  ;;  %5003 = vmatpush1.bf16.msra.mxu1 %v8786_v15  ;;  %v8796_v57 = vld [vmem:[#allocation30_spill] sm:$0xff]  ;;  %v8797_v15 = vld [vmem:[#allocation31_spill] sm:$0xff] }
 0x4a6   :  { %4941 = vmatprep.subr.bf16.mxu0 %v8787_v28  ;;  %5005 = vmatprep.subr.bf16.mxu1 %v8788_v0  ;;  %v8798_v28 = vld [vmem:[#allocation32_spill] sm:$0xff]  ;;  %v8799_v0 = vld [vmem:[#allocation33_spill] sm:$0xff] }
 0x4a9   :  { %4943 = vmatpush1.bf16.msra.mxu0 %v8789_v26  ;;  %5007 = vmatpush1.bf16.msra.mxu1 %v8790_v48  ;;  %v8800_v26 = vld [vmem:[#allocation34_spill] sm:$0xff]  ;;  %v8801_v48 = vld [vmem:[#allocation35_spill] sm:$0xff] }
 0x4aa   :  { %4945 = vmatprep.subr.bf16.mxu0 %v8791_v55  ;;  %5009 = vmatprep.subr.bf16.mxu1 %v8792_v6  ;;  %v8802_v55 = vld [vmem:[#allocation36_spill] sm:$0xff]  ;;  %v8803_v6 = vld [vmem:[#allocation37_spill] sm:$0xff] }
 0x4ad   :  { %4947 = vmatpush1.bf16.msra.mxu0 %v8793_v51  ;;  %5011 = vmatpush1.bf16.msra.mxu1 %v8794_v27  ;;  %v8804_v51 = vld [vmem:[#allocation38_spill] sm:$0xff]  ;;  %v8805_v27 = vld [vmem:[#allocation39_spill] sm:$0xff] }
 0x4ae   :  { %4949 = vmatprep.subr.bf16.mxu0 %v8795_v63  ;;  %5013 = vmatprep.subr.bf16.mxu1 %v8796_v57  ;;  %v8806_v63 = vld [vmem:[#allocation40_spill] sm:$0xff]  ;;  %v8807_v57 = vld [vmem:[#allocation41_spill] sm:$0xff] }
 0x4b1   :  { %4951 = vmatpush1.bf16.msra.mxu0 %v8797_v15  ;;  %5015 = vmatpush1.bf16.msra.mxu1 %v8798_v28  ;;  %v8808_v15 = vld [vmem:[#allocation42_spill] sm:$0xff]  ;;  %v8809_v28 = vld [vmem:[#allocation43_spill] sm:$0xff] }
 0x4b2   :  { %4953 = vmatprep.subr.bf16.mxu0 %v8799_v0  ;;  %5017 = vmatprep.subr.bf16.mxu1 %v8800_v26  ;;  %v8810_v0 = vld [vmem:[#allocation44_spill] sm:$0xff]  ;;  %v8811_v26 = vld [vmem:[#allocation45_spill] sm:$0xff] }
 0x4b5   :  { %4955 = vmatpush1.bf16.msra.mxu0 %v8801_v48  ;;  %5019 = vmatpush1.bf16.msra.mxu1 %v8802_v55  ;;  %v8812_v48 = vld [vmem:[#allocation46_spill] sm:$0xff]  ;;  %v8813_v55 = vld [vmem:[#allocation47_spill] sm:$0xff] }
 0x4b6   :  { %4957 = vmatprep.subr.bf16.mxu0 %v8803_v6  ;;  %5021 = vmatprep.subr.bf16.mxu1 %v8804_v51  ;;  %v8814_v6 = vld [vmem:[#allocation48_spill] sm:$0xff]  ;;  %v8815_v51 = vld [vmem:[#allocation49_spill] sm:$0xff] }
 0x4b9   :  { %4959 = vmatpush1.bf16.msra.mxu0 %v8805_v27  ;;  %5023 = vmatpush1.bf16.msra.mxu1 %v8806_v63  ;;  %v8816_v27 = vld [vmem:[#allocation50_spill] sm:$0xff]  ;;  %v8817_v63 = vld [vmem:[#allocation51_spill] sm:$0xff] }
 0x4ba   :  { %4961 = vmatprep.subr.bf16.mxu0 %v8807_v57  ;;  %5025 = vmatprep.subr.bf16.mxu1 %v8808_v15  ;;  %v8818_v57 = vld [vmem:[#allocation52_spill] sm:$0xff]  ;;  %v8819_v15 = vld [vmem:[#allocation53_spill] sm:$0xff] }
 0x4bd   :  { %4963 = vmatpush1.bf16.msra.mxu0 %v8809_v28  ;;  %5027 = vmatpush1.bf16.msra.mxu1 %v8810_v0  ;;  %v8820_v28 = vld [vmem:[#allocation54_spill] sm:$0xff]  ;;  %v8821_v0 = vld [vmem:[#allocation55_spill] sm:$0xff] }
 0x4be   :  { %4965 = vmatprep.subr.bf16.mxu0 %v8811_v26  ;;  %5029 = vmatprep.subr.bf16.mxu1 %v8812_v48  ;;  %v8822_v26 = vld [vmem:[#allocation56_spill] sm:$0xff]  ;;  %v8823_v48 = vld [vmem:[#allocation57_spill] sm:$0xff] }
 0x4c1   :  { %4967 = vmatpush1.bf16.msra.mxu0 %v8813_v55  ;;  %5031 = vmatpush1.bf16.msra.mxu1 %v8814_v6  ;;  %v8824_v55 = vld [vmem:[#allocation58_spill] sm:$0xff]  ;;  %v8825_v6 = vld [vmem:[#allocation59_spill] sm:$0xff] }
 0x4c2   :  { %4969 = vmatprep.subr.bf16.mxu0 %v8815_v51  ;;  %5033 = vmatprep.subr.bf16.mxu1 %v8816_v27  ;;  %v8826_v51 = vld [vmem:[#allocation60_spill] sm:$0xff]  ;;  %v8827_v27 = vld [vmem:[#allocation61_spill] sm:$0xff] }
 0x4c5   :  { %4971 = vmatpush1.bf16.msra.mxu0 %v8817_v63  ;;  %5035 = vmatpush1.bf16.msra.mxu1 %v8818_v57  ;;  %v8828_v63 = vld [vmem:[#allocation62_spill] sm:$0xff]  ;;  %v8829_v57 = vld [vmem:[#allocation63_spill] sm:$0xff] }
 0x4c6   :  { %4973 = vmatprep.subr.bf16.mxu0 %v8819_v15  ;;  %5037 = vmatprep.subr.bf16.mxu1 %v8820_v28  ;;  %v8830_v15 = vld [vmem:[#allocation64_spill] sm:$0xff]  ;;  %v8831_v28 = vld [vmem:[#allocation65_spill] sm:$0xff] }
 0x4c9   :  { %4975 = vmatpush1.bf16.msra.mxu0 %v8821_v0  ;;  %5039 = vmatpush1.bf16.msra.mxu1 %v8822_v26  ;;  %v8832_v0 = vld [vmem:[#allocation66_spill] sm:$0xff]  ;;  %v8833_v26 = vld [vmem:[#allocation67_spill] sm:$0xff] }
 0x4ca   :  { %4977 = vmatprep.subr.bf16.mxu0 %v8823_v48  ;;  %5041 = vmatprep.subr.bf16.mxu1 %v8824_v55  ;;  %v8834_v48 = vld [vmem:[#allocation68_spill] sm:$0xff]  ;;  %v8835_v55 = vld [vmem:[#allocation69_spill] sm:$0xff] }
 0x4cd   :  { %4979 = vmatpush1.bf16.msra.mxu0 %v8825_v6  ;;  %5043 = vmatpush1.bf16.msra.mxu1 %v8826_v51  ;;  %v8836_v6 = vld [vmem:[#allocation70_spill] sm:$0xff]  ;;  %v8837_v51 = vld [vmem:[#allocation71_spill] sm:$0xff] }
 0x4ce   :  { %4981 = vmatprep.subr.bf16.mxu0 %v8827_v27  ;;  %5045 = vmatprep.subr.bf16.mxu1 %v8828_v63  ;;  %v8838_v27 = vld [vmem:[#allocation72_spill] sm:$0xff]  ;;  %v8839_v63 = vld [vmem:[#allocation73_spill] sm:$0xff] }
 0x4d1   :  { %4983 = vmatpush1.bf16.msra.mxu0 %v8829_v57  ;;  %5047 = vmatpush1.bf16.msra.mxu1 %v8830_v15  ;;  %v8840_v57 = vld [vmem:[#allocation74_spill] sm:$0xff] }
 0x4d2   :  { %4985 = vmatprep.subr.bf16.mxu0 %v8831_v28  ;;  %5049 = vmatprep.subr.bf16.mxu1 %v8832_v0 }
 0x4d5   :  { %4987 = vmatpush1.bf16.msra.mxu0 %v8833_v26  ;;  %5051 = vmatpush1.bf16.msra.mxu1 %v8834_v48 }
 0x4d6   :  { %4989 = vmatprep.subr.bf16.mxu0 %v8835_v55  ;;  %5053 = vmatprep.subr.bf16.mxu1 %v8836_v6 }
 0x4d9   :  { %4991 = vmatpush1.bf16.msra.mxu0 %v8837_v51  ;;  %5055 = vmatpush1.bf16.msra.mxu1 %v8838_v27 }
 0x4da   :  { %5057 = vmatprep.subr.bf16.mxu0 %v8839_v63  ;;  %5121 = vmatprep.subr.bf16.mxu1 %v8840_v57 }
 0x52f   :  { %v2075_v15 = vpop.f32.mrb[6].mxu0  ;;  %v2146_v28 = vpop.f32.mrb[6].mxu1 }
 0x530   :  { %v5958_v0 = vadd.f32 %v2075_v15, %v8841_v11  ;;  %v2077_v20 = vpop.f32.mrb[7].mxu0  ;;  %v2148_v26 = vpop.f32.mrb[7].mxu1  ;;  %v5974_v27 = vadd.f32 %v2146_v28, %v8658_v56 }
 0x531   :  { %v5959_v48 = vadd.f32 %v2077_v20, %v8842_v2  ;;  %v5975_v51 = vadd.f32 %v2148_v26, %v8657_v43 }
 0x532   :  { %v3832_v44 = vmul.f32 -1.442695, %v5958_v0 }
 0x533   :  { %v3833_v55 = vmul.f32 -1.442695, %v5959_v48  ;;  %v3834_v6 = vmul.f32 -1.442695, %v5975_v51 }
 0x534   :  { %6181 = vpow2.f32 %v3832_v44 }
 0x535   :  { %6183 = vpow2.f32 %v3833_v55  ;;  %v8843_v55 = vld [vmem:[#allocation76_spill] sm:$0xff] }
 0x536   :  { %6185 = vpow2.f32 %v3834_v6 }
 0x537   :  { %6187 = vtanh.f32 %v5974_v27 }
 0x53e   :  { %v6182_v63 = vpop.eup %6181 }
 0x53f   :  { %v6184_v37 = vpop.eup %6183  ;;  %v2312_v57 = vadd.f32 1.0, %v6182_v63 }
 0x540   :  { %v2318_v36 = vadd.f32 1.0, %v6184_v37  ;;  %v6186_v15 = vpop.eup %6185 }
 0x541   :  { %6189 = vrcp.f32 %v2312_v57  ;;  %v6188_v11 = vpop.eup %6187  ;;  %v2325_v44 = vadd.f32 1.0, %v6186_v15 }
 0x542   :  { %6191 = vrcp.f32 %v2318_v36 }
 0x543   :  { %6193 = vrcp.f32 %v2325_v44 }
 0x54b   :  { %v6190_v20 = vpop.eup %6189 }
 0x54c   :  { %v6192_v0 = vpop.eup %6191  ;;  %v2329_v48 = vmul.f32 %v6190_v20, %v6188_v11  ;;  %v8845_v11 = vld [vmem:[#allocation142_spill] sm:$0xff] }
 0x54d   :  { %v2328_v2 = vmul.f32 %v6192_v0, %v8843_v55  ;;  %v6194_v51 = vpop.eup %6193 }
 0x54f   :  { %v7548_v26 = vadd.f32 %v2329_v48, %v2328_v2 }
 0x551   :  { %8844 = vst [vmem:[#allocation77_spill] sm:$0xff] %v7548_v26  ;;  %6195 = vtanh.f32 %v7548_v26 }
 0x55b   :  { %v6196_v63 = vpop.eup %6195 }
 0x55c   :  { %v7551_v6 = vmul.f32 %v6196_v63, %v6194_v51 }
 0x55e   :  { %3838 = vst [vmem:[%s8125_s4 + $0x30] sm:$0xff] %v7551_v6 }
 0x56f   :  { %v2217_v57 = vpop.f32.mrb[24].mxu0  ;;  %v2288_v27 = vpop.f32.mrb[24].mxu1 }
 0x570   :  { %v5992_v36 = vadd.f32 %v2217_v57, %v8845_v11  ;;  %v2219_v37 = vpop.f32.mrb[25].mxu0  ;;  %v2290_v28 = vpop.f32.mrb[25].mxu1  ;;  %v6008_v44 = vadd.f32 %v2288_v27, %v7088_v4 }
 0x571   :  { %v5993_v2 = vadd.f32 %v2219_v37, %v7079_v5  ;;  %v6009_v0 = vadd.f32 %v2290_v28, %v7084_v46 }
 0x572   :  { %v3835_v15 = vmul.f32 -1.442695, %v5992_v36 }
 0x573   :  { %v3836_v20 = vmul.f32 -1.442695, %v5993_v2  ;;  %v3837_v48 = vmul.f32 -1.442695, %v6009_v0 }
 0x574   :  { %6197 = vpow2.f32 %v3835_v15 }
 0x575   :  { %6199 = vpow2.f32 %v3836_v20 }
 0x576   :  { %6201 = vpow2.f32 %v3837_v48 }
 0x577   :  { %6203 = vtanh.f32 %v6008_v44  ;;  %v8849_v44 = vld [vmem:[#allocation119_spill] sm:$0xff] }
 0x57e   :  { %v6198_v55 = vpop.eup %6197 }
 0x57f   :  { %v6200_v51 = vpop.eup %6199  ;;  %v2336_v63 = vadd.f32 1.0, %v6198_v55  ;;  %v8850_v55 = vld [vmem:[#allocation120_spill] sm:$0xff] }
 0x580   :  { %v2342_v26 = vadd.f32 1.0, %v6200_v51  ;;  %v6202_v57 = vpop.eup %6201  ;;  %v8851_v51 = vld [vmem:[#allocation121_spill] sm:$0xff] }
 0x581   :  { %6205 = vrcp.f32 %v2336_v63  ;;  %v6204_v11 = vpop.eup %6203  ;;  %v2349_v15 = vadd.f32 1.0, %v6202_v57  ;;  %v8852_v63 = vld [vmem:[#allocation122_spill] sm:$0xff]  ;;  %v8853_v57 = vld [vmem:[#allocation123_spill] sm:$0xff] }
 0x582   :  { %6207 = vrcp.f32 %v2342_v26  ;;  %v8847_v26 = vld [vmem:[#allocation91_spill] sm:$0xff] }
 0x583   :  { %6209 = vrcp.f32 %v2349_v15  ;;  %v8857_v15 = vld [vmem:[#allocation127_spill] sm:$0xff] }
 0x58b   :  { %v6206_v37 = vpop.eup %6205 }
 0x58c   :  { %v6208_v36 = vpop.eup %6207  ;;  %v2353_v2 = vmul.f32 %v6206_v37, %v6204_v11  ;;  %v8848_v11 = vld [vmem:[#allocation93_spill] sm:$0xff]  ;;  %v8854_v37 = vld [vmem:[#allocation124_spill] sm:$0xff] }
 0x58d   :  { %v2352_v20 = vmul.f32 %v6208_v36, %v7405_v50  ;;  %v6210_v27 = vpop.eup %6209  ;;  %v8846_v50 = vld [vmem:[#allocation90_spill] sm:$0xff]  ;;  %v8855_v36 = vld [vmem:[#allocation125_spill] sm:$0xff] }
 0x58f   :  { %v7562_v28 = vadd.f32 %v2353_v2, %v2352_v20  ;;  %v8856_v2 = vld [vmem:[#allocation126_spill] sm:$0xff]  ;;  %v8858_v20 = vld [vmem:[#allocation128_spill] sm:$0xff] }
 0x591   :  { %6211 = vtanh.f32 %v7562_v28 }
 0x59b   :  { %v6212_v0 = vpop.eup %6211 }
 0x59c   :  { %v2356_v48 = vmul.f32 %v6212_v0, %v6210_v27  ;;  %v8859_v27 = vld [vmem:[#allocation129_spill] sm:$0xff]  ;;  %v8860_v0 = vld [vmem:[#allocation130_spill] sm:$0xff] }
 0x59e   :  { %3839 = vst [vmem:[%s8125_s4 + $0x38] sm:$0xff] %v2356_v48  ;;  %2424 = vmatprep.mubr.f32.mxu0 %v2356_v48  ;;  %2495 = vmatprep.mubr.f32.mxu1 %v2356_v48 }
 0x59f   :  { %2425 = vmatmul.mubr.f32.vlgmr.msra.gmra.mrb[8].mxu0 %v7551_v6  ;;  %2496 = vmatmul.mubr.f32.vlgmr.msra.gmra.mrb[8].mxu1 %v7551_v6 }
 0x5a0   :  { %5059 = vmatpush1.bf16.msra.mxu0 %v8570_v62  ;;  %5123 = vmatpush1.bf16.msra.mxu1 %v8571_v61 }
 0x5a1   :  { %2566 = vmatprep.mubr.f32.mxu0 %v2356_v48  ;;  %2637 = vmatprep.mubr.f32.mxu1 %v2356_v48  ;;  %v8861_v48 = vld [vmem:[#allocation131_spill] sm:$0xff] }
 0x5a2   :  { %5061 = vmatprep.subr.bf16.mxu0 %v8572_v31  ;;  %5125 = vmatprep.subr.bf16.mxu1 %v8573_v19 }
 0x5a4   :  { %5063 = vmatpush1.bf16.msra.mxu0 %v8574_v1  ;;  %5127 = vmatpush1.bf16.msra.mxu1 %v8662_v7 }
 0x5a5   :  { %5065 = vmatprep.subr.bf16.mxu0 %v8663_v32  ;;  %5129 = vmatprep.subr.bf16.mxu1 %v8664_v54 }
 0x5a8   :  { %5067 = vmatpush1.bf16.msra.mxu0 %v8665_v8  ;;  %5131 = vmatpush1.bf16.msra.mxu1 %v8666_v39 }
 0x5a9   :  { %5069 = vmatprep.subr.bf16.mxu0 %v8754_v12  ;;  %5133 = vmatprep.subr.bf16.mxu1 %v8755_v59 }
 0x5ac   :  { %5071 = vmatpush1.bf16.msra.mxu0 %v8756_v17  ;;  %5135 = vmatpush1.bf16.msra.mxu1 %v8757_v60 }
 0x5ad   :  { %5073 = vmatprep.subr.bf16.mxu0 %v8758_v22  ;;  %5137 = vmatprep.subr.bf16.mxu1 %v8846_v50 }
 0x5b0   :  { %5075 = vmatpush1.bf16.msra.mxu0 %v8847_v26  ;;  %5139 = vmatpush1.bf16.msra.mxu1 %v8761_v30 }
 0x5b1   :  { %5077 = vmatprep.subr.bf16.mxu0 %v8848_v11  ;;  %5141 = vmatprep.subr.bf16.mxu1 %v8763_v42 }
 0x5b4   :  { %5079 = vmatpush1.bf16.msra.mxu0 %v8764_v3  ;;  %5143 = vmatpush1.bf16.msra.mxu1 %v8765_v41 }
 0x5b5   :  { %5081 = vmatprep.subr.bf16.mxu0 %v8766_v16  ;;  %5145 = vmatprep.subr.bf16.mxu1 %v8767_v40 }
 0x5b8   :  { %5083 = vmatpush1.bf16.msra.mxu0 %v8768_v47  ;;  %5147 = vmatpush1.bf16.msra.mxu1 %v8769_v18 }
 0x5b9   :  { %5085 = vmatprep.subr.bf16.mxu0 %v8770_v29  ;;  %5149 = vmatprep.subr.bf16.mxu1 %v8771_v34 }
 0x5bc   :  { %5087 = vmatpush1.bf16.msra.mxu0 %v8685_v10  ;;  %5151 = vmatpush1.bf16.msra.mxu1 %v8772_v33 }
 0x5bd   :  { %5089 = vmatprep.subr.bf16.mxu0 %v8687_v25  ;;  %5153 = vmatprep.subr.bf16.mxu1 %v8688_v38 }
 0x5c0   :  { %5091 = vmatpush1.bf16.msra.mxu0 %v8689_v24  ;;  %5155 = vmatpush1.bf16.msra.mxu1 %v8690_v49 }
 0x5c1   :  { %5093 = vmatprep.subr.bf16.mxu0 %v8691_v52  ;;  %5157 = vmatprep.subr.bf16.mxu1 %v8692_v58 }
 0x5c4   :  { %5095 = vmatpush1.bf16.msra.mxu0 %v8693_v14  ;;  %5159 = vmatpush1.bf16.msra.mxu1 %v8694_v9 }
 0x5c5   :  { %5097 = vmatprep.subr.bf16.mxu0 %v8695_v23  ;;  %5161 = vmatprep.subr.bf16.mxu1 %v8609_v35 }
 0x5c8   :  { %5099 = vmatpush1.bf16.msra.mxu0 %v8696_v53  ;;  %5163 = vmatpush1.bf16.msra.mxu1 %v8611_v13 }
 0x5c9   :  { %5101 = vmatprep.subr.bf16.mxu0 %v8612_v21  ;;  %5165 = vmatprep.subr.bf16.mxu1 %v8613_v45 }
 0x5cc   :  { %5103 = vmatpush1.bf16.msra.mxu0 %v8849_v44  ;;  %5167 = vmatpush1.bf16.msra.mxu1 %v8850_v55  ;;  %v8934_v44 = vld [vmem:[#allocation138_spill] sm:$0xff] }
 0x5cd   :  { %5105 = vmatprep.subr.bf16.mxu0 %v8851_v51  ;;  %5169 = vmatprep.subr.bf16.mxu1 %v8852_v63  ;;  %v8862_v51 = vld [vmem:[#allocation132_spill] sm:$0xff]  ;;  %v8863_v63 = vld [vmem:[#allocation133_spill] sm:$0xff] }
 0x5d0   :  { %5107 = vmatpush1.bf16.msra.mxu0 %v8853_v57  ;;  %5171 = vmatpush1.bf16.msra.mxu1 %v8854_v37  ;;  %v8864_v57 = vld [vmem:[#allocation134_spill] sm:$0xff]  ;;  %v8865_v37 = vld [vmem:[#allocation135_spill] sm:$0xff] }
 0x5d1   :  { %5109 = vmatprep.subr.bf16.mxu0 %v8855_v36  ;;  %5173 = vmatprep.subr.bf16.mxu1 %v8856_v2  ;;  %v8866_v36 = vld [vmem:[#allocation136_spill] sm:$0xff]  ;;  %v8867_v2 = vld [vmem:[#allocation9_spill] sm:$0xff] }
 0x5d4   :  { %5111 = vmatpush1.bf16.msra.mxu0 %v8857_v15  ;;  %5175 = vmatpush1.bf16.msra.mxu1 %v8858_v20  ;;  %v8868_v15 = vld [vmem:[#allocation10_spill] sm:$0xff]  ;;  %v8933_v20 = vld [vmem:[#allocation137_spill] sm:$0xff] }
 0x5d5   :  { %5113 = vmatprep.subr.bf16.mxu0 %v8859_v27  ;;  %5177 = vmatprep.subr.bf16.mxu1 %v8860_v0  ;;  %v8869_v0 = vld [vmem:[#allocation11_spill] sm:$0xff]  ;;  %v8878_v27 = vld [vmem:[#allocation20_spill] sm:$0xff] }
 0x5d8   :  { %5115 = vmatpush1.bf16.msra.mxu0 %v8861_v48  ;;  %5179 = vmatpush1.bf16.msra.mxu1 %v8862_v51  ;;  %v8870_v48 = vld [vmem:[#allocation12_spill] sm:$0xff]  ;;  %v8871_v51 = vld [vmem:[#allocation13_spill] sm:$0xff] }
 0x5d9   :  { %5117 = vmatprep.subr.bf16.mxu0 %v8863_v63  ;;  %5181 = vmatprep.subr.bf16.mxu1 %v8864_v57  ;;  %v8872_v63 = vld [vmem:[#allocation14_spill] sm:$0xff]  ;;  %v8873_v57 = vld [vmem:[#allocation15_spill] sm:$0xff] }
 0x5dc   :  { %5119 = vmatpush1.bf16.msra.mxu0 %v8865_v37  ;;  %5183 = vmatpush1.bf16.msra.mxu1 %v8866_v36  ;;  %v8874_v37 = vld [vmem:[#allocation16_spill] sm:$0xff]  ;;  %v8875_v36 = vld [vmem:[#allocation17_spill] sm:$0xff] }
 0x5dd   :  { %5185 = vmatprep.subr.bf16.mxu0 %v8867_v2  ;;  %5249 = vmatprep.subr.bf16.mxu1 %v8868_v15  ;;  %v8876_v2 = vld [vmem:[#allocation18_spill] sm:$0xff]  ;;  %v8877_v15 = vld [vmem:[#allocation19_spill] sm:$0xff] }
 0x5df   :  { %2567 = vmatmul.mubr.f32.vlgmr.msra.gmra.mrb[22].mxu0 %v7551_v6  ;;  %2638 = vmatmul.mubr.f32.vlgmr.msra.gmra.mrb[22].mxu1 %v7551_v6  ;;  %v8879_v6 = vld [vmem:[#allocation21_spill] sm:$0xff] }
 0x5e0   :  { %5187 = vmatpush1.bf16.msra.mxu0 %v8869_v0  ;;  %5251 = vmatpush1.bf16.msra.mxu1 %v8870_v48  ;;  %v8880_v0 = vld [vmem:[#allocation22_spill] sm:$0xff]  ;;  %v8881_v48 = vld [vmem:[#allocation23_spill] sm:$0xff] }
 0x5e1   :  { %5189 = vmatprep.subr.bf16.mxu0 %v8871_v51  ;;  %5253 = vmatprep.subr.bf16.mxu1 %v8872_v63  ;;  %v8882_v51 = vld [vmem:[#allocation24_spill] sm:$0xff]  ;;  %v8883_v63 = vld [vmem:[#allocation25_spill] sm:$0xff] }
 0x5e4   :  { %5191 = vmatpush1.bf16.msra.mxu0 %v8873_v57  ;;  %5255 = vmatpush1.bf16.msra.mxu1 %v8874_v37  ;;  %v8884_v57 = vld [vmem:[#allocation26_spill] sm:$0xff]  ;;  %v8885_v37 = vld [vmem:[#allocation27_spill] sm:$0xff] }
 0x5e5   :  { %5193 = vmatprep.subr.bf16.mxu0 %v8875_v36  ;;  %5257 = vmatprep.subr.bf16.mxu1 %v8876_v2  ;;  %v8886_v36 = vld [vmem:[#allocation28_spill] sm:$0xff]  ;;  %v8887_v2 = vld [vmem:[#allocation29_spill] sm:$0xff] }
 0x5e8   :  { %5195 = vmatpush1.bf16.msra.mxu0 %v8877_v15  ;;  %5259 = vmatpush1.bf16.msra.mxu1 %v8878_v27  ;;  %v8888_v15 = vld [vmem:[#allocation30_spill] sm:$0xff]  ;;  %v8889_v27 = vld [vmem:[#allocation31_spill] sm:$0xff] }
 0x5e9   :  { %5197 = vmatprep.subr.bf16.mxu0 %v8879_v6  ;;  %5261 = vmatprep.subr.bf16.mxu1 %v8880_v0  ;;  %v8890_v6 = vld [vmem:[#allocation32_spill] sm:$0xff]  ;;  %v8891_v0 = vld [vmem:[#allocation33_spill] sm:$0xff] }
 0x5ec   :  { %5199 = vmatpush1.bf16.msra.mxu0 %v8881_v48  ;;  %5263 = vmatpush1.bf16.msra.mxu1 %v8882_v51  ;;  %v8892_v48 = vld [vmem:[#allocation34_spill] sm:$0xff]  ;;  %v8893_v51 = vld [vmem:[#allocation35_spill] sm:$0xff] }
 0x5ed   :  { %5201 = vmatprep.subr.bf16.mxu0 %v8883_v63  ;;  %5265 = vmatprep.subr.bf16.mxu1 %v8884_v57  ;;  %v8894_v63 = vld [vmem:[#allocation36_spill] sm:$0xff]  ;;  %v8895_v57 = vld [vmem:[#allocation37_spill] sm:$0xff] }
 0x5f0   :  { %5203 = vmatpush1.bf16.msra.mxu0 %v8885_v37  ;;  %5267 = vmatpush1.bf16.msra.mxu1 %v8886_v36  ;;  %v8896_v37 = vld [vmem:[#allocation38_spill] sm:$0xff]  ;;  %v8897_v36 = vld [vmem:[#allocation39_spill] sm:$0xff] }
 0x5f1   :  { %5205 = vmatprep.subr.bf16.mxu0 %v8887_v2  ;;  %5269 = vmatprep.subr.bf16.mxu1 %v8888_v15  ;;  %v8898_v2 = vld [vmem:[#allocation40_spill] sm:$0xff]  ;;  %v8899_v15 = vld [vmem:[#allocation41_spill] sm:$0xff] }
 0x5f4   :  { %5207 = vmatpush1.bf16.msra.mxu0 %v8889_v27  ;;  %5271 = vmatpush1.bf16.msra.mxu1 %v8890_v6  ;;  %v8900_v27 = vld [vmem:[#allocation42_spill] sm:$0xff]  ;;  %v8901_v6 = vld [vmem:[#allocation43_spill] sm:$0xff] }
 0x5f5   :  { %5209 = vmatprep.subr.bf16.mxu0 %v8891_v0  ;;  %5273 = vmatprep.subr.bf16.mxu1 %v8892_v48  ;;  %v8902_v0 = vld [vmem:[#allocation44_spill] sm:$0xff]  ;;  %v8903_v48 = vld [vmem:[#allocation45_spill] sm:$0xff] }
 0x5f8   :  { %5211 = vmatpush1.bf16.msra.mxu0 %v8893_v51  ;;  %5275 = vmatpush1.bf16.msra.mxu1 %v8894_v63  ;;  %v8904_v51 = vld [vmem:[#allocation46_spill] sm:$0xff]  ;;  %v8905_v63 = vld [vmem:[#allocation47_spill] sm:$0xff] }
 0x5f9   :  { %5213 = vmatprep.subr.bf16.mxu0 %v8895_v57  ;;  %5277 = vmatprep.subr.bf16.mxu1 %v8896_v37  ;;  %v8906_v57 = vld [vmem:[#allocation48_spill] sm:$0xff]  ;;  %v8907_v37 = vld [vmem:[#allocation49_spill] sm:$0xff] }
 0x5fc   :  { %5215 = vmatpush1.bf16.msra.mxu0 %v8897_v36  ;;  %5279 = vmatpush1.bf16.msra.mxu1 %v8898_v2  ;;  %v8908_v36 = vld [vmem:[#allocation50_spill] sm:$0xff]  ;;  %v8909_v2 = vld [vmem:[#allocation51_spill] sm:$0xff] }
 0x5fd   :  { %5217 = vmatprep.subr.bf16.mxu0 %v8899_v15  ;;  %5281 = vmatprep.subr.bf16.mxu1 %v8900_v27  ;;  %v8910_v15 = vld [vmem:[#allocation52_spill] sm:$0xff]  ;;  %v8911_v27 = vld [vmem:[#allocation53_spill] sm:$0xff] }
 0x600   :  { %5219 = vmatpush1.bf16.msra.mxu0 %v8901_v6  ;;  %5283 = vmatpush1.bf16.msra.mxu1 %v8902_v0  ;;  %v8912_v6 = vld [vmem:[#allocation54_spill] sm:$0xff]  ;;  %v8913_v0 = vld [vmem:[#allocation55_spill] sm:$0xff] }
 0x601   :  { %5221 = vmatprep.subr.bf16.mxu0 %v8903_v48  ;;  %5285 = vmatprep.subr.bf16.mxu1 %v8904_v51  ;;  %v8914_v48 = vld [vmem:[#allocation56_spill] sm:$0xff]  ;;  %v8915_v51 = vld [vmem:[#allocation57_spill] sm:$0xff] }
 0x604   :  { %5223 = vmatpush1.bf16.msra.mxu0 %v8905_v63  ;;  %5287 = vmatpush1.bf16.msra.mxu1 %v8906_v57  ;;  %v8916_v63 = vld [vmem:[#allocation58_spill] sm:$0xff]  ;;  %v8917_v57 = vld [vmem:[#allocation59_spill] sm:$0xff] }
 0x605   :  { %5225 = vmatprep.subr.bf16.mxu0 %v8907_v37  ;;  %5289 = vmatprep.subr.bf16.mxu1 %v8908_v36  ;;  %v8918_v37 = vld [vmem:[#allocation60_spill] sm:$0xff]  ;;  %v8919_v36 = vld [vmem:[#allocation61_spill] sm:$0xff] }
 0x608   :  { %5227 = vmatpush1.bf16.msra.mxu0 %v8909_v2  ;;  %5291 = vmatpush1.bf16.msra.mxu1 %v8910_v15  ;;  %v8920_v2 = vld [vmem:[#allocation62_spill] sm:$0xff]  ;;  %v8921_v15 = vld [vmem:[#allocation63_spill] sm:$0xff] }
 0x609   :  { %5229 = vmatprep.subr.bf16.mxu0 %v8911_v27  ;;  %5293 = vmatprep.subr.bf16.mxu1 %v8912_v6  ;;  %v8922_v27 = vld [vmem:[#allocation64_spill] sm:$0xff]  ;;  %v8923_v6 = vld [vmem:[#allocation65_spill] sm:$0xff] }
 0x60c   :  { %5231 = vmatpush1.bf16.msra.mxu0 %v8913_v0  ;;  %5295 = vmatpush1.bf16.msra.mxu1 %v8914_v48  ;;  %v8924_v0 = vld [vmem:[#allocation66_spill] sm:$0xff]  ;;  %v8925_v48 = vld [vmem:[#allocation67_spill] sm:$0xff] }
 0x60d   :  { %5233 = vmatprep.subr.bf16.mxu0 %v8915_v51  ;;  %5297 = vmatprep.subr.bf16.mxu1 %v8916_v63  ;;  %v8926_v51 = vld [vmem:[#allocation68_spill] sm:$0xff]  ;;  %v8927_v63 = vld [vmem:[#allocation69_spill] sm:$0xff] }
 0x610   :  { %5235 = vmatpush1.bf16.msra.mxu0 %v8917_v57  ;;  %5299 = vmatpush1.bf16.msra.mxu1 %v8918_v37  ;;  %v8928_v57 = vld [vmem:[#allocation70_spill] sm:$0xff]  ;;  %v8929_v37 = vld [vmem:[#allocation71_spill] sm:$0xff] }
 0x611   :  { %5237 = vmatprep.subr.bf16.mxu0 %v8919_v36  ;;  %5301 = vmatprep.subr.bf16.mxu1 %v8920_v2  ;;  %v8930_v36 = vld [vmem:[#allocation72_spill] sm:$0xff]  ;;  %v8931_v2 = vld [vmem:[#allocation73_spill] sm:$0xff] }
 0x614   :  { %5239 = vmatpush1.bf16.msra.mxu0 %v8921_v15  ;;  %5303 = vmatpush1.bf16.msra.mxu1 %v8922_v27  ;;  %v8932_v15 = vld [vmem:[#allocation74_spill] sm:$0xff] }
 0x615   :  { %5241 = vmatprep.subr.bf16.mxu0 %v8923_v6  ;;  %5305 = vmatprep.subr.bf16.mxu1 %v8924_v0 }
 0x618   :  { %5243 = vmatpush1.bf16.msra.mxu0 %v8925_v48  ;;  %5307 = vmatpush1.bf16.msra.mxu1 %v8926_v51 }
 0x619   :  { %5245 = vmatprep.subr.bf16.mxu0 %v8927_v63  ;;  %5309 = vmatprep.subr.bf16.mxu1 %v8928_v57 }
 0x61c   :  { %5247 = vmatpush1.bf16.msra.mxu0 %v8929_v37  ;;  %5311 = vmatpush1.bf16.msra.mxu1 %v8930_v36 }
 0x61d   :  { %5313 = vmatprep.subr.bf16.mxu0 %v8931_v2  ;;  %5377 = vmatprep.subr.bf16.mxu1 %v8932_v15 }
 0x672   :  { %v2426_v27 = vpop.f32.mrb[8].mxu0  ;;  %v2497_v6 = vpop.f32.mrb[8].mxu1 }
 0x673   :  { %v5960_v0 = vadd.f32 %v2426_v27, %v8933_v20  ;;  %v2428_v55 = vpop.f32.mrb[9].mxu0  ;;  %v2499_v48 = vpop.f32.mrb[9].mxu1  ;;  %v5976_v36 = vadd.f32 %v2497_v6, %v8658_v56 }
 0x674   :  { %v5961_v51 = vadd.f32 %v2428_v55, %v8934_v44  ;;  %v5977_v37 = vadd.f32 %v2499_v48, %v8657_v43 }
 0x675   :  { %v3840_v45 = vmul.f32 -1.442695, %v5960_v0 }
 0x676   :  { %v3841_v63 = vmul.f32 -1.442695, %v5961_v51  ;;  %v3842_v57 = vmul.f32 -1.442695, %v5977_v37 }
 0x677   :  { %6213 = vpow2.f32 %v3840_v45 }
 0x678   :  { %6215 = vpow2.f32 %v3841_v63  ;;  %v8935_v63 = vld [vmem:[#allocation77_spill] sm:$0xff] }
 0x679   :  { %6217 = vpow2.f32 %v3842_v57 }
 0x67a   :  { %6219 = vtanh.f32 %v5976_v36  ;;  %v8937_v36 = vld [vmem:[#allocation142_spill] sm:$0xff] }
 0x681   :  { %v6214_v2 = vpop.eup %6213 }
 0x682   :  { %v6216_v21 = vpop.eup %6215  ;;  %v2663_v15 = vadd.f32 1.0, %v6214_v2 }
 0x683   :  { %v2669_v13 = vadd.f32 1.0, %v6216_v21  ;;  %v6218_v27 = vpop.eup %6217 }
 0x684   :  { %6221 = vrcp.f32 %v2663_v15  ;;  %v6220_v20 = vpop.eup %6219  ;;  %v2676_v45 = vadd.f32 1.0, %v6218_v27 }
 0x685   :  { %6223 = vrcp.f32 %v2669_v13 }
 0x686   :  { %6225 = vrcp.f32 %v2676_v45 }
 0x68e   :  { %v6222_v55 = vpop.eup %6221 }
 0x68f   :  { %v6224_v0 = vpop.eup %6223  ;;  %v2680_v51 = vmul.f32 %v6222_v55, %v6220_v20 }
 0x690   :  { %v2679_v44 = vmul.f32 %v6224_v0, %v8935_v63  ;;  %v6226_v37 = vpop.eup %6225 }
 0x692   :  { %v7705_v48 = vadd.f32 %v2680_v51, %v2679_v44 }
 0x694   :  { %8936 = vst [vmem:[#allocation78_spill] sm:$0xff] %v7705_v48  ;;  %6227 = vtanh.f32 %v7705_v48 }
 0x69e   :  { %v6228_v2 = vpop.eup %6227 }
 0x69f   :  { %v7708_v57 = vmul.f32 %v6228_v2, %v6226_v37 }
 0x6a1   :  { %3846 = vst [vmem:[%s8125_s4 + $0x40] sm:$0xff] %v7708_v57 }
 0x6b2   :  { %v2568_v13 = vpop.f32.mrb[22].mxu0  ;;  %v2639_v21 = vpop.f32.mrb[22].mxu1 }
 0x6b3   :  { %v5990_v15 = vadd.f32 %v2568_v13, %v8937_v36  ;;  %v2570_v20 = vpop.f32.mrb[23].mxu0  ;;  %v2641_v6 = vpop.f32.mrb[23].mxu1  ;;  %v6006_v45 = vadd.f32 %v2639_v21, %v7088_v4 }
 0x6b4   :  { %v5991_v44 = vadd.f32 %v2570_v20, %v7079_v5  ;;  %v6007_v0 = vadd.f32 %v2641_v6, %v7084_v46 }
 0x6b5   :  { %v3843_v27 = vmul.f32 -1.442695, %v5990_v15 }
 0x6b6   :  { %v3844_v55 = vmul.f32 -1.442695, %v5991_v44  ;;  %v3845_v51 = vmul.f32 -1.442695, %v6007_v0 }
 0x6b7   :  { %6229 = vpow2.f32 %v3843_v27 }
 0x6b8   :  { %6231 = vpow2.f32 %v3844_v55 }
 0x6b9   :  { %6233 = vpow2.f32 %v3845_v51 }
 0x6ba   :  { %6235 = vtanh.f32 %v6006_v45  ;;  %v8941_v45 = vld [vmem:[#allocation119_spill] sm:$0xff] }
 0x6c1   :  { %v6230_v63 = vpop.eup %6229 }
 0x6c2   :  { %v6232_v37 = vpop.eup %6231  ;;  %v2687_v2 = vadd.f32 1.0, %v6230_v63  ;;  %v8942_v63 = vld [vmem:[#allocation120_spill] sm:$0xff] }
 0x6c3   :  { %v2693_v48 = vadd.f32 1.0, %v6232_v37  ;;  %v6234_v13 = vpop.eup %6233  ;;  %v8943_v37 = vld [vmem:[#allocation121_spill] sm:$0xff] }
 0x6c4   :  { %6237 = vrcp.f32 %v2687_v2  ;;  %v6236_v36 = vpop.eup %6235  ;;  %v2700_v27 = vadd.f32 1.0, %v6234_v13  ;;  %v8944_v2 = vld [vmem:[#allocation122_spill] sm:$0xff]  ;;  %v8945_v13 = vld [vmem:[#allocation123_spill] sm:$0xff] }
 0x6c5   :  { %6239 = vrcp.f32 %v2693_v48  ;;  %v8939_v48 = vld [vmem:[#allocation117_spill] sm:$0xff] }
 0x6c6   :  { %6241 = vrcp.f32 %v2700_v27  ;;  %v8949_v27 = vld [vmem:[#allocation127_spill] sm:$0xff] }
 0x6ce   :  { %v6238_v20 = vpop.eup %6237 }
 0x6cf   :  { %v6240_v15 = vpop.eup %6239  ;;  %v2704_v44 = vmul.f32 %v6238_v20, %v6236_v36  ;;  %v8940_v36 = vld [vmem:[#allocation118_spill] sm:$0xff]  ;;  %v8946_v20 = vld [vmem:[#allocation124_spill] sm:$0xff] }
 0x6d0   :  { %v2703_v55 = vmul.f32 %v6240_v15, %v7562_v28  ;;  %v6242_v21 = vpop.eup %6241  ;;  %v8938_v28 = vld [vmem:[#allocation116_spill] sm:$0xff]  ;;  %v8947_v15 = vld [vmem:[#allocation125_spill] sm:$0xff] }
 0x6d2   :  { %v7719_v6 = vadd.f32 %v2704_v44, %v2703_v55  ;;  %v8948_v44 = vld [vmem:[#allocation126_spill] sm:$0xff]  ;;  %v8950_v55 = vld [vmem:[#allocation128_spill] sm:$0xff] }
 0x6d4   :  { %6243 = vtanh.f32 %v7719_v6 }
 0x6de   :  { %v6244_v0 = vpop.eup %6243 }
 0x6df   :  { %v2707_v51 = vmul.f32 %v6244_v0, %v6242_v21  ;;  %v8951_v21 = vld [vmem:[#allocation129_spill] sm:$0xff]  ;;  %v8952_v0 = vld [vmem:[#allocation130_spill] sm:$0xff] }
 0x6e1   :  { %3847 = vst [vmem:[%s8125_s4 + $0x48] sm:$0xff] %v2707_v51  ;;  %2775 = vmatprep.mubr.f32.mxu0 %v2707_v51  ;;  %2846 = vmatprep.mubr.f32.mxu1 %v2707_v51 }
 0x6e2   :  { %2776 = vmatmul.mubr.f32.vlgmr.msra.gmra.mrb[10].mxu0 %v7708_v57  ;;  %2847 = vmatmul.mubr.f32.vlgmr.msra.gmra.mrb[10].mxu1 %v7708_v57 }
 0x6e3   :  { %5315 = vmatpush1.bf16.msra.mxu0 %v8570_v62  ;;  %5379 = vmatpush1.bf16.msra.mxu1 %v8571_v61 }
 0x6e4   :  { %2917 = vmatprep.mubr.f32.mxu0 %v2707_v51  ;;  %2988 = vmatprep.mubr.f32.mxu1 %v2707_v51  ;;  %v8953_v51 = vld [vmem:[#allocation131_spill] sm:$0xff] }
 0x6e5   :  { %5317 = vmatprep.subr.bf16.mxu0 %v8572_v31  ;;  %5381 = vmatprep.subr.bf16.mxu1 %v8573_v19 }
 0x6e7   :  { %5319 = vmatpush1.bf16.msra.mxu0 %v8574_v1  ;;  %5383 = vmatpush1.bf16.msra.mxu1 %v8662_v7 }
 0x6e8   :  { %5321 = vmatprep.subr.bf16.mxu0 %v8663_v32  ;;  %5385 = vmatprep.subr.bf16.mxu1 %v8664_v54 }
 0x6eb   :  { %5323 = vmatpush1.bf16.msra.mxu0 %v8665_v8  ;;  %5387 = vmatpush1.bf16.msra.mxu1 %v8666_v39 }
 0x6ec   :  { %5325 = vmatprep.subr.bf16.mxu0 %v8754_v12  ;;  %5389 = vmatprep.subr.bf16.mxu1 %v8755_v59 }
 0x6ef   :  { %5327 = vmatpush1.bf16.msra.mxu0 %v8756_v17  ;;  %5391 = vmatpush1.bf16.msra.mxu1 %v8757_v60 }
 0x6f0   :  { %5329 = vmatprep.subr.bf16.mxu0 %v8758_v22  ;;  %5393 = vmatprep.subr.bf16.mxu1 %v8846_v50 }
 0x6f3   :  { %5331 = vmatpush1.bf16.msra.mxu0 %v8847_v26  ;;  %5395 = vmatpush1.bf16.msra.mxu1 %v8761_v30 }
 0x6f4   :  { %5333 = vmatprep.subr.bf16.mxu0 %v8848_v11  ;;  %5397 = vmatprep.subr.bf16.mxu1 %v8763_v42 }
 0x6f7   :  { %5335 = vmatpush1.bf16.msra.mxu0 %v8764_v3  ;;  %5399 = vmatpush1.bf16.msra.mxu1 %v8765_v41 }
 0x6f8   :  { %5337 = vmatprep.subr.bf16.mxu0 %v8766_v16  ;;  %5401 = vmatprep.subr.bf16.mxu1 %v8767_v40 }
 0x6fb   :  { %5339 = vmatpush1.bf16.msra.mxu0 %v8768_v47  ;;  %5403 = vmatpush1.bf16.msra.mxu1 %v8769_v18 }
 0x6fc   :  { %5341 = vmatprep.subr.bf16.mxu0 %v8770_v29  ;;  %5405 = vmatprep.subr.bf16.mxu1 %v8771_v34 }
 0x6ff   :  { %5343 = vmatpush1.bf16.msra.mxu0 %v8685_v10  ;;  %5407 = vmatpush1.bf16.msra.mxu1 %v8772_v33 }
 0x700   :  { %5345 = vmatprep.subr.bf16.mxu0 %v8687_v25  ;;  %5409 = vmatprep.subr.bf16.mxu1 %v8688_v38 }
 0x703   :  { %5347 = vmatpush1.bf16.msra.mxu0 %v8689_v24  ;;  %5411 = vmatpush1.bf16.msra.mxu1 %v8690_v49 }
 0x704   :  { %5349 = vmatprep.subr.bf16.mxu0 %v8691_v52  ;;  %5413 = vmatprep.subr.bf16.mxu1 %v8692_v58 }
 0x707   :  { %5351 = vmatpush1.bf16.msra.mxu0 %v8693_v14  ;;  %5415 = vmatpush1.bf16.msra.mxu1 %v8694_v9 }
 0x708   :  { %5353 = vmatprep.subr.bf16.mxu0 %v8695_v23  ;;  %5417 = vmatprep.subr.bf16.mxu1 %v8609_v35 }
 0x70b   :  { %5355 = vmatpush1.bf16.msra.mxu0 %v8696_v53  ;;  %5419 = vmatpush1.bf16.msra.mxu1 %v8938_v28 }
 0x70c   :  { %5357 = vmatprep.subr.bf16.mxu0 %v8939_v48  ;;  %5421 = vmatprep.subr.bf16.mxu1 %v8940_v36 }
 0x70f   :  { %5359 = vmatpush1.bf16.msra.mxu0 %v8941_v45  ;;  %5423 = vmatpush1.bf16.msra.mxu1 %v8942_v63  ;;  %v9026_v45 = vld [vmem:[#allocation138_spill] sm:$0xff] }
 0x710   :  { %5361 = vmatprep.subr.bf16.mxu0 %v8943_v37  ;;  %5425 = vmatprep.subr.bf16.mxu1 %v8944_v2  ;;  %v8954_v37 = vld [vmem:[#allocation132_spill] sm:$0xff]  ;;  %v8955_v2 = vld [vmem:[#allocation133_spill] sm:$0xff] }
 0x713   :  { %5363 = vmatpush1.bf16.msra.mxu0 %v8945_v13  ;;  %5427 = vmatpush1.bf16.msra.mxu1 %v8946_v20  ;;  %v8956_v13 = vld [vmem:[#allocation134_spill] sm:$0xff]  ;;  %v8957_v20 = vld [vmem:[#allocation135_spill] sm:$0xff] }
 0x714   :  { %5365 = vmatprep.subr.bf16.mxu0 %v8947_v15  ;;  %5429 = vmatprep.subr.bf16.mxu1 %v8948_v44  ;;  %v8958_v15 = vld [vmem:[#allocation136_spill] sm:$0xff]  ;;  %v8959_v44 = vld [vmem:[#allocation9_spill] sm:$0xff] }
 0x717   :  { %5367 = vmatpush1.bf16.msra.mxu0 %v8949_v27  ;;  %5431 = vmatpush1.bf16.msra.mxu1 %v8950_v55  ;;  %v8960_v27 = vld [vmem:[#allocation10_spill] sm:$0xff]  ;;  %v9025_v55 = vld [vmem:[#allocation137_spill] sm:$0xff] }
 0x718   :  { %5369 = vmatprep.subr.bf16.mxu0 %v8951_v21  ;;  %5433 = vmatprep.subr.bf16.mxu1 %v8952_v0  ;;  %v8961_v0 = vld [vmem:[#allocation11_spill] sm:$0xff]  ;;  %v8970_v21 = vld [vmem:[#allocation20_spill] sm:$0xff] }
 0x71b   :  { %5371 = vmatpush1.bf16.msra.mxu0 %v8953_v51  ;;  %5435 = vmatpush1.bf16.msra.mxu1 %v8954_v37  ;;  %v8962_v51 = vld [vmem:[#allocation12_spill] sm:$0xff]  ;;  %v8963_v37 = vld [vmem:[#allocation13_spill] sm:$0xff] }
 0x71c   :  { %5373 = vmatprep.subr.bf16.mxu0 %v8955_v2  ;;  %5437 = vmatprep.subr.bf16.mxu1 %v8956_v13  ;;  %v8964_v2 = vld [vmem:[#allocation14_spill] sm:$0xff]  ;;  %v8965_v13 = vld [vmem:[#allocation15_spill] sm:$0xff] }
 0x71f   :  { %5375 = vmatpush1.bf16.msra.mxu0 %v8957_v20  ;;  %5439 = vmatpush1.bf16.msra.mxu1 %v8958_v15  ;;  %v8966_v20 = vld [vmem:[#allocation16_spill] sm:$0xff]  ;;  %v8967_v15 = vld [vmem:[#allocation17_spill] sm:$0xff] }
 0x720   :  { %5441 = vmatprep.subr.bf16.mxu0 %v8959_v44  ;;  %5505 = vmatprep.subr.bf16.mxu1 %v8960_v27  ;;  %v8968_v44 = vld [vmem:[#allocation18_spill] sm:$0xff]  ;;  %v8969_v27 = vld [vmem:[#allocation19_spill] sm:$0xff] }
 0x722   :  { %2918 = vmatmul.mubr.f32.vlgmr.msra.gmra.mrb[20].mxu0 %v7708_v57  ;;  %2989 = vmatmul.mubr.f32.vlgmr.msra.gmra.mrb[20].mxu1 %v7708_v57  ;;  %v8971_v57 = vld [vmem:[#allocation21_spill] sm:$0xff] }
 0x723   :  { %5443 = vmatpush1.bf16.msra.mxu0 %v8961_v0  ;;  %5507 = vmatpush1.bf16.msra.mxu1 %v8962_v51  ;;  %v8972_v0 = vld [vmem:[#allocation22_spill] sm:$0xff]  ;;  %v8973_v51 = vld [vmem:[#allocation23_spill] sm:$0xff] }
 0x724   :  { %5445 = vmatprep.subr.bf16.mxu0 %v8963_v37  ;;  %5509 = vmatprep.subr.bf16.mxu1 %v8964_v2  ;;  %v8974_v37 = vld [vmem:[#allocation24_spill] sm:$0xff]  ;;  %v8975_v2 = vld [vmem:[#allocation25_spill] sm:$0xff] }
 0x727   :  { %5447 = vmatpush1.bf16.msra.mxu0 %v8965_v13  ;;  %5511 = vmatpush1.bf16.msra.mxu1 %v8966_v20  ;;  %v8976_v13 = vld [vmem:[#allocation26_spill] sm:$0xff]  ;;  %v8977_v20 = vld [vmem:[#allocation27_spill] sm:$0xff] }
 0x728   :  { %5449 = vmatprep.subr.bf16.mxu0 %v8967_v15  ;;  %5513 = vmatprep.subr.bf16.mxu1 %v8968_v44  ;;  %v8978_v15 = vld [vmem:[#allocation28_spill] sm:$0xff]  ;;  %v8979_v44 = vld [vmem:[#allocation29_spill] sm:$0xff] }
 0x72b   :  { %5451 = vmatpush1.bf16.msra.mxu0 %v8969_v27  ;;  %5515 = vmatpush1.bf16.msra.mxu1 %v8970_v21  ;;  %v8980_v27 = vld [vmem:[#allocation30_spill] sm:$0xff]  ;;  %v8981_v21 = vld [vmem:[#allocation31_spill] sm:$0xff] }
 0x72c   :  { %5453 = vmatprep.subr.bf16.mxu0 %v8971_v57  ;;  %5517 = vmatprep.subr.bf16.mxu1 %v8972_v0  ;;  %v8982_v57 = vld [vmem:[#allocation32_spill] sm:$0xff]  ;;  %v8983_v0 = vld [vmem:[#allocation33_spill] sm:$0xff] }
 0x72f   :  { %5455 = vmatpush1.bf16.msra.mxu0 %v8973_v51  ;;  %5519 = vmatpush1.bf16.msra.mxu1 %v8974_v37  ;;  %v8984_v51 = vld [vmem:[#allocation34_spill] sm:$0xff]  ;;  %v8985_v37 = vld [vmem:[#allocation35_spill] sm:$0xff] }
 0x730   :  { %5457 = vmatprep.subr.bf16.mxu0 %v8975_v2  ;;  %5521 = vmatprep.subr.bf16.mxu1 %v8976_v13  ;;  %v8986_v2 = vld [vmem:[#allocation36_spill] sm:$0xff]  ;;  %v8987_v13 = vld [vmem:[#allocation37_spill] sm:$0xff] }
 0x733   :  { %5459 = vmatpush1.bf16.msra.mxu0 %v8977_v20  ;;  %5523 = vmatpush1.bf16.msra.mxu1 %v8978_v15  ;;  %v8988_v20 = vld [vmem:[#allocation38_spill] sm:$0xff]  ;;  %v8989_v15 = vld [vmem:[#allocation39_spill] sm:$0xff] }
 0x734   :  { %5461 = vmatprep.subr.bf16.mxu0 %v8979_v44  ;;  %5525 = vmatprep.subr.bf16.mxu1 %v8980_v27  ;;  %v8990_v44 = vld [vmem:[#allocation40_spill] sm:$0xff]  ;;  %v8991_v27 = vld [vmem:[#allocation41_spill] sm:$0xff] }
 0x737   :  { %5463 = vmatpush1.bf16.msra.mxu0 %v8981_v21  ;;  %5527 = vmatpush1.bf16.msra.mxu1 %v8982_v57  ;;  %v8992_v21 = vld [vmem:[#allocation42_spill] sm:$0xff]  ;;  %v8993_v57 = vld [vmem:[#allocation43_spill] sm:$0xff] }
 0x738   :  { %5465 = vmatprep.subr.bf16.mxu0 %v8983_v0  ;;  %5529 = vmatprep.subr.bf16.mxu1 %v8984_v51  ;;  %v8994_v0 = vld [vmem:[#allocation44_spill] sm:$0xff]  ;;  %v8995_v51 = vld [vmem:[#allocation45_spill] sm:$0xff] }
 0x73b   :  { %5467 = vmatpush1.bf16.msra.mxu0 %v8985_v37  ;;  %5531 = vmatpush1.bf16.msra.mxu1 %v8986_v2  ;;  %v8996_v37 = vld [vmem:[#allocation46_spill] sm:$0xff]  ;;  %v8997_v2 = vld [vmem:[#allocation47_spill] sm:$0xff] }
 0x73c   :  { %5469 = vmatprep.subr.bf16.mxu0 %v8987_v13  ;;  %5533 = vmatprep.subr.bf16.mxu1 %v8988_v20  ;;  %v8998_v13 = vld [vmem:[#allocation48_spill] sm:$0xff]  ;;  %v8999_v20 = vld [vmem:[#allocation49_spill] sm:$0xff] }
 0x73f   :  { %5471 = vmatpush1.bf16.msra.mxu0 %v8989_v15  ;;  %5535 = vmatpush1.bf16.msra.mxu1 %v8990_v44  ;;  %v9000_v15 = vld [vmem:[#allocation50_spill] sm:$0xff]  ;;  %v9001_v44 = vld [vmem:[#allocation51_spill] sm:$0xff] }
 0x740   :  { %5473 = vmatprep.subr.bf16.mxu0 %v8991_v27  ;;  %5537 = vmatprep.subr.bf16.mxu1 %v8992_v21  ;;  %v9002_v27 = vld [vmem:[#allocation52_spill] sm:$0xff]  ;;  %v9003_v21 = vld [vmem:[#allocation53_spill] sm:$0xff] }
 0x743   :  { %5475 = vmatpush1.bf16.msra.mxu0 %v8993_v57  ;;  %5539 = vmatpush1.bf16.msra.mxu1 %v8994_v0  ;;  %v9004_v57 = vld [vmem:[#allocation54_spill] sm:$0xff]  ;;  %v9005_v0 = vld [vmem:[#allocation55_spill] sm:$0xff] }
 0x744   :  { %5477 = vmatprep.subr.bf16.mxu0 %v8995_v51  ;;  %5541 = vmatprep.subr.bf16.mxu1 %v8996_v37  ;;  %v9006_v51 = vld [vmem:[#allocation56_spill] sm:$0xff]  ;;  %v9007_v37 = vld [vmem:[#allocation57_spill] sm:$0xff] }
 0x747   :  { %5479 = vmatpush1.bf16.msra.mxu0 %v8997_v2  ;;  %5543 = vmatpush1.bf16.msra.mxu1 %v8998_v13  ;;  %v9008_v2 = vld [vmem:[#allocation58_spill] sm:$0xff]  ;;  %v9009_v13 = vld [vmem:[#allocation59_spill] sm:$0xff] }
 0x748   :  { %5481 = vmatprep.subr.bf16.mxu0 %v8999_v20  ;;  %5545 = vmatprep.subr.bf16.mxu1 %v9000_v15  ;;  %v9010_v20 = vld [vmem:[#allocation60_spill] sm:$0xff]  ;;  %v9011_v15 = vld [vmem:[#allocation61_spill] sm:$0xff] }
 0x74b   :  { %5483 = vmatpush1.bf16.msra.mxu0 %v9001_v44  ;;  %5547 = vmatpush1.bf16.msra.mxu1 %v9002_v27  ;;  %v9012_v44 = vld [vmem:[#allocation62_spill] sm:$0xff]  ;;  %v9013_v27 = vld [vmem:[#allocation63_spill] sm:$0xff] }
 0x74c   :  { %5485 = vmatprep.subr.bf16.mxu0 %v9003_v21  ;;  %5549 = vmatprep.subr.bf16.mxu1 %v9004_v57  ;;  %v9014_v21 = vld [vmem:[#allocation64_spill] sm:$0xff]  ;;  %v9015_v57 = vld [vmem:[#allocation65_spill] sm:$0xff] }
 0x74f   :  { %5487 = vmatpush1.bf16.msra.mxu0 %v9005_v0  ;;  %5551 = vmatpush1.bf16.msra.mxu1 %v9006_v51  ;;  %v9016_v0 = vld [vmem:[#allocation66_spill] sm:$0xff]  ;;  %v9017_v51 = vld [vmem:[#allocation67_spill] sm:$0xff] }
 0x750   :  { %5489 = vmatprep.subr.bf16.mxu0 %v9007_v37  ;;  %5553 = vmatprep.subr.bf16.mxu1 %v9008_v2  ;;  %v9018_v37 = vld [vmem:[#allocation68_spill] sm:$0xff]  ;;  %v9019_v2 = vld [vmem:[#allocation69_spill] sm:$0xff] }
 0x753   :  { %5491 = vmatpush1.bf16.msra.mxu0 %v9009_v13  ;;  %5555 = vmatpush1.bf16.msra.mxu1 %v9010_v20  ;;  %v9020_v13 = vld [vmem:[#allocation70_spill] sm:$0xff]  ;;  %v9021_v20 = vld [vmem:[#allocation71_spill] sm:$0xff] }
 0x754   :  { %5493 = vmatprep.subr.bf16.mxu0 %v9011_v15  ;;  %5557 = vmatprep.subr.bf16.mxu1 %v9012_v44  ;;  %v9022_v15 = vld [vmem:[#allocation72_spill] sm:$0xff]  ;;  %v9023_v44 = vld [vmem:[#allocation73_spill] sm:$0xff] }
 0x757   :  { %5495 = vmatpush1.bf16.msra.mxu0 %v9013_v27  ;;  %5559 = vmatpush1.bf16.msra.mxu1 %v9014_v21  ;;  %v9024_v27 = vld [vmem:[#allocation74_spill] sm:$0xff] }
 0x758   :  { %5497 = vmatprep.subr.bf16.mxu0 %v9015_v57  ;;  %5561 = vmatprep.subr.bf16.mxu1 %v9016_v0 }
 0x75b   :  { %5499 = vmatpush1.bf16.msra.mxu0 %v9017_v51  ;;  %5563 = vmatpush1.bf16.msra.mxu1 %v9018_v37 }
 0x75c   :  { %5501 = vmatprep.subr.bf16.mxu0 %v9019_v2  ;;  %5565 = vmatprep.subr.bf16.mxu1 %v9020_v13 }
 0x75f   :  { %5503 = vmatpush1.bf16.msra.mxu0 %v9021_v20  ;;  %5567 = vmatpush1.bf16.msra.mxu1 %v9022_v15 }
 0x760   :  { %5569 = vmatprep.subr.bf16.mxu0 %v9023_v44  ;;  %5633 = vmatprep.subr.bf16.mxu1 %v9024_v27 }
 0x7b5   :  { %v2777_v21 = vpop.f32.mrb[10].mxu0  ;;  %v2848_v57 = vpop.f32.mrb[10].mxu1 }
 0x7b6   :  { %v5962_v0 = vadd.f32 %v2777_v21, %v9025_v55  ;;  %v2779_v63 = vpop.f32.mrb[11].mxu0  ;;  %v2850_v51 = vpop.f32.mrb[11].mxu1  ;;  %v5978_v15 = vadd.f32 %v2848_v57, %v8658_v56 }
 0x7b7   :  { %v5963_v37 = vadd.f32 %v2779_v63, %v9026_v45  ;;  %v5979_v20 = vadd.f32 %v2850_v51, %v8657_v43 }
 0x7b8   :  { %v3848_v36 = vmul.f32 -1.442695, %v5962_v0 }
 0x7b9   :  { %v3849_v2 = vmul.f32 -1.442695, %v5963_v37  ;;  %v3850_v13 = vmul.f32 -1.442695, %v5979_v20 }
 0x7ba   :  { %6245 = vpow2.f32 %v3848_v36 }
 0x7bb   :  { %6247 = vpow2.f32 %v3849_v2  ;;  %v9027_v2 = vld [vmem:[#allocation78_spill] sm:$0xff] }
 0x7bc   :  { %6249 = vpow2.f32 %v3850_v13 }
 0x7bd   :  { %6251 = vtanh.f32 %v5978_v15  ;;  %v9029_v15 = vld [vmem:[#allocation142_spill] sm:$0xff] }
 0x7c4   :  { %v6246_v44 = vpop.eup %6245 }
 0x7c5   :  { %v6248_v48 = vpop.eup %6247  ;;  %v3014_v27 = vadd.f32 1.0, %v6246_v44 }
 0x7c6   :  { %v3020_v28 = vadd.f32 1.0, %v6248_v48  ;;  %v6250_v21 = vpop.eup %6249 }
 0x7c7   :  { %6253 = vrcp.f32 %v3014_v27  ;;  %v6252_v55 = vpop.eup %6251  ;;  %v3027_v36 = vadd.f32 1.0, %v6250_v21 }
 0x7c8   :  { %6255 = vrcp.f32 %v3020_v28 }
 0x7c9   :  { %6257 = vrcp.f32 %v3027_v36 }
 0x7d1   :  { %v6254_v63 = vpop.eup %6253 }
 0x7d2   :  { %v6256_v0 = vpop.eup %6255  ;;  %v3031_v37 = vmul.f32 %v6254_v63, %v6252_v55 }
 0x7d3   :  { %v3030_v45 = vmul.f32 %v6256_v0, %v9027_v2  ;;  %v6258_v20 = vpop.eup %6257 }
 0x7d5   :  { %v7862_v51 = vadd.f32 %v3031_v37, %v3030_v45 }
 0x7d7   :  { %9028 = vst [vmem:[#allocation79_spill] sm:$0xff] %v7862_v51  ;;  %6259 = vtanh.f32 %v7862_v51 }
 0x7e1   :  { %v6260_v44 = vpop.eup %6259 }
 0x7e2   :  { %v7865_v13 = vmul.f32 %v6260_v44, %v6258_v20 }
 0x7e4   :  { %3854 = vst [vmem:[%s8125_s4 + $0x50] sm:$0xff] %v7865_v13 }
 0x7f5   :  { %v2919_v28 = vpop.f32.mrb[20].mxu0  ;;  %v2990_v48 = vpop.f32.mrb[20].mxu1 }
 0x7f6   :  { %v5988_v27 = vadd.f32 %v2919_v28, %v9029_v15  ;;  %v2921_v55 = vpop.f32.mrb[21].mxu0  ;;  %v2992_v57 = vpop.f32.mrb[21].mxu1  ;;  %v6004_v36 = vadd.f32 %v2990_v48, %v7088_v4 }
 0x7f7   :  { %v5989_v45 = vadd.f32 %v2921_v55, %v7079_v5  ;;  %v6005_v0 = vadd.f32 %v2992_v57, %v7084_v46 }
 0x7f8   :  { %v3851_v21 = vmul.f32 -1.442695, %v5988_v27 }
 0x7f9   :  { %v3852_v63 = vmul.f32 -1.442695, %v5989_v45  ;;  %v3853_v37 = vmul.f32 -1.442695, %v6005_v0 }
 0x7fa   :  { %6261 = vpow2.f32 %v3851_v21 }
 0x7fb   :  { %6263 = vpow2.f32 %v3852_v63 }
 0x7fc   :  { %6265 = vpow2.f32 %v3853_v37 }
 0x7fd   :  { %6267 = vtanh.f32 %v6004_v36  ;;  %v9033_v36 = vld [vmem:[#allocation119_spill] sm:$0xff] }
 0x804   :  { %v6262_v2 = vpop.eup %6261 }
 0x805   :  { %v6264_v20 = vpop.eup %6263  ;;  %v3038_v44 = vadd.f32 1.0, %v6262_v2  ;;  %v9034_v2 = vld [vmem:[#allocation120_spill] sm:$0xff] }
 0x806   :  { %v3044_v51 = vadd.f32 1.0, %v6264_v20  ;;  %v6266_v28 = vpop.eup %6265  ;;  %v9035_v20 = vld [vmem:[#allocation121_spill] sm:$0xff] }
 0x807   :  { %6269 = vrcp.f32 %v3038_v44  ;;  %v6268_v15 = vpop.eup %6267  ;;  %v3051_v21 = vadd.f32 1.0, %v6266_v28  ;;  %v9036_v44 = vld [vmem:[#allocation122_spill] sm:$0xff]  ;;  %v9037_v28 = vld [vmem:[#allocation123_spill] sm:$0xff] }
 0x808   :  { %6271 = vrcp.f32 %v3044_v51  ;;  %v9031_v51 = vld [vmem:[#allocation117_spill] sm:$0xff] }
 0x809   :  { %6273 = vrcp.f32 %v3051_v21  ;;  %v9041_v21 = vld [vmem:[#allocation127_spill] sm:$0xff] }
 0x811   :  { %v6270_v55 = vpop.eup %6269 }
 0x812   :  { %v6272_v27 = vpop.eup %6271  ;;  %v3055_v45 = vmul.f32 %v6270_v55, %v6268_v15  ;;  %v9032_v15 = vld [vmem:[#allocation118_spill] sm:$0xff]  ;;  %v9038_v55 = vld [vmem:[#allocation124_spill] sm:$0xff] }
 0x813   :  { %v3054_v63 = vmul.f32 %v6272_v27, %v7719_v6  ;;  %v6274_v48 = vpop.eup %6273  ;;  %v9030_v6 = vld [vmem:[#allocation116_spill] sm:$0xff]  ;;  %v9039_v27 = vld [vmem:[#allocation125_spill] sm:$0xff] }
 0x815   :  { %v7876_v57 = vadd.f32 %v3055_v45, %v3054_v63  ;;  %v9040_v45 = vld [vmem:[#allocation126_spill] sm:$0xff]  ;;  %v9042_v63 = vld [vmem:[#allocation128_spill] sm:$0xff] }
 0x817   :  { %6275 = vtanh.f32 %v7876_v57 }
 0x821   :  { %v6276_v0 = vpop.eup %6275 }
 0x822   :  { %v3058_v37 = vmul.f32 %v6276_v0, %v6274_v48  ;;  %v9043_v48 = vld [vmem:[#allocation129_spill] sm:$0xff]  ;;  %v9044_v0 = vld [vmem:[#allocation130_spill] sm:$0xff] }
 0x824   :  { %3855 = vst [vmem:[%s8125_s4 + $0x58] sm:$0xff] %v3058_v37  ;;  %3126 = vmatprep.mubr.f32.mxu0 %v3058_v37  ;;  %3197 = vmatprep.mubr.f32.mxu1 %v3058_v37 }
 0x825   :  { %3127 = vmatmul.mubr.f32.vlgmr.msra.gmra.mrb[12].mxu0 %v7865_v13  ;;  %3198 = vmatmul.mubr.f32.vlgmr.msra.gmra.mrb[12].mxu1 %v7865_v13 }
 0x826   :  { %5571 = vmatpush1.bf16.msra.mxu0 %v8570_v62  ;;  %5635 = vmatpush1.bf16.msra.mxu1 %v8571_v61 }
 0x827   :  { %3268 = vmatprep.mubr.f32.mxu0 %v3058_v37  ;;  %3339 = vmatprep.mubr.f32.mxu1 %v3058_v37  ;;  %v9045_v37 = vld [vmem:[#allocation131_spill] sm:$0xff] }
 0x828   :  { %5573 = vmatprep.subr.bf16.mxu0 %v8572_v31  ;;  %5637 = vmatprep.subr.bf16.mxu1 %v8573_v19 }
 0x82a   :  { %5575 = vmatpush1.bf16.msra.mxu0 %v8574_v1  ;;  %5639 = vmatpush1.bf16.msra.mxu1 %v8662_v7 }
 0x82b   :  { %5577 = vmatprep.subr.bf16.mxu0 %v8663_v32  ;;  %5641 = vmatprep.subr.bf16.mxu1 %v8664_v54 }
 0x82e   :  { %5579 = vmatpush1.bf16.msra.mxu0 %v8665_v8  ;;  %5643 = vmatpush1.bf16.msra.mxu1 %v8666_v39 }
 0x82f   :  { %5581 = vmatprep.subr.bf16.mxu0 %v8754_v12  ;;  %5645 = vmatprep.subr.bf16.mxu1 %v8755_v59 }
 0x832   :  { %5583 = vmatpush1.bf16.msra.mxu0 %v8756_v17  ;;  %5647 = vmatpush1.bf16.msra.mxu1 %v8757_v60 }
 0x833   :  { %5585 = vmatprep.subr.bf16.mxu0 %v8758_v22  ;;  %5649 = vmatprep.subr.bf16.mxu1 %v8846_v50 }
 0x836   :  { %5587 = vmatpush1.bf16.msra.mxu0 %v8847_v26  ;;  %5651 = vmatpush1.bf16.msra.mxu1 %v8761_v30 }
 0x837   :  { %5589 = vmatprep.subr.bf16.mxu0 %v8848_v11  ;;  %5653 = vmatprep.subr.bf16.mxu1 %v8763_v42 }
 0x83a   :  { %5591 = vmatpush1.bf16.msra.mxu0 %v8764_v3  ;;  %5655 = vmatpush1.bf16.msra.mxu1 %v8765_v41 }
 0x83b   :  { %5593 = vmatprep.subr.bf16.mxu0 %v8766_v16  ;;  %5657 = vmatprep.subr.bf16.mxu1 %v8767_v40 }
 0x83e   :  { %5595 = vmatpush1.bf16.msra.mxu0 %v8768_v47  ;;  %5659 = vmatpush1.bf16.msra.mxu1 %v8769_v18 }
 0x83f   :  { %5597 = vmatprep.subr.bf16.mxu0 %v8770_v29  ;;  %5661 = vmatprep.subr.bf16.mxu1 %v8771_v34 }
 0x842   :  { %5599 = vmatpush1.bf16.msra.mxu0 %v8685_v10  ;;  %5663 = vmatpush1.bf16.msra.mxu1 %v8772_v33 }
 0x843   :  { %5601 = vmatprep.subr.bf16.mxu0 %v8687_v25  ;;  %5665 = vmatprep.subr.bf16.mxu1 %v8688_v38 }
 0x846   :  { %5603 = vmatpush1.bf16.msra.mxu0 %v8689_v24  ;;  %5667 = vmatpush1.bf16.msra.mxu1 %v8690_v49 }
 0x847   :  { %5605 = vmatprep.subr.bf16.mxu0 %v8691_v52  ;;  %5669 = vmatprep.subr.bf16.mxu1 %v8692_v58 }
 0x84a   :  { %5607 = vmatpush1.bf16.msra.mxu0 %v8693_v14  ;;  %5671 = vmatpush1.bf16.msra.mxu1 %v8694_v9 }
 0x84b   :  { %5609 = vmatprep.subr.bf16.mxu0 %v8695_v23  ;;  %5673 = vmatprep.subr.bf16.mxu1 %v8609_v35 }
 0x84e   :  { %5611 = vmatpush1.bf16.msra.mxu0 %v8696_v53  ;;  %5675 = vmatpush1.bf16.msra.mxu1 %v9030_v6 }
 0x84f   :  { %5613 = vmatprep.subr.bf16.mxu0 %v9031_v51  ;;  %5677 = vmatprep.subr.bf16.mxu1 %v9032_v15 }
 0x852   :  { %5615 = vmatpush1.bf16.msra.mxu0 %v9033_v36  ;;  %5679 = vmatpush1.bf16.msra.mxu1 %v9034_v2  ;;  %v9118_v36 = vld [vmem:[#allocation138_spill] sm:$0xff] }
 0x853   :  { %5617 = vmatprep.subr.bf16.mxu0 %v9035_v20  ;;  %5681 = vmatprep.subr.bf16.mxu1 %v9036_v44  ;;  %v9046_v20 = vld [vmem:[#allocation132_spill] sm:$0xff]  ;;  %v9047_v44 = vld [vmem:[#allocation133_spill] sm:$0xff] }
 0x856   :  { %5619 = vmatpush1.bf16.msra.mxu0 %v9037_v28  ;;  %5683 = vmatpush1.bf16.msra.mxu1 %v9038_v55  ;;  %v9048_v28 = vld [vmem:[#allocation134_spill] sm:$0xff]  ;;  %v9049_v55 = vld [vmem:[#allocation135_spill] sm:$0xff] }
 0x857   :  { %5621 = vmatprep.subr.bf16.mxu0 %v9039_v27  ;;  %5685 = vmatprep.subr.bf16.mxu1 %v9040_v45  ;;  %v9050_v27 = vld [vmem:[#allocation136_spill] sm:$0xff]  ;;  %v9051_v45 = vld [vmem:[#allocation9_spill] sm:$0xff] }
 0x85a   :  { %5623 = vmatpush1.bf16.msra.mxu0 %v9041_v21  ;;  %5687 = vmatpush1.bf16.msra.mxu1 %v9042_v63  ;;  %v9052_v21 = vld [vmem:[#allocation10_spill] sm:$0xff]  ;;  %v9117_v63 = vld [vmem:[#allocation137_spill] sm:$0xff] }
 0x85b   :  { %5625 = vmatprep.subr.bf16.mxu0 %v9043_v48  ;;  %5689 = vmatprep.subr.bf16.mxu1 %v9044_v0  ;;  %v9053_v0 = vld [vmem:[#allocation11_spill] sm:$0xff]  ;;  %v9062_v48 = vld [vmem:[#allocation20_spill] sm:$0xff] }
 0x85e   :  { %5627 = vmatpush1.bf16.msra.mxu0 %v9045_v37  ;;  %5691 = vmatpush1.bf16.msra.mxu1 %v9046_v20  ;;  %v9054_v37 = vld [vmem:[#allocation12_spill] sm:$0xff]  ;;  %v9055_v20 = vld [vmem:[#allocation13_spill] sm:$0xff] }
 0x85f   :  { %5629 = vmatprep.subr.bf16.mxu0 %v9047_v44  ;;  %5693 = vmatprep.subr.bf16.mxu1 %v9048_v28  ;;  %v9056_v44 = vld [vmem:[#allocation14_spill] sm:$0xff]  ;;  %v9057_v28 = vld [vmem:[#allocation15_spill] sm:$0xff] }
 0x862   :  { %5631 = vmatpush1.bf16.msra.mxu0 %v9049_v55  ;;  %5695 = vmatpush1.bf16.msra.mxu1 %v9050_v27  ;;  %v9058_v55 = vld [vmem:[#allocation16_spill] sm:$0xff]  ;;  %v9059_v27 = vld [vmem:[#allocation17_spill] sm:$0xff] }
 0x863   :  { %5697 = vmatprep.subr.bf16.mxu0 %v9051_v45  ;;  %5761 = vmatprep.subr.bf16.mxu1 %v9052_v21  ;;  %v9060_v45 = vld [vmem:[#allocation18_spill] sm:$0xff]  ;;  %v9061_v21 = vld [vmem:[#allocation19_spill] sm:$0xff] }
 0x865   :  { %3269 = vmatmul.mubr.f32.vlgmr.msra.gmra.mrb[18].mxu0 %v7865_v13  ;;  %3340 = vmatmul.mubr.f32.vlgmr.msra.gmra.mrb[18].mxu1 %v7865_v13  ;;  %v9063_v13 = vld [vmem:[#allocation21_spill] sm:$0xff] }
 0x866   :  { %5699 = vmatpush1.bf16.msra.mxu0 %v9053_v0  ;;  %5763 = vmatpush1.bf16.msra.mxu1 %v9054_v37  ;;  %v9064_v0 = vld [vmem:[#allocation22_spill] sm:$0xff]  ;;  %v9065_v37 = vld [vmem:[#allocation23_spill] sm:$0xff] }
 0x867   :  { %5701 = vmatprep.subr.bf16.mxu0 %v9055_v20  ;;  %5765 = vmatprep.subr.bf16.mxu1 %v9056_v44  ;;  %v9066_v20 = vld [vmem:[#allocation24_spill] sm:$0xff]  ;;  %v9067_v44 = vld [vmem:[#allocation25_spill] sm:$0xff] }
 0x86a   :  { %5703 = vmatpush1.bf16.msra.mxu0 %v9057_v28  ;;  %5767 = vmatpush1.bf16.msra.mxu1 %v9058_v55  ;;  %v9068_v28 = vld [vmem:[#allocation26_spill] sm:$0xff]  ;;  %v9069_v55 = vld [vmem:[#allocation27_spill] sm:$0xff] }
 0x86b   :  { %5705 = vmatprep.subr.bf16.mxu0 %v9059_v27  ;;  %5769 = vmatprep.subr.bf16.mxu1 %v9060_v45  ;;  %v9070_v27 = vld [vmem:[#allocation28_spill] sm:$0xff]  ;;  %v9071_v45 = vld [vmem:[#allocation29_spill] sm:$0xff] }
 0x86e   :  { %5707 = vmatpush1.bf16.msra.mxu0 %v9061_v21  ;;  %5771 = vmatpush1.bf16.msra.mxu1 %v9062_v48  ;;  %v9072_v21 = vld [vmem:[#allocation30_spill] sm:$0xff]  ;;  %v9073_v48 = vld [vmem:[#allocation31_spill] sm:$0xff] }
 0x86f   :  { %5709 = vmatprep.subr.bf16.mxu0 %v9063_v13  ;;  %5773 = vmatprep.subr.bf16.mxu1 %v9064_v0  ;;  %v9074_v13 = vld [vmem:[#allocation32_spill] sm:$0xff]  ;;  %v9075_v0 = vld [vmem:[#allocation33_spill] sm:$0xff] }
 0x872   :  { %5711 = vmatpush1.bf16.msra.mxu0 %v9065_v37  ;;  %5775 = vmatpush1.bf16.msra.mxu1 %v9066_v20  ;;  %v9076_v37 = vld [vmem:[#allocation34_spill] sm:$0xff]  ;;  %v9077_v20 = vld [vmem:[#allocation35_spill] sm:$0xff] }
 0x873   :  { %5713 = vmatprep.subr.bf16.mxu0 %v9067_v44  ;;  %5777 = vmatprep.subr.bf16.mxu1 %v9068_v28  ;;  %v9078_v44 = vld [vmem:[#allocation36_spill] sm:$0xff]  ;;  %v9079_v28 = vld [vmem:[#allocation37_spill] sm:$0xff] }
 0x876   :  { %5715 = vmatpush1.bf16.msra.mxu0 %v9069_v55  ;;  %5779 = vmatpush1.bf16.msra.mxu1 %v9070_v27  ;;  %v9080_v55 = vld [vmem:[#allocation38_spill] sm:$0xff]  ;;  %v9081_v27 = vld [vmem:[#allocation39_spill] sm:$0xff] }
 0x877   :  { %5717 = vmatprep.subr.bf16.mxu0 %v9071_v45  ;;  %5781 = vmatprep.subr.bf16.mxu1 %v9072_v21  ;;  %v9082_v45 = vld [vmem:[#allocation40_spill] sm:$0xff]  ;;  %v9083_v21 = vld [vmem:[#allocation41_spill] sm:$0xff] }
 0x87a   :  { %5719 = vmatpush1.bf16.msra.mxu0 %v9073_v48  ;;  %5783 = vmatpush1.bf16.msra.mxu1 %v9074_v13  ;;  %v9084_v48 = vld [vmem:[#allocation42_spill] sm:$0xff]  ;;  %v9085_v13 = vld [vmem:[#allocation43_spill] sm:$0xff] }
 0x87b   :  { %5721 = vmatprep.subr.bf16.mxu0 %v9075_v0  ;;  %5785 = vmatprep.subr.bf16.mxu1 %v9076_v37  ;;  %v9086_v0 = vld [vmem:[#allocation44_spill] sm:$0xff]  ;;  %v9087_v37 = vld [vmem:[#allocation45_spill] sm:$0xff] }
 0x87e   :  { %5723 = vmatpush1.bf16.msra.mxu0 %v9077_v20  ;;  %5787 = vmatpush1.bf16.msra.mxu1 %v9078_v44  ;;  %v9088_v20 = vld [vmem:[#allocation46_spill] sm:$0xff]  ;;  %v9089_v44 = vld [vmem:[#allocation47_spill] sm:$0xff] }
 0x87f   :  { %5725 = vmatprep.subr.bf16.mxu0 %v9079_v28  ;;  %5789 = vmatprep.subr.bf16.mxu1 %v9080_v55  ;;  %v9090_v28 = vld [vmem:[#allocation48_spill] sm:$0xff]  ;;  %v9091_v55 = vld [vmem:[#allocation49_spill] sm:$0xff] }
 0x882   :  { %5727 = vmatpush1.bf16.msra.mxu0 %v9081_v27  ;;  %5791 = vmatpush1.bf16.msra.mxu1 %v9082_v45  ;;  %v9092_v27 = vld [vmem:[#allocation50_spill] sm:$0xff]  ;;  %v9093_v45 = vld [vmem:[#allocation51_spill] sm:$0xff] }
 0x883   :  { %5729 = vmatprep.subr.bf16.mxu0 %v9083_v21  ;;  %5793 = vmatprep.subr.bf16.mxu1 %v9084_v48  ;;  %v9094_v21 = vld [vmem:[#allocation52_spill] sm:$0xff]  ;;  %v9095_v48 = vld [vmem:[#allocation53_spill] sm:$0xff] }
 0x886   :  { %5731 = vmatpush1.bf16.msra.mxu0 %v9085_v13  ;;  %5795 = vmatpush1.bf16.msra.mxu1 %v9086_v0  ;;  %v9096_v13 = vld [vmem:[#allocation54_spill] sm:$0xff]  ;;  %v9097_v0 = vld [vmem:[#allocation55_spill] sm:$0xff] }
 0x887   :  { %5733 = vmatprep.subr.bf16.mxu0 %v9087_v37  ;;  %5797 = vmatprep.subr.bf16.mxu1 %v9088_v20  ;;  %v9098_v37 = vld [vmem:[#allocation56_spill] sm:$0xff]  ;;  %v9099_v20 = vld [vmem:[#allocation57_spill] sm:$0xff] }
 0x88a   :  { %5735 = vmatpush1.bf16.msra.mxu0 %v9089_v44  ;;  %5799 = vmatpush1.bf16.msra.mxu1 %v9090_v28  ;;  %v9100_v44 = vld [vmem:[#allocation58_spill] sm:$0xff]  ;;  %v9101_v28 = vld [vmem:[#allocation59_spill] sm:$0xff] }
 0x88b   :  { %5737 = vmatprep.subr.bf16.mxu0 %v9091_v55  ;;  %5801 = vmatprep.subr.bf16.mxu1 %v9092_v27  ;;  %v9102_v55 = vld [vmem:[#allocation60_spill] sm:$0xff]  ;;  %v9103_v27 = vld [vmem:[#allocation61_spill] sm:$0xff] }
 0x88e   :  { %5739 = vmatpush1.bf16.msra.mxu0 %v9093_v45  ;;  %5803 = vmatpush1.bf16.msra.mxu1 %v9094_v21  ;;  %v9104_v45 = vld [vmem:[#allocation62_spill] sm:$0xff]  ;;  %v9105_v21 = vld [vmem:[#allocation63_spill] sm:$0xff] }
 0x88f   :  { %5741 = vmatprep.subr.bf16.mxu0 %v9095_v48  ;;  %5805 = vmatprep.subr.bf16.mxu1 %v9096_v13  ;;  %v9106_v48 = vld [vmem:[#allocation64_spill] sm:$0xff]  ;;  %v9107_v13 = vld [vmem:[#allocation65_spill] sm:$0xff] }
 0x892   :  { %5743 = vmatpush1.bf16.msra.mxu0 %v9097_v0  ;;  %5807 = vmatpush1.bf16.msra.mxu1 %v9098_v37  ;;  %v9108_v0 = vld [vmem:[#allocation66_spill] sm:$0xff]  ;;  %v9109_v37 = vld [vmem:[#allocation67_spill] sm:$0xff] }
 0x893   :  { %5745 = vmatprep.subr.bf16.mxu0 %v9099_v20  ;;  %5809 = vmatprep.subr.bf16.mxu1 %v9100_v44  ;;  %v9110_v20 = vld [vmem:[#allocation68_spill] sm:$0xff]  ;;  %v9111_v44 = vld [vmem:[#allocation69_spill] sm:$0xff] }
 0x896   :  { %5747 = vmatpush1.bf16.msra.mxu0 %v9101_v28  ;;  %5811 = vmatpush1.bf16.msra.mxu1 %v9102_v55  ;;  %v9112_v28 = vld [vmem:[#allocation70_spill] sm:$0xff]  ;;  %v9113_v55 = vld [vmem:[#allocation71_spill] sm:$0xff] }
 0x897   :  { %5749 = vmatprep.subr.bf16.mxu0 %v9103_v27  ;;  %5813 = vmatprep.subr.bf16.mxu1 %v9104_v45  ;;  %v9114_v27 = vld [vmem:[#allocation72_spill] sm:$0xff]  ;;  %v9115_v45 = vld [vmem:[#allocation73_spill] sm:$0xff] }
 0x89a   :  { %5751 = vmatpush1.bf16.msra.mxu0 %v9105_v21  ;;  %5815 = vmatpush1.bf16.msra.mxu1 %v9106_v48  ;;  %v9116_v21 = vld [vmem:[#allocation74_spill] sm:$0xff] }
 0x89b   :  { %5753 = vmatprep.subr.bf16.mxu0 %v9107_v13  ;;  %5817 = vmatprep.subr.bf16.mxu1 %v9108_v0 }
 0x89e   :  { %5755 = vmatpush1.bf16.msra.mxu0 %v9109_v37  ;;  %5819 = vmatpush1.bf16.msra.mxu1 %v9110_v20 }
 0x89f   :  { %5757 = vmatprep.subr.bf16.mxu0 %v9111_v44  ;;  %5821 = vmatprep.subr.bf16.mxu1 %v9112_v28 }
 0x8a2   :  { %5759 = vmatpush1.bf16.msra.mxu0 %v9113_v55  ;;  %5823 = vmatpush1.bf16.msra.mxu1 %v9114_v27 }
 0x8a3   :  { %5825 = vmatprep.subr.bf16.mxu0 %v9115_v45  ;;  %5889 = vmatprep.subr.bf16.mxu1 %v9116_v21 }
 0x8f8   :  { %v3128_v48 = vpop.f32.mrb[12].mxu0  ;;  %v3199_v13 = vpop.f32.mrb[12].mxu1 }
 0x8f9   :  { %v5964_v0 = vadd.f32 %v3128_v48, %v9117_v63  ;;  %v3130_v2 = vpop.f32.mrb[13].mxu0  ;;  %v3201_v37 = vpop.f32.mrb[13].mxu1  ;;  %v5980_v27 = vadd.f32 %v3199_v13, %v8658_v56 }
 0x8fa   :  { %v5965_v20 = vadd.f32 %v3130_v2, %v9118_v36  ;;  %v5981_v28 = vadd.f32 %v3201_v37, %v8657_v43 }
 0x8fb   :  { %v3856_v15 = vmul.f32 -1.442695, %v5964_v0 }
 0x8fc   :  { %v3857_v44 = vmul.f32 -1.442695, %v5965_v20  ;;  %v3858_v55 = vmul.f32 -1.442695, %v5981_v28 }
 0x8fd   :  { %6277 = vpow2.f32 %v3856_v15 }
 0x8fe   :  { %6279 = vpow2.f32 %v3857_v44  ;;  %v9119_v44 = vld [vmem:[#allocation79_spill] sm:$0xff] }
 0x8ff   :  { %6281 = vpow2.f32 %v3858_v55 }
 0x900   :  { %6283 = vtanh.f32 %v5980_v27 }
 0x907   :  { %v6278_v45 = vpop.eup %6277 }
 0x908   :  { %v6280_v51 = vpop.eup %6279  ;;  %v3365_v21 = vadd.f32 1.0, %v6278_v45 }
 0x909   :  { %v3371_v6 = vadd.f32 1.0, %v6280_v51  ;;  %v6282_v48 = vpop.eup %6281 }
 0x90a   :  { %6285 = vrcp.f32 %v3365_v21  ;;  %v6284_v63 = vpop.eup %6283  ;;  %v3378_v15 = vadd.f32 1.0, %v6282_v48 }
 0x90b   :  { %6287 = vrcp.f32 %v3371_v6 }
 0x90c   :  { %6289 = vrcp.f32 %v3378_v15 }
 0x914   :  { %v6286_v2 = vpop.eup %6285 }
 0x915   :  { %v6288_v0 = vpop.eup %6287  ;;  %v3382_v20 = vmul.f32 %v6286_v2, %v6284_v63  ;;  %v9121_v63 = vld [vmem:[#allocation142_spill] sm:$0xff] }
 0x916   :  { %v3381_v36 = vmul.f32 %v6288_v0, %v9119_v44  ;;  %v6290_v13 = vpop.eup %6289 }
 0x918   :  { %v8019_v37 = vadd.f32 %v3382_v20, %v3381_v36 }
 0x91a   :  { %9120 = vst [vmem:[#allocation114_spill] sm:$0xff] %v8019_v37  ;;  %6291 = vtanh.f32 %v8019_v37 }
 0x924   :  { %v6292_v28 = vpop.eup %6291 }
 0x925   :  { %v8022_v55 = vmul.f32 %v6292_v28, %v6290_v13 }
 0x927   :  { %3862 = vst [vmem:[%s8125_s4 + $0x60] sm:$0xff] %v8022_v55 }
 0x938   :  { %v3270_v6 = vpop.f32.mrb[18].mxu0  ;;  %v3341_v51 = vpop.f32.mrb[18].mxu1 }
 0x939   :  { %v5986_v27 = vadd.f32 %v3270_v6, %v9121_v63  ;;  %v3272_v45 = vpop.f32.mrb[19].mxu0  ;;  %v3343_v21 = vpop.f32.mrb[19].mxu1  ;;  %v6002_v15 = vadd.f32 %v3341_v51, %v7088_v4 }
 0x93a   :  { %v5987_v36 = vadd.f32 %v3272_v45, %v7079_v5  ;;  %v6003_v0 = vadd.f32 %v3343_v21, %v7084_v46 }
 0x93b   :  { %v3859_v48 = vmul.f32 -1.442695, %v5986_v27 }
 0x93c   :  { %v3860_v2 = vmul.f32 -1.442695, %v5987_v36  ;;  %v3861_v20 = vmul.f32 -1.442695, %v6003_v0 }
 0x93d   :  { %6293 = vpow2.f32 %v3859_v48 }
 0x93e   :  { %6295 = vpow2.f32 %v3860_v2 }
 0x93f   :  { %6297 = vpow2.f32 %v3861_v20 }
 0x940   :  { %6299 = vtanh.f32 %v6002_v15 }
 0x947   :  { %v6294_v44 = vpop.eup %6293 }
 0x948   :  { %v6296_v13 = vpop.eup %6295  ;;  %v3389_v28 = vadd.f32 1.0, %v6294_v44 }
 0x949   :  { %v3395_v37 = vadd.f32 1.0, %v6296_v13  ;;  %v6298_v6 = vpop.eup %6297 }
 0x94a   :  { %6301 = vrcp.f32 %v3389_v28  ;;  %v6300_v63 = vpop.eup %6299  ;;  %v3402_v48 = vadd.f32 1.0, %v6298_v6 }
 0x94b   :  { %6303 = vrcp.f32 %v3395_v37 }
 0x94c   :  { %6305 = vrcp.f32 %v3402_v48 }
 0x954   :  { %v6302_v45 = vpop.eup %6301 }
 0x955   :  { %v6304_v27 = vpop.eup %6303  ;;  %v3406_v36 = vmul.f32 %v6302_v45, %v6300_v63  ;;  %v9145_v63 = vld [vmem:[#allocation114_spill] sm:$0xff] }
 0x956   :  { %v3405_v2 = vmul.f32 %v6304_v27, %v7876_v57  ;;  %v6306_v51 = vpop.eup %6305  ;;  %v9146_v45 = vld [vmem:[#allocation142_spill] sm:$0xff] }
 0x958   :  { %v8033_v21 = vadd.f32 %v3406_v36, %v3405_v2 }
 0x95a   :  { %6307 = vtanh.f32 %v8033_v21 }
 0x964   :  { %v6308_v0 = vpop.eup %6307 }
 0x965   :  { %v3409_v20 = vmul.f32 %v6308_v0, %v6306_v51 }
 0x967   :  { %3863 = vst [vmem:[%s8125_s4 + $0x68] sm:$0xff] %v3409_v20  ;;  %3477 = vmatprep.mubr.f32.mxu0 %v3409_v20  ;;  %3548 = vmatprep.mubr.f32.mxu1 %v3409_v20 }
 0x968   :  { %3478 = vmatmul.mubr.f32.vlgmr.msra.gmra.mrb[14].mxu0 %v8022_v55  ;;  %3549 = vmatmul.mubr.f32.vlgmr.msra.gmra.mrb[14].mxu1 %v8022_v55 }
 0x969   :  { %5827 = vmatpush1.bf16.msra.mxu0 %v8570_v62  ;;  %5891 = vmatpush1.bf16.msra.mxu1 %v8571_v61  ;;  %v9122_v62 = vld [vmem:[#allocation116_spill] sm:$0xff]  ;;  %v9123_v61 = vld [vmem:[#allocation117_spill] sm:$0xff] }
 0x96a   :  { %3619 = vmatprep.mubr.f32.mxu0 %v3409_v20  ;;  %3690 = vmatprep.mubr.f32.mxu1 %v3409_v20 }
 0x96b   :  { %5829 = vmatprep.subr.bf16.mxu0 %v8572_v31  ;;  %5893 = vmatprep.subr.bf16.mxu1 %v8573_v19  ;;  %v9124_v31 = vld [vmem:[#allocation118_spill] sm:$0xff]  ;;  %v9125_v19 = vld [vmem:[#allocation119_spill] sm:$0xff] }
 0x96d   :  { %5831 = vmatpush1.bf16.msra.mxu0 %v8574_v1  ;;  %5895 = vmatpush1.bf16.msra.mxu1 %v8662_v7  ;;  %v9126_v1 = vld [vmem:[#allocation120_spill] sm:$0xff]  ;;  %v9127_v7 = vld [vmem:[#allocation121_spill] sm:$0xff] }
 0x96e   :  { %5833 = vmatprep.subr.bf16.mxu0 %v8663_v32  ;;  %5897 = vmatprep.subr.bf16.mxu1 %v8664_v54  ;;  %v9128_v32 = vld [vmem:[#allocation122_spill] sm:$0xff]  ;;  %v9129_v54 = vld [vmem:[#allocation123_spill] sm:$0xff] }
 0x971   :  { %5835 = vmatpush1.bf16.msra.mxu0 %v8665_v8  ;;  %5899 = vmatpush1.bf16.msra.mxu1 %v8666_v39  ;;  %v9130_v8 = vld [vmem:[#allocation124_spill] sm:$0xff]  ;;  %v9132_v39 = vld [vmem:[#allocation126_spill] sm:$0xff] }
 0x972   :  { %5837 = vmatprep.subr.bf16.mxu0 %v8754_v12  ;;  %5901 = vmatprep.subr.bf16.mxu1 %v8755_v59  ;;  %v9143_v59 = vld [vmem:[#allocation137_spill] sm:$0xff] }
 0x975   :  { %5839 = vmatpush1.bf16.msra.mxu0 %v8756_v17  ;;  %5903 = vmatpush1.bf16.msra.mxu1 %v8757_v60 }
 0x976   :  { %5841 = vmatprep.subr.bf16.mxu0 %v8758_v22  ;;  %5905 = vmatprep.subr.bf16.mxu1 %v8846_v50 }
 0x979   :  { %5843 = vmatpush1.bf16.msra.mxu0 %v8847_v26  ;;  %5907 = vmatpush1.bf16.msra.mxu1 %v8761_v30 }
 0x97a   :  { %5845 = vmatprep.subr.bf16.mxu0 %v8848_v11  ;;  %5909 = vmatprep.subr.bf16.mxu1 %v8763_v42 }
 0x97d   :  { %5847 = vmatpush1.bf16.msra.mxu0 %v8764_v3  ;;  %5911 = vmatpush1.bf16.msra.mxu1 %v8765_v41 }
 0x97e   :  { %5849 = vmatprep.subr.bf16.mxu0 %v8766_v16  ;;  %5913 = vmatprep.subr.bf16.mxu1 %v8767_v40 }
 0x981   :  { %5851 = vmatpush1.bf16.msra.mxu0 %v8768_v47  ;;  %5915 = vmatpush1.bf16.msra.mxu1 %v8769_v18 }
 0x982   :  { %5853 = vmatprep.subr.bf16.mxu0 %v8770_v29  ;;  %5917 = vmatprep.subr.bf16.mxu1 %v8771_v34  ;;  %v9144_v29 = vld [vmem:[#allocation138_spill] sm:$0xff] }
 0x985   :  { %5855 = vmatpush1.bf16.msra.mxu0 %v8685_v10  ;;  %5919 = vmatpush1.bf16.msra.mxu1 %v8772_v33  ;;  %v9140_v10 = vld [vmem:[#allocation134_spill] sm:$0xff] }
 0x986   :  { %5857 = vmatprep.subr.bf16.mxu0 %v8687_v25  ;;  %5921 = vmatprep.subr.bf16.mxu1 %v8688_v38  ;;  %v9142_v25 = vld [vmem:[#allocation136_spill] sm:$0xff] }
 0x989   :  { %5859 = vmatpush1.bf16.msra.mxu0 %v8689_v24  ;;  %5923 = vmatpush1.bf16.msra.mxu1 %v8690_v49  ;;  %v9133_v24 = vld [vmem:[#allocation127_spill] sm:$0xff]  ;;  %v9134_v49 = vld [vmem:[#allocation128_spill] sm:$0xff] }
 0x98a   :  { %5861 = vmatprep.subr.bf16.mxu0 %v8691_v52  ;;  %5925 = vmatprep.subr.bf16.mxu1 %v8692_v58  ;;  %v9135_v52 = vld [vmem:[#allocation129_spill] sm:$0xff]  ;;  %v9136_v58 = vld [vmem:[#allocation130_spill] sm:$0xff] }
 0x98d   :  { %5863 = vmatpush1.bf16.msra.mxu0 %v8693_v14  ;;  %5927 = vmatpush1.bf16.msra.mxu1 %v8694_v9  ;;  %v9137_v14 = vld [vmem:[#allocation131_spill] sm:$0xff]  ;;  %v9138_v9 = vld [vmem:[#allocation132_spill] sm:$0xff] }
 0x98e   :  { %5865 = vmatprep.subr.bf16.mxu0 %v8695_v23  ;;  %5929 = vmatprep.subr.bf16.mxu1 %v8609_v35  ;;  %v9131_v35 = vld [vmem:[#allocation125_spill] sm:$0xff] }
 0x98f   :  { %v9139_v23 = vld [vmem:[#allocation133_spill] sm:$0xff] }
 0x991   :  { %5867 = vmatpush1.bf16.msra.mxu0 %v8696_v53  ;;  %5931 = vmatpush1.bf16.msra.mxu1 %v9122_v62  ;;  %v9141_v53 = vld [vmem:[#allocation135_spill] sm:$0xff] }
 0x992   :  { %5869 = vmatprep.subr.bf16.mxu0 %v9123_v61  ;;  %5933 = vmatprep.subr.bf16.mxu1 %v9124_v31 }
 0x995   :  { %5871 = vmatpush1.bf16.msra.mxu0 %v9125_v19  ;;  %5935 = vmatpush1.bf16.msra.mxu1 %v9126_v1 }
 0x996   :  { %5873 = vmatprep.subr.bf16.mxu0 %v9127_v7  ;;  %5937 = vmatprep.subr.bf16.mxu1 %v9128_v32 }
 0x999   :  { %5875 = vmatpush1.bf16.msra.mxu0 %v9129_v54  ;;  %5939 = vmatpush1.bf16.msra.mxu1 %v9130_v8 }
 0x99a   :  { %5877 = vmatprep.subr.bf16.mxu0 %v9131_v35  ;;  %5941 = vmatprep.subr.bf16.mxu1 %v9132_v39 }
 0x99d   :  { %5879 = vmatpush1.bf16.msra.mxu0 %v9133_v24  ;;  %5943 = vmatpush1.bf16.msra.mxu1 %v9134_v49 }
 0x99e   :  { %5881 = vmatprep.subr.bf16.mxu0 %v9135_v52  ;;  %5945 = vmatprep.subr.bf16.mxu1 %v9136_v58 }
 0x9a1   :  { %5883 = vmatpush1.bf16.msra.mxu0 %v9137_v14  ;;  %5947 = vmatpush1.bf16.msra.mxu1 %v9138_v9 }
 0x9a2   :  { %5885 = vmatprep.subr.bf16.mxu0 %v9139_v23  ;;  %5949 = vmatprep.subr.bf16.mxu1 %v9140_v10 }
 0x9a5   :  { %5887 = vmatpush1.bf16.msra.mxu0 %v9141_v53  ;;  %5951 = vmatpush1.bf16.msra.mxu1 %v9142_v25 }
 0x9a8   :  { %3620 = vmatmul.mubr.f32.vlgmr.msra.gmra.mrb[16].mxu0 %v8022_v55  ;;  %3691 = vmatmul.mubr.f32.vlgmr.msra.gmra.mrb[16].mxu1 %v8022_v55 }
 0xa3b   :  { %v3479_v38 = vpop.f32.mrb[14].mxu0  ;;  %v3550_v12 = vpop.f32.mrb[14].mxu1 }
 0xa3c   :  { %v5966_v17 = vadd.f32 %v3479_v38, %v9143_v59  ;;  %v3481_v60 = vpop.f32.mrb[15].mxu0  ;;  %v3552_v22 = vpop.f32.mrb[15].mxu1  ;;  %v5982_v41 = vadd.f32 %v3550_v12, %v8658_v56 }
 0xa3d   :  { %v5967_v34 = vadd.f32 %v3481_v60, %v9144_v29  ;;  %v5983_v42 = vadd.f32 %v3552_v22, %v8657_v43 }
 0xa3e   :  { %v3864_v30 = vmul.f32 -1.442695, %v5966_v17 }
 0xa3f   :  { %v3865_v33 = vmul.f32 -1.442695, %v5967_v34  ;;  %v3866_v3 = vmul.f32 -1.442695, %v5983_v42 }
 0xa40   :  { %6309 = vpow2.f32 %v3864_v30 }
 0xa41   :  { %6311 = vpow2.f32 %v3865_v33 }
 0xa42   :  { %6313 = vpow2.f32 %v3866_v3 }
 0xa43   :  { %6315 = vtanh.f32 %v5982_v41 }
 0xa4a   :  { %v6310_v16 = vpop.eup %6309 }
 0xa4b   :  { %v6312_v40 = vpop.eup %6311  ;;  %v3716_v47 = vadd.f32 1.0, %v6310_v16 }
 0xa4c   :  { %v3722_v18 = vadd.f32 1.0, %v6312_v40  ;;  %v6314_v50 = vpop.eup %6313 }
 0xa4d   :  { %6317 = vrcp.f32 %v3716_v47  ;;  %v6316_v26 = vpop.eup %6315  ;;  %v3729_v55 = vadd.f32 1.0, %v6314_v50 }
 0xa4e   :  { %6319 = vrcp.f32 %v3722_v18 }
 0xa4f   :  { %6321 = vrcp.f32 %v3729_v55 }
 0xa57   :  { %v6318_v11 = vpop.eup %6317 }
 0xa58   :  { %v6320_v57 = vpop.eup %6319  ;;  %v3733_v37 = vmul.f32 %v6318_v11, %v6316_v26 }
 0xa59   :  { %v3732_v15 = vmul.f32 %v6320_v57, %v9145_v63  ;;  %v6322_v56 = vpop.eup %6321 }
 0xa5b   :  { %v3734_v43 = vadd.f32 %v3733_v37, %v3732_v15 }
 0xa5d   :  { %6323 = vtanh.f32 %v3734_v43 }
 0xa67   :  { %v6324_v44 = vpop.eup %6323 }
 0xa68   :  { %v3736_v13 = vmul.f32 %v6324_v44, %v6322_v56 }
 0xa6a   :  { %3870 = vst [vmem:[%s8125_s4 + $0x70] sm:$0xff] %v3736_v13 }
 0xa7b   :  { %v3621_v28 = vpop.f32.mrb[16].mxu0  ;;  %v3692_v6 = vpop.f32.mrb[16].mxu1 }
 0xa7c   :  { %v5984_v27 = vadd.f32 %v3621_v28, %v9146_v45  ;;  %v3623_v36 = vpop.f32.mrb[17].mxu0  ;;  %v3694_v48 = vpop.f32.mrb[17].mxu1  ;;  %v6000_v61 = vadd.f32 %v3692_v6, %v7088_v4 }
 0xa7d   :  { %v5985_v2 = vadd.f32 %v3623_v36, %v7079_v5  ;;  %v6001_v20 = vadd.f32 %v3694_v48, %v7084_v46 }
 0xa7e   :  { %v3867_v51 = vmul.f32 -1.442695, %v5984_v27 }
 0xa7f   :  { %v3868_v0 = vmul.f32 -1.442695, %v5985_v2  ;;  %v3869_v62 = vmul.f32 -1.442695, %v6001_v20 }
 0xa80   :  { %6325 = vpow2.f32 %v3867_v51 }
 0xa81   :  { %6327 = vpow2.f32 %v3868_v0 }
 0xa82   :  { %6329 = vpow2.f32 %v3869_v62 }
 0xa83   :  { %6331 = vtanh.f32 %v6000_v61 }
 0xa8a   :  { %v6326_v31 = vpop.eup %6325 }
 0xa8b   :  { %v6328_v19 = vpop.eup %6327  ;;  %v3740_v1 = vadd.f32 1.0, %v6326_v31 }
 0xa8c   :  { %v3746_v7 = vadd.f32 1.0, %v6328_v19  ;;  %v6330_v32 = vpop.eup %6329 }
 0xa8d   :  { %6333 = vrcp.f32 %v3740_v1  ;;  %v6332_v54 = vpop.eup %6331  ;;  %v3753_v39 = vadd.f32 1.0, %v6330_v32 }
 0xa8e   :  { %6335 = vrcp.f32 %v3746_v7 }
 0xa8f   :  { %6337 = vrcp.f32 %v3753_v39 }
 0xa97   :  { %v6334_v5 = vpop.eup %6333 }
 0xa98   :  { %v6336_v8 = vpop.eup %6335  ;;  %v3757_v35 = vmul.f32 %v6334_v5, %v6332_v54 }
 0xa99   :  { %v3756_v24 = vmul.f32 %v6336_v8, %v8033_v21  ;;  %v6338_v4 = vpop.eup %6337 }
 0xa9b   :  { %v3758_v46 = vadd.f32 %v3757_v35, %v3756_v24 }
 0xa9d   :  { %6339 = vtanh.f32 %v3758_v46 }
 0xaa7   :  { %v6340_v49 = vpop.eup %6339 }
 0xaa8   :  { %v3760_v52 = vmul.f32 %v6340_v49, %v6338_v4 }
 0xaaa   :  { %3871 = vst [vmem:[%s8125_s4 + $0x78] sm:$0xff] %v3760_v52 }
 0xaab   :  { %3768 = vsyncpa [#allocation4], 1 }
 0xaac   :  { %3769 = vsyncpa [#allocation6], 1 }

</bundles_post_ra>
